<compile_context>
chip_gen: v7x
topology: tpu7x:2x2x1
jax: 0.10.0
libtpu: 0.0.40
codegen_flags: <defaults>
</compile_context>

<pallas_src>
import math

import jax
import jax.numpy as jnp
from jax.experimental import pallas as pl
from jax.experimental.pallas import tpu as pltpu


# ----------------------------------------------------------------------------- helpers
def _round_up(x, m):
    return (x + m - 1) // m * m


def build_positional_encoding(length, d_model):
    """Sinusoidal PE identical to PositionalEmbedding (base 1e6). Host/reference only."""
    position = jnp.arange(length, dtype=jnp.float32)[:, None]
    div_term = jnp.exp(jnp.arange(0, d_model, 2, dtype=jnp.float32)
                       * -(math.log(1000000.0) / d_model))
    ang = position * div_term
    pe = jnp.zeros((length, d_model), jnp.float32)
    pe = pe.at[:, 0::2].set(jnp.sin(ang))
    pe = pe.at[:, 1::2].set(jnp.cos(ang)[:, : d_model // 2])
    return pe


def init_token_conv_weight(key, c_in, d_model):
    """Kaiming normal (fan_in, leaky_relu a=0.01) on torch layout (d_model, c_in, 3),
    returned transposed to (3, c_in, d_model): w[k, i, o] == torch_weight[o, i, k]."""
    negative_slope = 0.01
    gain = math.sqrt(2.0 / (1.0 + negative_slope ** 2))
    std = gain / math.sqrt(c_in * 3)
    w_torch = std * jax.random.normal(key, (d_model, c_in, 3), dtype=jnp.float32)
    return jnp.transpose(w_torch, (2, 1, 0))


def _pe_constants(d_model, Dp):
    """Resident (8, Dp) constant: row 0 = per-column frequency, row 1 = even-column mask."""
    d_idx = jnp.arange(Dp, dtype=jnp.int32)
    freq = jnp.exp(-(d_idx - (d_idx % 2)).astype(jnp.float32)
                   * (math.log(1000000.0) / d_model))
    is_even = (d_idx % 2 == 0).astype(jnp.float32)
    pc = jnp.zeros((8, Dp), jnp.float32)
    pc = pc.at[0].set(freq).at[1].set(is_even)
    return pc


def _pick_tile(L, tl):
    """Sublane-aligned L tile; prefer one that divides L (skips the post-kernel slice)."""
    TL = _round_up(min(max(tl, 16), _round_up(L, 16)), 16)
    if L % 16 == 0:
        cand = min(TL, L)
        while cand >= 16 and L % cand != 0:
            cand -= 16
        if cand >= min(128, TL) and L % cand == 0:
            TL = cand
    return TL


# ----------------------------------------------------------------------------- kernel
def _pe_tile(pc_ref, tl, dp):
    """Sinusoidal PE (base 1e6) for the current (TL, Dp) tile, computed on the EUP."""
    l = pl.program_id(1)  # L-tile grid axis
    pos = (l * tl + jax.lax.broadcasted_iota(jnp.int32, (tl, dp), 0)).astype(jnp.float32)
    freq = pc_ref[0:1, :]          # (1, Dp)
    is_even = pc_ref[1:2, :]       # (1, Dp)
    ang = pos * freq
    return jnp.where(is_even > 0.5, jnp.sin(ang), jnp.cos(ang))


def _chr_lookup(ch_ref, tab_ref):
    """Embedding lookup as one-hot (TL, Nv) @ (Nv, Dp) matmul; table resident in VMEM."""
    tl = ch_ref.shape[1]
    nv = tab_ref.shape[0]
    ids = jax.lax.broadcasted_iota(jnp.int32, (tl, nv), 1)
    onehot = (ids == ch_ref[0]).astype(tab_ref.dtype)
    return jnp.dot(onehot, tab_ref[...], preferred_element_type=jnp.float32)


def _conv_kernel(xs_ref, ch_ref, w_ref, tab_ref, pc_ref, o_ref):
    # xs_ref : (1, TL, 3*c_in)  stacked [x[t-1], x[t], x[t+1]] (circular halo pre-applied)
    # ch_ref : (1, TL, 1)       int32 chromosome ids
    # w_ref  : (3*c_in, Dp)     folded circular-conv weight (resident)
    # tab_ref: (Nv, Dp)         chromosome embedding table (resident)
    # pc_ref : (8, Dp)          PE freq / parity constants (resident)
    # o_ref  : (1, TL, Dp)
    acc = jnp.dot(xs_ref[0], w_ref[...], preferred_element_type=jnp.float32)
    acc = acc + _chr_lookup(ch_ref, tab_ref)
    acc = acc + _pe_tile(pc_ref, o_ref.shape[1], o_ref.shape[2])
    o_ref[0] = acc.astype(o_ref.dtype)


def _identity_kernel(x_ref, ch_ref, tab_ref, pc_ref, o_ref):
    # Identity value-embedding branch (c_in == d_model): no conv matmul at all.
    acc = x_ref[0].astype(jnp.float32)
    acc = acc + _chr_lookup(ch_ref, tab_ref)
    acc = acc + _pe_tile(pc_ref, o_ref.shape[1], o_ref.shape[2])
    o_ref[0] = acc.astype(o_ref.dtype)


# ----------------------------------------------------------------------------- wrapper
def chr_data_embedding(x, chroms, conv_w, chr_table, *, tl=512,
                       compute_dtype=jnp.float32, out_dtype=None):
    """Fused CHRDataEmbedding forward (dropout treated as eval-mode identity).

    x        : (B, L, c_in) float
    chroms   : (B, L) int (ids in [0, 22))
    conv_w   : (3, c_in, d_model) conv weight, or None for the nn.Identity() branch
               (requires c_in == d_model)
    chr_table: (22, d_model) embedding table
    """
    B, L, c_in = x.shape
    n_vocab, d_model = chr_table.shape
    out_dtype = x.dtype if out_dtype is None else out_dtype

    Dp = _round_up(d_model, 128)              # lane-dense output / weight columns
    TL = _pick_tile(L, tl)                    # sublane-aligned sequence tile
    Lp = _round_up(L, TL)
    Nv = _round_up(n_vocab, 8)                # sublane-align the embedding table
    n_l = Lp // TL

    identity = conv_w is None
    if identity:
        assert c_in == d_model, "Identity branch requires c_in == d_model"

    # --- operand prep (pad only when needed) ---
    chr_tab = chr_table
    if Nv != n_vocab:
        chr_tab = jnp.pad(chr_tab, ((0, Nv - n_vocab), (0, 0)))
    if Dp != d_model:
        chr_tab = jnp.pad(chr_tab, ((0, 0), (0, Dp - d_model)))
    chr_tab = chr_tab.astype(compute_dtype)

    pc = _pe_constants(d_model, Dp)           # (8, Dp) f32 resident constant

    chroms_p = chroms.astype(jnp.int32)
    if Lp != L:
        chroms_p = jnp.pad(chroms_p, ((0, 0), (0, Lp - L)))
    ch = chroms_p[..., None]                  # (B, Lp, 1)

    itm = jnp.dtype(compute_dtype).itemsize
    out_itm = jnp.dtype(out_dtype).itemsize

    if identity:
        xv = x
        if Dp != d_model:
            xv = jnp.pad(xv, ((0, 0), (0, 0), (0, Dp - d_model)))
        if Lp != L:
            xv = jnp.pad(xv, ((0, 0), (0, Lp - L), (0, 0)))
        xv = xv.astype(compute_dtype)

        kernel = _identity_kernel
        operands = (xv, ch, chr_tab, pc)
        in_specs = [
            pl.BlockSpec((1, TL, Dp), lambda b, l: (b, l, 0)),   # x
            pl.BlockSpec((1, TL, 1), lambda b, l: (b, l, 0)),    # chrom ids
            pl.BlockSpec((Nv, Dp), lambda b, l: (0, 0)),         # chr table (resident)
            pl.BlockSpec((8, Dp), lambda b, l: (0, 0)),          # PE constants (resident)
        ]
        flops = 2 * B * Lp * Nv * Dp
        per_step_io = TL * Dp * itm + TL * 128 * 4 + TL * Dp * out_itm
        resident = Nv * Dp * itm + 8 * Dp * 4
        bytes_accessed = (B * Lp * Dp * itm + B * Lp * 4 + Nv * Dp * itm
                          + 8 * Dp * 4 + B * Lp * Dp * out_itm)
    else:
        # Circular 3-tap conv folded into ONE matmul: y[t] = [x[t-1], x[t], x[t+1]] @ W.
        K = 3 * c_in
        x_prev = jnp.roll(x, 1, axis=1)
        x_next = jnp.roll(x, -1, axis=1)
        xs = jnp.concatenate([x_prev, x, x_next], axis=-1)       # (B, L, 3*c_in)
        if Lp != L:
            xs = jnp.pad(xs, ((0, 0), (0, Lp - L), (0, 0)))
        xs = xs.astype(compute_dtype)

        w_flat = conv_w.reshape(K, d_model)                      # tap order matches concat
        if Dp != d_model:
            w_flat = jnp.pad(w_flat, ((0, 0), (0, Dp - d_model)))
        w_flat = w_flat.astype(compute_dtype)

        kernel = _conv_kernel
        operands = (xs, ch, w_flat, chr_tab, pc)
        in_specs = [
            pl.BlockSpec((1, TL, K), lambda b, l: (b, l, 0)),    # stacked x
            pl.BlockSpec((1, TL, 1), lambda b, l: (b, l, 0)),    # chrom ids
            pl.BlockSpec((K, Dp), lambda b, l: (0, 0)),          # conv weight (resident)
            pl.BlockSpec((Nv, Dp), lambda b, l: (0, 0)),         # chr table (resident)
            pl.BlockSpec((8, Dp), lambda b, l: (0, 0)),          # PE constants (resident)
        ]
        flops = 2 * B * Lp * (K + Nv) * Dp
        per_step_io = TL * _round_up(K, 128) * itm + TL * 128 * 4 + TL * Dp * out_itm
        resident = (K + Nv) * Dp * itm + 8 * Dp * 4
        bytes_accessed = (B * Lp * K * itm + B * Lp * 4 + (K + Nv) * Dp * itm
                          + 8 * Dp * 4 + B * Lp * Dp * out_itm)

    # VMEM limit sized from the actual tiles (double-buffered) instead of a hardcoded value.
    vmem_limit = int(min(max(2 * (per_step_io + resident) + (4 << 20), 8 << 20), 120 << 20))

    y = pl.pallas_call(
        kernel,
        out_shape=jax.ShapeDtypeStruct((B, Lp, Dp), out_dtype),
        grid_spec=pltpu.PrefetchScalarGridSpec(
            num_scalar_prefetch=0,
            grid=(B, n_l),
            in_specs=in_specs,
            out_specs=pl.BlockSpec((1, TL, Dp), lambda b, l: (b, l, 0)),
        ),
        compiler_params=pltpu.CompilerParams(
            dimension_semantics=("parallel", "parallel"),
            vmem_limit_bytes=vmem_limit,
        ),
        cost_estimate=pl.CostEstimate(flops=int(flops),
                                      transcendentals=int(B * Lp * Dp),
                                      bytes_accessed=int(bytes_accessed)),
    )(*operands)

    if Lp != L or Dp != d_model:
        y = y[:, :L, :d_model]
    return y


# ----------------------------------------------------------------------------- reference
def reference_chr_data_embedding(x, chroms, conv_w, chr_table):
    B, L, c_in = x.shape
    d_model = chr_table.shape[1]
    if conv_w is None:
        val = x
    else:
        x_prev = jnp.roll(x, 1, axis=1)
        x_next = jnp.roll(x, -1, axis=1)
        val = (jnp.einsum("blc,cd->bld", x_prev, conv_w[0])
               + jnp.einsum("blc,cd->bld", x, conv_w[1])
               + jnp.einsum("blc,cd->bld", x_next, conv_w[2]))
    pe = build_positional_encoding(L, d_model)[None]
    return val + pe + chr_table[chroms]


# ----------------------------------------------------------------------------- demo
if __name__ == "__main__":
    key = jax.random.PRNGKey(0)
    k1, k2, k3, k4 = jax.random.split(key, 4)

    # Case 1: TokenEmbedding path, lane-dense d_model, multiple L tiles, 2 batches.
    B, L, c_in, d_model = 2, 256, 4, 128
    x = jax.random.normal(k1, (B, L, c_in), dtype=jnp.float32)
    chroms = jax.random.randint(k2, (B, L), 0, 22, dtype=jnp.int32)
    conv_w = init_token_conv_weight(k3, c_in, d_model)
    chr_table = jax.random.normal(k4, (22, d_model), dtype=jnp.float32)

    y = jax.block_until_ready(chr_data_embedding(x, chroms, conv_w, chr_table, tl=128))
    y_ref = reference_chr_data_embedding(x, chroms, conv_w, chr_table)
    assert y.shape == (B, L, d_model)
    assert jnp.allclose(y, y_ref, atol=2e-3, rtol=1e-3), \
        float(jnp.max(jnp.abs(y - y_ref)))

    # Case 2: ragged small shapes exercising the d_model->128, vocab->24, L->TL padding paths.
    B2, L2, c2, d2 = 2, 40, 6, 32
    x2 = jax.random.normal(k1, (B2, L2, c2), dtype=jnp.float32)
    chroms2 = jax.random.randint(k2, (B2, L2), 0, 22, dtype=jnp.int32)
    conv_w2 = init_token_conv_weight(k3, c2, d2)
    chr_table2 = jax.random.normal(k4, (22, d2), dtype=jnp.float32)
    y2 = jax.block_until_ready(chr_data_embedding(x2, chroms2, conv_w2, chr_table2))
    y2_ref = reference_chr_data_embedding(x2, chroms2, conv_w2, chr_table2)
    assert y2.shape == (B2, L2, d2)
    assert jnp.allclose(y2, y2_ref, atol=2e-3, rtol=1e-3)

    # Case 3: Identity value-embedding branch (c_in == d_model): no conv matmul, no stacking.
    B3, L3, d3 = 2, 64, 128
    x3 = jax.random.normal(k1, (B3, L3, d3), dtype=jnp.float32)
    chroms3 = jax.random.randint(k2, (B3, L3), 0, 22, dtype=jnp.int32)
    chr_table3 = jax.random.normal(k4, (22, d3), dtype=jnp.float32)
    y3 = jax.block_until_ready(chr_data_embedding(x3, chroms3, None, chr_table3))
    y3_ref = reference_chr_data_embedding(x3, chroms3, None, chr_table3)
    assert y3.shape == (B3, L3, d3)
    assert jnp.allclose(y3, y3_ref, atol=2e-3, rtol=1e-3)

    # Case 4: bf16 operands + bf16 output (bandwidth-bound path), f32 accumulation in-kernel.
    y4 = jax.block_until_ready(
        chr_data_embedding(x, chroms, conv_w, chr_table, tl=128,
                           compute_dtype=jnp.bfloat16, out_dtype=jnp.bfloat16))
    assert y4.dtype == jnp.bfloat16
    assert jnp.allclose(y4.astype(jnp.float32), y_ref, atol=0.25, rtol=0.05)

    print("KERNEL_OK")
</pallas_src>

<mosaic_0001>
module attributes {stable_mosaic.version = 11 : i64} {
  func.func @_conv_kernel(%arg0: i32, %arg1: i32, %arg2: memref<1x128x12xf32, #tpu.memory_space<vmem>>, %arg3: memref<1x128x1xi32, #tpu.memory_space<vmem>>, %arg4: memref<12x128xf32, #tpu.memory_space<vmem>>, %arg5: memref<24x128xf32, #tpu.memory_space<vmem>>, %arg6: memref<8x128xf32, #tpu.memory_space<vmem>>, %arg7: memref<1x128x128xf32, #tpu.memory_space<vmem>>) attributes {dimension_semantics = [#tpu.dimension_semantics<parallel>, #tpu.dimension_semantics<parallel>], iteration_bounds = array<i64: 2, 2>, scalar_prefetch = 0 : i64, scratch_operands = 0 : i64, tpu.core_type = #tpu.core_type<tc>, window_params = [{transform_indices = @transform_0, window_bounds = array<i64: 1, 128, 12>}, {transform_indices = @transform_1, window_bounds = array<i64: 1, 128, 1>}, {pipeline_mode = #tpu.pipeline_mode<synchronous>, transform_indices = @transform_2, window_bounds = array<i64: 12, 128>}, {pipeline_mode = #tpu.pipeline_mode<synchronous>, transform_indices = @transform_3, window_bounds = array<i64: 24, 128>}, {pipeline_mode = #tpu.pipeline_mode<synchronous>, transform_indices = @transform_4, window_bounds = array<i64: 8, 128>}, {transform_indices = @transform_5, window_bounds = array<i64: 1, 128, 128>}]} {
    %c0 = arith.constant 0 : index
    %c0_0 = arith.constant 0 : index
    %c0_1 = arith.constant 0 : index
    %0 = vector.load %arg2[%c0, %c0_0, %c0_1] : memref<1x128x12xf32, #tpu.memory_space<vmem>>, vector<1x128x12xf32>
    %1 = vector.shape_cast %0 : vector<1x128x12xf32> to vector<128x12xf32>
    %c0_2 = arith.constant 0 : index
    %c0_3 = arith.constant 0 : index
    %2 = vector.load %arg4[%c0_2, %c0_3] : memref<12x128xf32, #tpu.memory_space<vmem>>, vector<12x128xf32>
    %cst = arith.constant dense<0.000000e+00> : vector<128x128xf32>
    %3 = tpu.matmul %1, %2, %cst {dimension_numbers = #tpu.dot_dimension_numbers<[1], [0], [0], [1], [0, 0, 1, 1], [], []>} : vector<128x12xf32>, vector<12x128xf32>, vector<128x128xf32> -> vector<128x128xf32>
    %4 = tpu.iota {dimensions = array<i32: 1>} : vector<128x24xi32>
    %c0_4 = arith.constant 0 : index
    %c0_5 = arith.constant 0 : index
    %c0_6 = arith.constant 0 : index
    %5 = vector.load %arg3[%c0_4, %c0_5, %c0_6] : memref<1x128x1xi32, #tpu.memory_space<vmem>>, vector<1x128x1xi32>
    %6 = vector.shape_cast %5 : vector<1x128x1xi32> to vector<128x1xi32>
    %7 = vector.broadcast %6 : vector<128x1xi32> to vector<128x24xi32>
    %8 = arith.cmpi eq, %4, %7 : vector<128x24xi32>
    %9 = arith.extui %8 : vector<128x24xi1> to vector<128x24xi32>
    %10 = arith.sitofp %9 : vector<128x24xi32> to vector<128x24xf32>
    %c0_7 = arith.constant 0 : index
    %c0_8 = arith.constant 0 : index
    %11 = vector.load %arg5[%c0_7, %c0_8] : memref<24x128xf32, #tpu.memory_space<vmem>>, vector<24x128xf32>
    %cst_9 = arith.constant dense<0.000000e+00> : vector<128x128xf32>
    %12 = tpu.matmul %10, %11, %cst_9 {dimension_numbers = #tpu.dot_dimension_numbers<[1], [0], [0], [1], [0, 0, 1, 1], [], []>} : vector<128x24xf32>, vector<24x128xf32>, vector<128x128xf32> -> vector<128x128xf32>
    %13 = arith.addf %3, %12 : vector<128x128xf32>
    %c128_i32 = arith.constant 128 : i32
    %14 = arith.muli %arg1, %c128_i32 : i32
    %15 = tpu.iota {dimensions = array<i32: 0>} : vector<128x128xi32>
    %16 = vector.broadcast %14 : i32 to vector<128x128xi32>
    %17 = arith.addi %16, %15 : vector<128x128xi32>
    %18 = arith.sitofp %17 : vector<128x128xi32> to vector<128x128xf32>
    %c0_10 = arith.constant 0 : index
    %c0_11 = arith.constant 0 : index
    %19 = vector.load %arg6[%c0_10, %c0_11] : memref<8x128xf32, #tpu.memory_space<vmem>>, vector<1x128xf32>
    %c1 = arith.constant 1 : index
    %c0_12 = arith.constant 0 : index
    %20 = vector.load %arg6[%c1, %c0_12] : memref<8x128xf32, #tpu.memory_space<vmem>>, vector<1x128xf32>
    %21 = vector.broadcast %19 : vector<1x128xf32> to vector<128x128xf32>
    %22 = arith.mulf %18, %21 : vector<128x128xf32>
    %cst_13 = arith.constant 5.000000e-01 : f32
    %23 = vector.broadcast %cst_13 : f32 to vector<1x128xf32>
    %24 = arith.cmpf ogt, %20, %23 : vector<1x128xf32>
    %25 = math.sin %22 : vector<128x128xf32>
    %26 = math.cos %22 : vector<128x128xf32>
    %27 = vector.shape_cast %24 : vector<1x128xi1> to vector<1x128xi1>
    %28 = vector.broadcast %27 : vector<1x128xi1> to vector<128x128xi1>
    %29 = arith.select %28, %25, %26 : vector<128x128xi1>, vector<128x128xf32>
    %30 = arith.addf %13, %29 : vector<128x128xf32>
    %c0_14 = arith.constant 0 : index
    %c0_15 = arith.constant 0 : index
    %c0_16 = arith.constant 0 : index
    %31 = vector.load %arg7[%c0_14, %c0_15, %c0_16] : memref<1x128x128xf32, #tpu.memory_space<vmem>>, vector<1x128x128xf32>
    %32 = vector.shape_cast %31 : vector<1x128x128xf32> to vector<128x128xf32>
    %33 = vector.shape_cast %30 : vector<128x128xf32> to vector<1x128x128xf32>
    tpu.vector_store %arg7[%c0_14, %c0_15, %c0_16], %33 {strides = array<i32>} : memref<1x128x128xf32, #tpu.memory_space<vmem>>, vector<1x128x128xf32>,
    return
  }
  func.func @transform_0(%arg0: i32, %arg1: i32) -> (i32, i32, i32) {
    %c0_i32 = arith.constant 0 : i32
    %c0_i32_0 = arith.constant 0 : i32
    return %arg0, %arg1, %c0_i32 : i32, i32, i32
  }
  func.func @transform_1(%arg0: i32, %arg1: i32) -> (i32, i32, i32) {
    %c0_i32 = arith.constant 0 : i32
    %c0_i32_0 = arith.constant 0 : i32
    return %arg0, %arg1, %c0_i32 : i32, i32, i32
  }
  func.func @transform_2(%arg0: i32, %arg1: i32) -> (i32, i32) {
    %c0_i32 = arith.constant 0 : i32
    %c0_i32_0 = arith.constant 0 : i32
    %c0_i32_1 = arith.constant 0 : i32
    return %c0_i32, %c0_i32_0 : i32, i32
  }
  func.func @transform_3(%arg0: i32, %arg1: i32) -> (i32, i32) {
    %c0_i32 = arith.constant 0 : i32
    %c0_i32_0 = arith.constant 0 : i32
    %c0_i32_1 = arith.constant 0 : i32
    return %c0_i32, %c0_i32_0 : i32, i32
  }
  func.func @transform_4(%arg0: i32, %arg1: i32) -> (i32, i32) {
    %c0_i32 = arith.constant 0 : i32
    %c0_i32_0 = arith.constant 0 : i32
    %c0_i32_1 = arith.constant 0 : i32
    return %c0_i32, %c0_i32_0 : i32, i32
  }
  func.func @transform_5(%arg0: i32, %arg1: i32) -> (i32, i32, i32) {
    %c0_i32 = arith.constant 0 : i32
    %c0_i32_0 = arith.constant 0 : i32
    return %arg0, %arg1, %c0_i32 : i32, i32, i32
  }
}

</mosaic_0001>

<bundles_post_ra>
// kernel: tpu_custom_call.1
= control target key start
LH: loop header
LB: loop body
LE: loop exit
PB: predicated region body
PF: predicated region fallthrough
CT: control target
= control target key end

     0   :  { %10 = vsyncpa [#allocation3], 0  ;;  %s7121_s0 = inlined_call_operand.vmem [shape: f32[2,256,12], index: 0, kind: input, shape index: {}]   ;;  %s7122_s1 = inlined_call_operand.vmem [shape: s32[2,256,1], index: 1, kind: input, shape index: {}]   ;;  %s7123_s2 = inlined_call_operand.vmem [shape: f32[12,128], index: 2, kind: input, shape index: {}]   ;;  %s7124_s3 = inlined_call_operand.vmem [shape: f32[24,128], index: 3, kind: input, shape index: {}]   ;;  %s7125_s4 = inlined_call_operand.vmem [shape: f32[8,128], index: 4, kind: input, shape index: {}]   ;;  %s7126_s5 = inlined_call_operand.hbm [shape: f32[2,256,128], index: 5, kind: output, shape index: {}]  }
   0x1   :  { %12 = vsyncpa [#allocation3 + $0x1], 0  ;;  %s5044_s18 = smov 0   ;;  %s5046_s19 = smov 0  }
   0x2   :  { %s5048_s20 = smov 0   ;;  %s5050_s21 = smov 0  }
   0x3   :  { %s5052_s22 = smov 0   ;;  %s5054_s23 = smov 0  }
   0x4   :  { %s5056_s24 = smov 0   ;;  %s5058_s25 = smov 0  }
   0x5 LB: > { %s4373_s26 = sadd.s32 4294967295, %s5000_s25   ;;  %s4374_s27 = sadd.s32 4294967294, %s5000_s25   ;;  %s5000_s25 = sphi %s5058_s25, %s18_s25   ;;  %s4996_s24 = sphi %s5056_s24, %s7183_s24   ;;  %s4992_s23 = sphi %s5054_s23, %s7182_s23   ;;  %s4988_s22 = sphi %s5052_s22, %s7181_s22   ;;  %s4984_s21 = sphi %s5050_s21, %s7180_s21   ;;  %s4980_s20 = sphi %s5048_s20, %s7179_s20   ;;  %s4976_s19 = sphi %s5046_s19, %s7178_s19   ;;  %s4972_s18 = sphi %s5044_s18, %s7177_s18  }
   0x6   : > { %s27_s28 = sadd.s32 1, %s4992_s23  ;;  %s30_s29 = sadd.s32 1, %s4996_s24 }
   0x7   : > { %p28_p0 = scmp.ge.s32.totalorder %s27_s28, 2  ;;  %p168_p1 = scmp.ne.s32.totalorder %s4980_s20, %s4976_s19 }
   0x8   : > { %p169_p2 = scmp.eq.s32.totalorder %s4373_s26, 3  ;;  %p174_p5 = scmp.ne.s32.totalorder %s4976_s19, %s4972_s18 }
   0x9   : > { %s7185_s28 = smov (%p28_p0, %s27_s28), 0  ;;  %s7187_s29 = smov (!%p28_p0, %s30_s29), %s4996_s24 }
   0xa   : > { %s154_s30 = ssub.s32 %s4992_s23, %s7185_s28  ;;  %p5095_p3 = por %p169_p2, %p168_p1 }
   0xb   : > { %p32_p4 = scmp.ge.s32.totalorder %s7187_s29, 2  ;;  %p175_p6 = scmp.eq.s32.totalorder %s4374_s27, 3 }
   0xc   : > { %p4377_p7 = scmp.ge.s32.totalorder %s5000_s25, 1  ;;  %p228_p9 = scmp.lt.s32.totalorder %s5000_s25, 5 }
   0xd   : > { %s7189_s29 = smov (%p32_p4, %s7187_s29), 0  ;;  %p5104_p8 = por %p175_p6, %p174_p5 }
   0xe   : > { %7139 = sst [smem:[#allocation5_spill]] %s7189_s29  ;;  %s153_s8 = ssub.s32 %s4996_s24, %s7189_s29 }
   0xf   : > { %s158_s9 = sadd.s32 1, %s4980_s20  ;;  %s155_s10 = sor.u32 %s154_s30, %s153_s8 }
  0x10   : > { %p229_p10 = pnand %p4377_p7, %p228_p9  ;;  %p156_p11 = scmp.eq.s32.totalorder %s155_s10, 0 }
  0x11   : > { %s5116_s12 = sshll.u32 (!%p229_p10), %s4984_s21, 4  ;;  %p270_p12 = scmp.lt.s32.totalorder (!%p229_p10), %s4988_s22, 1  ;;  %v5002_v0 = vmov (!%p229_p10), 0   ;;  %v422_v1 = vld [vmem:[%s7124_s3] sm:$0xff] (!%p229_p10)  ;;  %v423_v2 = vld [vmem:[%s7124_s3 + $0x8] sm:$0xff] (!%p229_p10)  ;;  %vm668_vm0 = vcmask (!%p229_p10), 1043456   ;;  %v308_v40 = vlaneseq (!%p229_p10) }
  0x12   : > { %s5113_s11 = scalar_select %p156_p11, %s4980_s20, %s158_s9  }
  0x13   : > { %232 = sbr.rel (%p229_p10) target bundleno = 682 (0x2aa), region = 40  ;;  %4838 = vset.pattern.permute.xlu1 (!%p229_p10), %v5002_v0  ;;  %4837 = vset.pattern.permute.xlu0 (!%p229_p10), %v5002_v0  ;;  %p272_p13 = scmp.lt.s32.totalorder (!%p229_p10), %s5116_s12, 31  ;;  %v4665_v3 = vpack.c.bf16 (!%p229_p10), %v423_v2, %v422_v1  ;;  %v306_v4 = vld [vmem:[%s7123_s2] sm:$0xff] (!%p229_p10)  ;;  %v307_v5 = vld [vmem:[%s7123_s2 + $0x8] sm:$0xf] (!%p229_p10)  ;;  %vm619_vm1 = vcmask (!%p229_p10), 97280  }
  0x14   : > { %v4669_v10 = vpack.c.bf16 (!%p229_p10), %v307_v5, %v306_v4  ;;  %vm5003_vm2 = vmmov (!%p229_p10), 1   ;;  %v424_v11 = vld [vmem:[%s7124_s3 + $0x10] sm:$0xff] (!%p229_p10)  ;;  %v5197_v41 = vand.u32 (!%p229_p10), 127, %v308_v40  ;;  %v5199_v42 = vshrl.u32 (!%p229_p10), %v308_v40, 7  ;;  %v5223_v59 = vld [vmem:[%s7125_s4] ss:$0 sm:$0xff] (!%p229_p10) }
  0x15   : > { %4666 = vmatprep.subr.bf16.mxu1 (!%p229_p10), %v4665_v3  ;;  %vm4670_vm3 = vmpackc.low (!%p229_p10), %vm668_vm0, %vm5003_vm2  ;;  %vm425_vm4 = vcmask (!%p229_p10), 195584   ;;  %v5004_v45 = vmov (!%p229_p10), 0.0  }
  0x16   : > { %4668 = vmatpush3.bf16.msra.mxu1 (!%p229_p10), %v4665_v3  ;;  %4671 = vmatprep.subr.msk.bf16.mxu0 (!%p229_p10), %vm4670_vm3, %v4669_v10  ;;  %v820_v49 = vadd.s32 (!%p229_p10), 8, %v5199_v42  ;;  %v822_v58 = vadd.s32 (!%p229_p10), 24, %v5199_v42 }
  0x17   : > { %4611 = vmatprep.subr.mxu1 (!%p229_p10), %v424_v11  ;;  %4674 = vmatpush3.bf16.msk.msra.mxu0 (!%p229_p10), %vm4670_vm3, %v4669_v10 }
  0x1a   : > { %s271_s13 = scalar_select %p270_p12, %s4988_s22, 1  ;;  %4612 = vmatpush3.msra.mxu1 %v424_v11 }
  0x1b   : > { %s273_s14 = scalar_select %p272_p13, %s5116_s12, 31 }
  0x1c   : > { %s4380_s15 = sshll.u32 %s271_s13, 5 }
  0x1d   : > { %s275_s16 = sadd.s32 %s4380_s15, %s273_s14 }
  0x1e   : > { %s4381_s17 = sshll.u32 %s275_s16, 3  ;;  %s266_s16 = sand.u32 1, %s4976_s19  }
  0x1f   : > { %s5133_s29 = scalar_lea.vmem %s7122_s1, %s4381_s17  ;;  %s5148_s30 = scalar_lea.vmem %s7121_s0, %s4381_s17 }
  0x20   : > { %v312_v6 = vld [vmem:[%s5133_s29 + $0x10] sm:$0xff]  ;;  %v310_v7 = vld [vmem:[%s5133_s29] sm:$0xff]  ;;  %v313_v8 = vld [vmem:[%s5133_s29 + $0x18] sm:$0xff]  ;;  %s6093_s26 = sshll.u32 %s266_s16, 7  ;;  %s7069_s15 = scalar_lea.sflag [#allocation3], %s266_s16 }
  0x21   : > { %333 = vperm.xlu1 %4838, %v312_v6   ;;  %327 = vperm.xlu0 %4837, %v310_v7   ;;  %v311_v9 = vld [vmem:[%s5133_s29 + $0x8] sm:$0xff]  ;;  %v314_v13 = vld [vmem:[%s5133_s29 + $0x20] sm:$0xff]  ;;  %v292_v16 = vld [vmem:[%s5148_s30 + $0x10] sm:$0xff]  ;;  %s6133_s27 = scalar_lea.vmem [#allocation2], %s6093_s26 }
  0x22   : > { %v315_v12 = vld [vmem:[%s5133_s29 + $0x28] sm:$0xff]  ;;  %v290_v14 = vld [vmem:[%s5148_s30] sm:$0xff]  ;;  %v317_v17 = vld [vmem:[%s5133_s29 + $0x38] sm:$0xff] }
  0x23   : > { %4641 = vmatprep.mubr.msk.f32.mxu0 %vm619_vm1, %v290_v14  ;;  %v291_v15 = vld [vmem:[%s5148_s30 + $0x8] sm:$0xff]  ;;  %v316_v18 = vld [vmem:[%s5133_s29 + $0x30] sm:$0xff]  ;;  %v293_v19 = vld [vmem:[%s5148_s30 + $0x18] sm:$0xff] }
  0x24   : > { %4642 = vmatmul.mubr.msk.f32.vlgmr.msra.gmra.mrb[0].mxu0 %vm619_vm1, %v291_v15  ;;  %v294_v20 = vld [vmem:[%s5148_s30 + $0x20] sm:$0xff]  ;;  %v319_v21 = vld [vmem:[%s5133_s29 + $0x48] sm:$0xff]  ;;  %v296_v24 = vld [vmem:[%s5148_s30 + $0x30] sm:$0xff] }
  0x25   : > { %336 = vperm.xlu1 %4838, %v313_v8   ;;  %330 = vperm.xlu0 %4837, %v311_v9   ;;  %v318_v22 = vld [vmem:[%s5133_s29 + $0x40] sm:$0xff]  ;;  %v295_v23 = vld [vmem:[%s5148_s30 + $0x28] sm:$0xff]  ;;  %v321_v25 = vld [vmem:[%s5133_s29 + $0x58] sm:$0xff] }
  0x26   : > { %4644 = vmatprep.mubr.msk.f32.mxu0 %vm619_vm1, %v292_v16  ;;  %v320_v26 = vld [vmem:[%s5133_s29 + $0x50] sm:$0xff]  ;;  %v297_v27 = vld [vmem:[%s5148_s30 + $0x38] sm:$0xff]  ;;  %v298_v28 = vld [vmem:[%s5148_s30 + $0x40] sm:$0xff] }
  0x27   : > { %v323_v29 = vld [vmem:[%s5133_s29 + $0x68] sm:$0xff]  ;;  %v322_v30 = vld [vmem:[%s5133_s29 + $0x60] sm:$0xff]  ;;  %v300_v32 = vld [vmem:[%s5148_s30 + $0x50] sm:$0xff] }
  0x28   : > { %4645 = vmatmul.mubr.msk.f32.gmra.mrb[2].mxu0 %vm619_vm1, %v293_v19  ;;  %v299_v31 = vld [vmem:[%s5148_s30 + $0x48] sm:$0xff]  ;;  %v325_v33 = vld [vmem:[%s5133_s29 + $0x78] sm:$0xff]  ;;  %v324_v34 = vld [vmem:[%s5133_s29 + $0x70] sm:$0xff]  ;;  %s4434_s29 = sshll.u32 %s4984_s21, 7  ;;  %s4566_s21 = sshll.u32 %s4988_s22, 5 }
  0x29   : > { %342 = vperm.xlu1 %4838, %v315_v12   ;;  %339 = vperm.xlu0 %4837, %v314_v13   ;;  %v301_v35 = vld [vmem:[%s5148_s30 + $0x58] sm:$0xff]  ;;  %v302_v36 = vld [vmem:[%s5148_s30 + $0x60] sm:$0xff]  ;;  %v303_v37 = vld [vmem:[%s5148_s30 + $0x68] sm:$0xff]  ;;  %v5209_v51 = vstv %s4434_s29  ;;  %s4270_s17 = sadd.s32 %s4566_s21, %s5116_s12  ;;  %s4273_s22 = sshll.u32 %s6133_s27, 4  ;;  %s7063_s22 = int_to_ptr.vmem [resolvable:$true] %s4273_s22 }
  0x2a   : > { %4647 = vmatprep.mubr.msk.f32.mxu0 %vm619_vm1, %v294_v20  ;;  %v304_v38 = vld [vmem:[%s5148_s30 + $0x70] sm:$0xff]  ;;  %v305_v39 = vld [vmem:[%s5148_s30 + $0x78] sm:$0xff]  ;;  %v837_v53 = vadd.s32 %v5209_v51, %v820_v49  ;;  %v836_v54 = vadd.s32 %v5209_v51, %v5199_v42  ;;  %v839_v1 = vadd.s32 %v5209_v51, %v822_v58  ;;  %s4567_s10 = sshll.u32 %s4270_s17, 7  ;;  %s4906_s26 = scalar_lea.vmem %s7063_s22, 2048 }
  0x2b   : > { %s7059_s14 = scalar_lea.hbm %s7126_s5, %s4567_s10  ;;  %p4907_p0 = scmp.ne.s32.totalorder %s7063_s22, %s4906_s26 }
  0x2c   : > { %4648 = vmatmul.mubr.msk.f32.gmra.mrb[4].mxu0 %vm619_vm1, %v295_v23  ;;  %v853_v57 = vcvt.s32.f32 %v837_v53  ;;  %v852_v60 = vcvt.s32.f32 %v836_v54  ;;  %v855_v6 = vcvt.s32.f32 %v839_v1  ;;  %v821_v23 = vadd.s32 16, %v5199_v42  ;;  %s5011_s30 = smov [#allocation2]  }
  0x2d   : > { %348 = vperm.xlu1 %4838, %v317_v17   ;;  %345 = vperm.xlu0 %4837, %v316_v18   ;;  %v7129_v54 = vmov 2131351028   ;;  %p4908_p1 = pnand %p4907_p0, %p5095_p3  ;;  %s4910_s8 = sshll.u32 %s5011_s30, 4  ;;  %s4911_s8 = int_to_ptr.vmem [resolvable:$false] %s4910_s8 }
  0x2e   : > { %4650 = vmatprep.mubr.msk.f32.mxu0 %vm619_vm1, %v296_v24  ;;  %v5228_v63 = vmul.f32 %v5223_v59, %v853_v57  ;;  %v5234_v2 = vmul.f32 %v5223_v59, %v852_v60  ;;  %v5243_v11 = vmul.f32 %v5223_v59, %v855_v6  ;;  %s4912_s9 = scalar_lea.vmem %s4911_s8, 4096  ;;  %p4913_p4 = scmp.lt.s32.totalorder %s7063_s22, %s4911_s8 }
  0x2f   : > { %p4909_p2 = pneg %p4908_p1  ;;  %p4914_p5 = scmp.lt.s32.totalorder %s4912_s9, %s4906_s26 }
  0x30   : > { %4651 = vmatmul.mubr.msk.f32.gmra.mrb[6].mxu0 %vm619_vm1, %v297_v27  ;;  %v998_v5 = vand.u32 2139095040, %v5228_v63  ;;  %v894_v7 = vand.u32 2139095040, %v5234_v2  ;;  %v1206_v16 = vand.u32 2139095040, %v5243_v11 }
  0x31   : > { %354 = vperm.xlu1 %4838, %v319_v21   ;;  %351 = vperm.xlu0 %4837, %v318_v22   ;;  %p4915_p6 = por %p4914_p5, %p4913_p4 }
  0x32   : > { %4653 = vmatprep.mubr.msk.f32.mxu0 %vm619_vm1, %v298_v28  ;;  %v999_v10 = vshrl.u32 %v998_v5, 23  ;;  %v895_v12 = vshrl.u32 %v894_v7, 23  ;;  %v1207_v21 = vshrl.u32 %v1206_v16, 23 }
  0x33   : > { %p4916_p7 = pnand %p4915_p6, %p4909_p2 }
  0x34   : > { %4654 = vmatmul.mubr.msk.f32.gmra.mrb[8].mxu0 %vm619_vm1, %v299_v31  ;;  %v4440_v15 = vadd.s32 4294967169, %v999_v10  ;;  %v4436_v17 = vadd.s32 4294967169, %v895_v12 }
  0x35   : > { %360 = vperm.xlu1 %4838, %v321_v25   ;;  %357 = vperm.xlu0 %4837, %v320_v26   ;;  %v4448_v26 = vadd.s32 4294967169, %v1207_v21 }
  0x36   : > { %4656 = vmatprep.mubr.msk.f32.mxu0 %vm619_vm1, %v300_v32  ;;  %v1005_v20 = vadd.s32 1, %v4440_v15  ;;  %v901_v22 = vadd.s32 1, %v4436_v17  ;;  %v5264_v32 = vadd.s32 %v5209_v51, %v821_v23 }
  0x38   : > { %4657 = vmatmul.mubr.msk.f32.gmra.mrb[10].mxu0 %vm619_vm1, %v301_v35  ;;  %vm1006_vm15 = vcmp.gt.s32.totalorder %v1005_v20, 0  ;;  %vm902_vm2 = vcmp.gt.s32.totalorder %v901_v22, 0 }
  0x39   : > { %366 = vperm.xlu1 %4838, %v323_v29   ;;  %363 = vperm.xlu0 %4837, %v322_v30   ;;  %v1007_v27 = vsel %vm1006_vm15, %v1005_v20, 0  ;;  %v5260_v31 = vsel %vm902_vm2, %v901_v22, 0 }
  0x3a   : > { %4659 = vmatprep.mubr.msk.f32.mxu0 %vm619_vm1, %v302_v36  ;;  %v1009_v30 = vand.u32 31, %v1007_v27  ;;  %v1008_v49 = vshrl.u32 %v1007_v27, 5 }
  0x3c   : > { %4660 = vmatmul.mubr.msk.f32.gmra.mrb[12].mxu0 %vm619_vm1, %v303_v37  ;;  %v1010_v36 = vsub.s32 32, %v1009_v30  ;;  %v5269_v37 = vand.u32 31, %v5260_v31  ;;  %v1018_v57 = vshll.u32 %v7129_v54, %v1009_v30 }
  0x3d   : > { %372 = vperm.xlu1 %4838, %v325_v33   ;;  %369 = vperm.xlu0 %4837, %v324_v34  }
  0x3e   : > { %4662 = vmatprep.mubr.msk.f32.mxu0 %vm619_vm1, %v304_v38  ;;  %v5271_v38 = vadd.s32 1, %v4448_v26 }
  0x40   : > { %4663 = vmatmul.mubr.msk.f32.gmra.mrb[14].mxu0 %vm619_vm1, %v305_v39 }
  0xa0   : > { %v334_v43 = vpop.permute.xlu1 %333  ;;  %v328_v44 = vpop.permute.xlu0 %327 }
  0xa1   : > { %vm374_vm5 = vcmp.eq.s32.totalorder %v5197_v41, %v328_v44  ;;  %vm376_vm6 = vcmp.eq.s32.totalorder %v5197_v41, %v334_v43  ;;  %v995_v43 = vand.u32 2147483647, %v5228_v63  ;;  %v5005_v44 = vmov 683565275  }
  0xa2   : > { %v4385_v46 = vsel %vm374_vm5, 1.0, %v5004_v45  ;;  %v4387_v50 = vsel %vm376_vm6, 1.0, %v5004_v45  ;;  %v1011_v12 = vshrl.u32 %v5005_v44, %v1010_v36 }
  0xa3   : > { %4613 = vmatprep.mubr.msk.f32.mxu1 %vm425_vm4, %v4385_v46  ;;  %v1012_v46 = vshll.u32 %v5005_v44, %v1009_v30 }
  0xa4   : > { %v337_v47 = vpop.permute.xlu1 %336  ;;  %v331_v48 = vpop.permute.xlu0 %330 }
  0xa5   : > { %vm375_vm7 = vcmp.eq.s32.totalorder %v5197_v41, %v331_v48  ;;  %vm377_vm8 = vcmp.eq.s32.totalorder %v5197_v41, %v337_v47 }
  0xa6   : > { %v4386_v52 = vsel %vm375_vm7, 1.0, %v5004_v45  ;;  %v4388_v61 = vsel %vm377_vm8, 1.0, %v5004_v45  ;;  %vm1027_vm8 = vcmp.lt.s32.totalorder %v1008_v49, 1 }
  0xa7   : > { %4614 = vmatmul.mubr.msk.f32.vlgmr.msra.gmra.mrb[0].mxu1 %vm425_vm4, %v4386_v52 }
  0xa8   : > { %v343_v55 = vpop.permute.xlu1 %342  ;;  %4616 = vmatprep.mubr.msk.f32.mxu1 %vm425_vm4, %v4387_v50  ;;  %v340_v56 = vpop.permute.xlu0 %339  ;;  %v7135_v50 = vmov 2475754826  }
  0xa9   : > { %vm378_vm9 = vcmp.eq.s32.totalorder %v5197_v41, %v340_v56  ;;  %vm379_vm10 = vcmp.eq.s32.totalorder %v5197_v41, %v343_v55  ;;  %v1013_v52 = vshrl.u32 %v7135_v50, %v1010_v36  ;;  %v1015_v53 = vshll.u32 %v7135_v50, %v1009_v30 }
  0xaa   : > { %v4389_v62 = vsel %vm378_vm9, 1.0, %v5004_v45  ;;  %v4390_v8 = vsel %vm379_vm10, 1.0, %v5004_v45  ;;  %v1016_v55 = vshrl.u32 %v7129_v54, %v1010_v36  ;;  %v1002_v56 = vand.u32 8388607, %v995_v43 }
  0xab   : > { %4617 = vmatmul.mubr.msk.f32.gmra.mrb[2].mxu1 %vm425_vm4, %v4388_v61  ;;  %v1014_v61 = vor.u32 %v1013_v52, %v1012_v46  ;;  %vm1028_vm9 = vcmp.lt.s32.totalorder %v1008_v49, 2  ;;  %vm1029_vm10 = vcmp.lt.s32.totalorder %v1008_v49, 3  ;;  %v908_v46 = vshll.u32 %v5005_v44, %v5269_v37 }
  0xac   : > { %v349_v3 = vpop.permute.xlu1 %348  ;;  %4619 = vmatprep.mubr.msk.f32.mxu1 %vm425_vm4, %v4389_v62  ;;  %v346_v4 = vpop.permute.xlu0 %345  ;;  %v1017_v62 = vor.u32 %v1016_v55, %v1015_v53  ;;  %v1003_v1 = vor.u32 8388608, %v1002_v56 }
  0xad   : > { %vm380_vm11 = vcmp.eq.s32.totalorder %v5197_v41, %v346_v4  ;;  %vm381_vm12 = vcmp.eq.s32.totalorder %v5197_v41, %v349_v3  ;;  %v7131_v3 = vmov 2102212464   ;;  %v1031_v20 = vsel %vm1027_vm8, %v1011_v12, %v1014_v61 }
  0xae   : > { %v4391_v9 = vsel %vm380_vm11, 1.0, %v5004_v45  ;;  %v4392_v18 = vsel %vm381_vm12, 1.0, %v5004_v45  ;;  %v1019_v4 = vshrl.u32 %v7131_v3, %v1010_v36  ;;  %v1021_v5 = vshll.u32 %v7131_v3, %v1009_v30 }
  0xaf   : > { %4620 = vmatmul.mubr.msk.f32.gmra.mrb[4].mxu1 %vm425_vm4, %v4390_v8  ;;  %v5010_v8 = vmov 1326507024   ;;  %vm1030_vm11 = vcmp.lt.s32.totalorder %v1008_v49, 4  ;;  %v1043_v15 = vshll.u32 %v1003_v1, 8  ;;  %v917_v49 = vshll.u32 %v7131_v3, %v5269_v37 }
  0xb0   : > { %v355_v13 = vpop.permute.xlu1 %354  ;;  %4622 = vmatprep.mubr.msk.f32.mxu1 %vm425_vm4, %v4391_v9  ;;  %v352_v14 = vpop.permute.xlu0 %351  ;;  %v1020_v9 = vor.u32 %v1019_v4, %v1018_v57 }
  0xb1   : > { %vm382_vm13 = vcmp.eq.s32.totalorder %v5197_v41, %v352_v14  ;;  %vm383_vm14 = vcmp.eq.s32.totalorder %v5197_v41, %v355_v13  ;;  %v1035_v14 = vsel %vm1027_vm8, %v1014_v61, %v1017_v62 }
  0xb2   : > { %v4393_v19 = vsel %vm382_vm13, 1.0, %v5004_v45  ;;  %v4394_v28 = vsel %vm383_vm14, 1.0, %v5004_v45  ;;  %v1032_v16 = vsel %vm1030_vm11, %v1020_v9, 2102212464 }
  0xb3   : > { %4623 = vmatmul.mubr.msk.f32.gmra.mrb[6].mxu1 %vm425_vm4, %v4392_v18  ;;  %v1039_v18 = vsel %vm1027_vm8, %v1017_v62, %v1020_v9  ;;  %v1033_v21 = vsel %vm1029_vm10, %v1017_v62, %v1032_v16 }
  0xb4   : > { %v361_v24 = vpop.permute.xlu1 %360  ;;  %4625 = vmatprep.mubr.msk.f32.mxu1 %vm425_vm4, %v4393_v19  ;;  %v358_v25 = vpop.permute.xlu0 %357  ;;  %v891_v19 = vand.u32 2147483647, %v5234_v2 }
  0xb5   : > { %vm385_vm0 = vcmp.eq.s32.totalorder %v5197_v41, %v361_v24  ;;  %vm384_vm1 = vcmp.eq.s32.totalorder %v5197_v41, %v358_v25  ;;  %v1034_v24 = vsel %vm1028_vm9, %v1031_v20, %v1033_v21 }
  0xb6   : > { %v4395_v29 = vsel %vm384_vm1, 1.0, %v5004_v45  ;;  %v4396_v33 = vsel %vm385_vm0, 1.0, %v5004_v45  ;;  %v898_v27 = vand.u32 8388607, %v891_v19  ;;  %vm1214_vm0 = vcmp.gt.s32.totalorder %v5271_v38, 0 }
  0xb7   : > { %4626 = vmatmul.mubr.msk.f32.gmra.mrb[8].mxu1 %vm425_vm4, %v4394_v28 }
  0xb8   : > { %v367_v34 = vpop.permute.xlu1 %366  ;;  %4628 = vmatprep.mubr.msk.f32.mxu1 %vm425_vm4, %v4395_v29  ;;  %v364_v35 = vpop.permute.xlu0 %363 }
  0xb9   : > { %vm387_vm3 = vcmp.eq.s32.totalorder %v5197_v41, %v367_v34  ;;  %vm386_vm5 = vcmp.eq.s32.totalorder %v5197_v41, %v364_v35 }
  0xba   : > { %v4398_v39 = vsel %vm387_vm3, 1.0, %v5004_v45  ;;  %v4397_v40 = vsel %vm386_vm5, 1.0, %v5004_v45 }
  0xbb   : > { %4629 = vmatmul.mubr.msk.f32.gmra.mrb[10].mxu1 %vm425_vm4, %v4396_v33  ;;  %v1050_v33 = vmul.u32 %v1043_v15, %v1034_v24 }
  0xbc   : > { %v373_v47 = vpop.permute.xlu1 %372  ;;  %4631 = vmatprep.mubr.msk.f32.mxu1 %vm425_vm4, %v4397_v40  ;;  %v370_v48 = vpop.permute.xlu0 %369  ;;  %v906_v40 = vsub.s32 32, %v5269_v37 }
  0xbd   : > { %vm389_vm6 = vcmp.eq.s32.totalorder %v5197_v41, %v373_v47  ;;  %vm388_vm7 = vcmp.eq.s32.totalorder %v5197_v41, %v370_v48  ;;  %v5009_v41 = vmov 920167782   ;;  %v911_v47 = vshll.u32 %v7135_v50, %v5269_v37 }
  0xbe   : > { %v4400_v58 = vsel %vm389_vm6, 1.0, %v5004_v45  ;;  %v4399_v60 = vsel %vm388_vm7, 1.0, %v5004_v45  ;;  %v1022_v6 = vshrl.u32 %v5009_v41, %v1010_v36  ;;  %v1024_v7 = vshll.u32 %v5009_v41, %v1009_v30 }
  0xbf   : > { %4632 = vmatmul.mubr.msk.f32.gmra.mrb[12].mxu1 %vm425_vm4, %v4398_v39  ;;  %v1025_v45 = vshrl.u32 %v5010_v8, %v1010_v36  ;;  %v899_v36 = vor.u32 8388608, %v898_v27  ;;  %v904_v39 = vshrl.u32 %v5260_v31, 5  ;;  %v914_v48 = vshll.u32 %v7129_v54, %v5269_v37 }
  0xc0   : > { %4634 = vmatprep.mubr.msk.f32.mxu1 %vm425_vm4, %v4399_v60  ;;  %v1023_v10 = vor.u32 %v1022_v6, %v1021_v5  ;;  %v920_v52 = vshll.u32 %v5009_v41, %v5269_v37  ;;  %v907_v53 = vshrl.u32 %v5005_v44, %v906_v40  ;;  %v909_v55 = vshrl.u32 %v7135_v50, %v906_v40 }
  0xc1   : > { %v1026_v13 = vor.u32 %v1025_v45, %v1024_v7  ;;  %vm924_vm12 = vcmp.lt.s32.totalorder %v904_v39, 2  ;;  %v912_v56 = vshrl.u32 %v7129_v54, %v906_v40  ;;  %v915_v57 = vshrl.u32 %v7131_v3, %v906_v40 }
  0xc2   : > { %v1036_v17 = vsel %vm1030_vm11, %v1023_v10, 920167782  ;;  %v921_v60 = vshrl.u32 %v5010_v8, %v906_v40  ;;  %v910_v61 = vor.u32 %v909_v55, %v908_v46  ;;  %vm925_vm14 = vcmp.lt.s32.totalorder %v904_v39, 3 }
  0xc3   : > { %4635 = vmatmul.mubr.msk.f32.gmra.mrb[14].mxu1 %vm425_vm4, %v4400_v58  ;;  %v1037_v22 = vsel %vm1029_vm10, %v1020_v9, %v1036_v17  ;;  %v1040_v23 = vsel %vm1030_vm11, %v1026_v13, 1326507024  ;;  %vm923_vm4 = vcmp.lt.s32.totalorder %v904_v39, 1  ;;  %v918_v58 = vshrl.u32 %v5009_v41, %v906_v40 }
  0xc4   : > { %v1038_v25 = vsel %vm1028_vm9, %v1035_v14, %v1037_v22  ;;  %v1041_v26 = vsel %vm1029_vm10, %v1023_v10, %v1040_v23  ;;  %v913_v62 = vor.u32 %v912_v56, %v911_v47  ;;  %v916_v4 = vor.u32 %v915_v57, %v914_v48 }
  0xc5   : > { %v1042_v28 = vsel %vm1028_vm9, %v1039_v18, %v1041_v26  ;;  %v5309_v29 = vmul.u32.u64.low %v1043_v15, %v1038_v25  ;;  %v5310_v30 = vmul.u32.u64.high %v1043_v15, %v1038_v25, %v5309_v29  ;;  %v919_v5 = vor.u32 %v918_v58, %v917_v49 }
  0xc6   : > { %v5313_v34 = vmul.u32.u64.low %v1043_v15, %v1042_v28  ;;  %v5314_v35 = vmul.u32.u64.high %v1043_v15, %v1042_v28, %v5313_v34  ;;  %v922_v6 = vor.u32 %v921_v60, %v920_v52  ;;  %vm926_vm15 = vcmp.lt.s32.totalorder %v904_v39, 4 }
  0xc7   : > { %v1053_v31 = vadd.s32 1, %v5310_v30  ;;  %v927_v7 = vsel %vm923_vm4, %v907_v53, %v910_v61  ;;  %v931_v45 = vsel %vm923_vm4, %v910_v61, %v913_v62  ;;  %v939_v9 = vshll.u32 %v899_v36, 8 }
  0xc8   : > { %vm1052_vm13 = vc.u32 %v5314_v35, %v5309_v29  ;;  %v928_v12 = vsel %vm926_vm15, %v916_v4, 2102212464  ;;  %v932_v13 = vsel %vm926_vm15, %v919_v5, 920167782  ;;  %v935_v14 = vsel %vm923_vm4, %v913_v62, %v916_v4 }
  0xc9   : > { %v1054_v37 = vsel %vm1052_vm13, %v1053_v31, %v5310_v30  ;;  %v929_v15 = vsel %vm925_vm14, %v913_v62, %v928_v12  ;;  %v933_v16 = vsel %vm925_vm14, %v916_v4, %v932_v13  ;;  %v936_v17 = vsel %vm926_vm15, %v922_v6, 1326507024 }
  0xca   : > { %v1055_v1 = vadd.s32 %v1054_v37, %v1050_v33  ;;  %v1203_v18 = vand.u32 2147483647, %v5243_v11  ;;  %v934_v21 = vsel %vm924_vm12, %v931_v45, %v933_v16  ;;  %v937_v22 = vsel %vm925_vm14, %v919_v5, %v936_v17 }
  0xcb   : > { %v854_v23 = vcvt.s32.f32 %v5264_v32  ;;  %v930_v24 = vsel %vm924_vm12, %v927_v7, %v929_v15  ;;  %v938_v25 = vsel %vm924_vm12, %v935_v14, %v937_v22  ;;  %v1215_v39 = vsel %vm1214_vm0, %v5271_v38, 0 }
  0xcc   : > { %v1056_v10 = vadd.s32 536870912, %v1055_v1  ;;  %v5351_v26 = vmul.u32.u64.low %v939_v9, %v934_v21  ;;  %v5352_v27 = vmul.u32.u64.high %v939_v9, %v934_v21, %v5351_v26  ;;  %v1210_v34 = vand.u32 8388607, %v1203_v18 }
  0xcd   : > { %v5356_v30 = vmul.u32.u64.low %v939_v9, %v938_v25  ;;  %v5357_v33 = vmul.u32.u64.high %v939_v9, %v938_v25, %v5356_v30  ;;  %v946_v32 = vmul.u32 %v939_v9, %v930_v24  ;;  %v1217_v46 = vand.u32 31, %v1215_v39 }
  0xce   : > { %v5344_v20 = vshrl.u32 %v1056_v10, 30  ;;  %v949_v40 = vadd.s32 1, %v5352_v27  ;;  %v1211_v48 = vor.u32 8388608, %v1210_v34  ;;  %v5370_v49 = vmul.f32 %v5223_v59, %v854_v23 }
  0xcf   : > { %vm948_vm1 = vc.u32 %v5357_v33, %v5351_v26  ;;  %v1216_v31 = vshrl.u32 %v1215_v39, 5  ;;  %v1218_v53 = vsub.s32 32, %v1217_v46  ;;  %v1220_v55 = vshll.u32 %v5005_v44, %v1217_v46 }
  0xd0   : > { %v1058_v28 = vshll.u32 %v5344_v20, 30  ;;  %v950_v52 = vsel %vm948_vm1, %v949_v40, %v5352_v27  ;;  %v1223_v57 = vshll.u32 %v7135_v50, %v1217_v46  ;;  %v1226_v58 = vshll.u32 %v7129_v54, %v1217_v46 }
  0xd1   : > { %v951_v56 = vadd.s32 %v950_v52, %v946_v32  ;;  %v1221_v60 = vshrl.u32 %v7135_v50, %v1218_v53  ;;  %v1224_v37 = vshrl.u32 %v7129_v54, %v1218_v53  ;;  %v1227_v61 = vshrl.u32 %v7131_v3, %v1218_v53 }
  0xd2   : > { %v5362_v36 = vsub.s32 %v1055_v1, %v1058_v28  ;;  %v1229_v62 = vshll.u32 %v7131_v3, %v1217_v46  ;;  %v1230_v5 = vshrl.u32 %v5009_v41, %v1218_v53  ;;  %v1232_v6 = vshll.u32 %v5009_v41, %v1217_v46 }
  0xd3   : > { %v952_v4 = vadd.s32 536870912, %v951_v56  ;;  %v1233_v7 = vshrl.u32 %v5010_v8, %v1218_v53  ;;  %v1102_v45 = vand.u32 2139095040, %v5370_v49  ;;  %v1222_v12 = vor.u32 %v1221_v60, %v1220_v55 }
  0xd4   : > { %v1061_v47 = vsub.s32 0, %v5362_v36  ;;  %v1251_v13 = vshll.u32 %v1211_v48, 8  ;;  %v1225_v14 = vor.u32 %v1224_v37, %v1223_v57  ;;  %v1228_v15 = vor.u32 %v1227_v61, %v1226_v58 }
  0xd5   : > { %v5385_v10 = vshrl.u32 %v952_v4, 30  ;;  %v1231_v16 = vor.u32 %v1230_v5, %v1229_v62  ;;  %v1234_v17 = vor.u32 %v1233_v7, %v1232_v6  ;;  %vm1235_vm3 = vcmp.lt.s32.totalorder %v1216_v31, 1 }
  0xd6   : > { %v4441_v38 = vmin.u32 %v1061_v47, %v5362_v36  ;;  %vm1238_vm5 = vcmp.lt.s32.totalorder %v1216_v31, 4  ;;  %v1051_v22 = vadd.s32 %v5309_v29, %v5314_v35  ;;  %v1219_v24 = vshrl.u32 %v5005_v44, %v1218_v53 }
  0xd7   : > { %v954_v21 = vshll.u32 %v5385_v10, 30  ;;  %vm1236_vm6 = vcmp.lt.s32.totalorder %v1216_v31, 2  ;;  %vm1237_vm7 = vcmp.lt.s32.totalorder %v1216_v31, 3  ;;  %v1240_v28 = vsel %vm1238_vm5, %v1228_v15, 2102212464 }
  0xd8   : > { %v1063_v1 = vclz %v4441_v38  ;;  %v1243_v34 = vsel %vm1235_vm3, %v1222_v12, %v1225_v14  ;;  %v1244_v32 = vsel %vm1238_vm5, %v1231_v16, 920167782  ;;  %v1248_v39 = vsel %vm1238_vm5, %v1234_v17, 1326507024 }
  0xd9   : > { %v955_v27 = vsub.s32 %v951_v56, %v954_v21  ;;  %v1247_v47 = vsel %vm1235_vm3, %v1225_v14, %v1228_v15  ;;  %v1239_v48 = vsel %vm1235_vm3, %v1219_v24, %v1222_v12  ;;  %v1245_v29 = vsel %vm1237_vm7, %v1228_v15, %v1244_v32 }
  0xda   : > { %v4442_v9 = vadd.s32 4294967294, %v1063_v1  ;;  %v1249_v35 = vsel %vm1237_vm7, %v1231_v16, %v1248_v39  ;;  %v1103_v52 = vshrl.u32 %v1102_v45, 23  ;;  %v1241_v38 = vsel %vm1237_vm7, %v1225_v14, %v1240_v28 }
  0xdb   : > { %v957_v46 = vsub.s32 0, %v955_v27  ;;  %v1246_v56 = vsel %vm1236_vm6, %v1243_v34, %v1245_v29  ;;  %v1250_v58 = vsel %vm1236_vm6, %v1247_v47, %v1249_v35  ;;  %v1242_v1 = vsel %vm1236_vm6, %v1239_v48, %v1241_v38 }
  0xdc   : > { %vm4443_vm2 = vcmp.lt.s32.totalorder %v4442_v9, 0  ;;  %v5397_v60 = vmul.u32.u64.low %v1251_v13, %v1246_v56  ;;  %v5398_v37 = vmul.u32.u64.high %v1251_v13, %v1246_v56, %v5397_v60  ;;  %v4444_v45 = vadd.s32 4294967169, %v1103_v52 }
  0xdd   : > { %v1066_v23 = vsel %vm4443_vm2, 0, %v4442_v9  ;;  %v4437_v55 = vmin.u32 %v957_v46, %v955_v27  ;;  %v5402_v4 = vmul.u32.u64.low %v1251_v13, %v1250_v58  ;;  %v5403_v5 = vmul.u32.u64.high %v1251_v13, %v1250_v58, %v5402_v4 }
  0xde   : > { %v1071_v25 = vsub.s32 4294967266, %v1066_v23  ;;  %v1067_v30 = vsub.s32 32, %v1066_v23  ;;  %v1068_v53 = vshll.u32 %v5362_v36, %v1066_v23  ;;  %v1261_v7 = vadd.s32 1, %v5398_v37 }
  0xdf   : > { %v959_v62 = vclz %v4437_v55  ;;  %v947_v12 = vadd.s32 %v5351_v26, %v5357_v33  ;;  %v1258_v14 = vmul.u32 %v1251_v13, %v1242_v1  ;;  %vm1260_vm9 = vc.u32 %v5403_v5, %v5397_v60  ;;  %v869_v26 = vld [vmem:[%s7125_s4 + $0x1] sm:$0x1] }
  0xe0   : > { %v1072_v40 = vadd.s32 127, %v1071_v25  ;;  %v1069_v57 = vshrl.u32 %v1051_v22, %v1067_v30  ;;  %v824_v17 = vadd.s32 40, %v5199_v42  ;;  %v1262_v23 = vsel %vm1260_vm9, %v1261_v7, %v5398_v37 }
  0xe1   : > { %v4438_v6 = vadd.s32 4294967294, %v959_v62  ;;  %v1109_v24 = vadd.s32 1, %v4444_v45  ;;  %v1263_v34 = vadd.s32 %v1262_v23, %v1258_v14  ;;  %vm890_vm11 = vcmp.gt.f32.partialorder %v869_v26, 0.5 }
  0xe2   : > { %v1073_v61 = vshll.u32 %v1072_v40, 23  ;;  %v1070_v36 = vor.u32 %v1069_v57, %v1068_v53  ;;  %v841_v13 = vadd.s32 %v5209_v51, %v824_v17  ;;  %v1099_v40 = vand.u32 2147483647, %v5370_v49 }
  0xe3   : > { %vm4439_vm8 = vcmp.lt.s32.totalorder %v4438_v6, 0  ;;  %v1264_v39 = vadd.s32 536870912, %v1263_v34  ;;  %vm1110_vm10 = vcmp.gt.s32.totalorder %v1109_v24, 0  ;;  %v823_v48 = vadd.s32 32, %v5199_v42 }
  0xe4   : > { %v1074_v9 = vor.u32 4788187, %v1073_v61  ;;  %v962_v15 = vsel %vm4439_vm8, 0, %v4438_v6  ;;  %v1077_v21 = vcvt.s32.f32 %v1070_v36  ;;  %v826_v29 = vadd.s32 56, %v5199_v42 }
  0xe5   : > { %v963_v31 = vsub.s32 32, %v962_v15  ;;  %v967_v16 = vsub.s32 4294967266, %v962_v15  ;;  %v964_v22 = vshll.u32 %v955_v27, %v962_v15  ;;  %v5417_v47 = vshrl.u32 %v1264_v39, 30 }
  0xe6   : > { %v1075_v25 = vand.u32 2147483647, %v1074_v9  ;;  %v857_v35 = vcvt.s32.f32 %v841_v13  ;;  %v1106_v55 = vand.u32 8388607, %v1099_v40  ;;  %v1111_v38 = vsel %vm1110_vm10, %v1109_v24, 0 }
  0xe7   : > { %v965_v28 = vshrl.u32 %v947_v12, %v963_v31  ;;  %v968_v30 = vadd.s32 127, %v967_v16  ;;  %v4203_v56 = vsel %vm890_vm11, 1, %v5002_v0  ;;  %v4206_v57 = vsub.s32 0, %v5199_v42 }
  0xe8   : > { %v1078_v46 = vmul.f32 %v1077_v21, %v1075_v25  ;;  %vm997_vm4 = vcmp.lt.s32.totalorder %v5228_v63, 0  ;;  %v1266_v37 = vshll.u32 %v5417_v47, 30  ;;  %v5428_v61 = vadd.s32 %v5209_v51, %v823_v48 }
  0xe9   : > { %v969_v33 = vshll.u32 %v968_v30, 23  ;;  %v966_v32 = vor.u32 %v965_v28, %v964_v22  ;;  %v5431_v62 = vadd.s32 %v5209_v51, %v826_v29  ;;  %v1081_v1 = vsub.s32 4, %v5344_v20 }
  0xea   : > { %v1079_v58 = vxor.u32 2147483648, %v1078_v46  ;;  %v1113_v4 = vand.u32 31, %v1111_v38  ;;  %v5435_v6 = vmul.f32 %v5223_v59, %v857_v35  ;;  %v1107_v36 = vor.u32 8388608, %v1106_v55 }
  0xeb   : > { %v970_v27 = vor.u32 4788187, %v969_v33  ;;  %v973_v53 = vcvt.s32.f32 %v966_v32  ;;  %v5437_v7 = vrot.slane %v4203_v56, %v4206_v57  ;;  %vm5441_vm12 = vcmp.le.f32.partialorder %v995_v43, 0.7853982 }
  0xec   : > { %v1080_v9 = vsel %vm997_vm4, %v1079_v58, %v1078_v46  ;;  %v5447_v12 = vshrl.u32 %v1111_v38, 5  ;;  %v977_v14 = vsub.s32 4, %v5385_v10  ;;  %v5450_v15 = vsub.s32 %v1263_v34, %v1266_v37 }
  0xed   : > { %v971_v52 = vand.u32 2147483647, %v970_v27  ;;  %v856_v31 = vcvt.s32.f32 %v5428_v61  ;;  %v859_v16 = vcvt.s32.f32 %v5431_v62  ;;  %v1082_v43 = vsel %vm997_vm4, %v1081_v1, %v5344_v20 }
  0xee   : > { %v1114_v21 = vsub.s32 32, %v1113_v4  ;;  %v7128_v22 = vand.u32 2147483647, %v5435_v6  ;;  %v1414_v23 = vand.u32 2139095040, %v5435_v6  ;;  %v1083_v24 = vsel %vm5441_vm12, %v5228_v63, %v1080_v9 }
  0xef   : > { %v974_v0 = vmul.f32 %v973_v53, %v971_v52  ;;  %v1269_v30 = vsub.s32 0, %v5450_v15  ;;  %v5467_v34 = vshll.u32 %v1107_v36, 8  ;;  %vm5471_vm13 = vcmp.le.f32.partialorder %v891_v19, 0.7853982 }
  0xf0   : > { %vm893_vm14 = vcmp.lt.s32.totalorder %v5234_v2, 0  ;;  %v1116_v26 = vshll.u32 %v5005_v44, %v1113_v4  ;;  %vm1131_vm15 = vcmp.lt.s32.totalorder %v5447_v12, 1  ;;  %v1084_v33 = vsel %vm5441_vm12, 0, %v1082_v43 }
  0xf1   : > { %v975_v28 = vxor.u32 2147483648, %v974_v0  ;;  %v978_v13 = vsel %vm893_vm14, %v977_v14, %v5385_v10  ;;  %v1259_v32 = vadd.s32 %v5397_v60, %v5403_v5  ;;  %v4449_v39 = vmin.u32 %v1269_v30, %v5450_v15 }
  0xf2   : > { %4839 = vcosq.f32 %v1083_v24  ;;  %v1117_v46 = vshrl.u32 %v7135_v50, %v1114_v21  ;;  %v1119_v27 = vshll.u32 %v7135_v50, %v1113_v4  ;;  %v1120_v48 = vshrl.u32 %v7129_v54, %v1114_v21 }
  0xf3   : > { %v976_v29 = vsel %vm893_vm14, %v975_v28, %v974_v0  ;;  %v1271_v35 = vclz %v4449_v39  ;;  %v1122_v10 = vshll.u32 %v7129_v54, %v1113_v4  ;;  %v1123_v53 = vshrl.u32 %v7131_v3, %v1114_v21 }
  0xf4   : > { %4841 = vsinq.f32 %v1083_v24  ;;  %v1088_v60 = vadd.s32 3, %v1084_v33  ;;  %v980_v5 = vsel %vm5471_vm13, 0, %v978_v13  ;;  %v1115_v55 = vshrl.u32 %v5005_v44, %v1114_v21 }
  0xf5   : > { %v4450_v38 = vadd.s32 4294967294, %v1271_v35  ;;  %v1125_v56 = vshll.u32 %v7131_v3, %v1113_v4  ;;  %v1126_v57 = vshrl.u32 %v5009_v41, %v1114_v21  ;;  %v1128_v58 = vshll.u32 %v5009_v41, %v1113_v4 }
  0xf6   : > { %v979_v37 = vsel %vm5471_vm13, %v5234_v2, %v976_v29  ;;  %v1118_v1 = vor.u32 %v1117_v46, %v1116_v26  ;;  %v1121_v0 = vor.u32 %v1120_v48, %v1119_v27  ;;  %v1129_v36 = vshrl.u32 %v5010_v8, %v1114_v21 }
  0xf7   : > { %v5454_v17 = vpop.f32.mrb[0].mxu0  ;;  %vm4451_vm0 = vcmp.lt.s32.totalorder %v4450_v38, 0  ;;  %v1124_v9 = vor.u32 %v1123_v53, %v1122_v10  ;;  %v1127_v14 = vor.u32 %v1126_v57, %v1125_v56  ;;  %vm1134_vm1 = vcmp.lt.s32.totalorder %v5447_v12, 4 }
  0xf8   : > { %v5464_v25 = vpop.f32.mrb[1].mxu0  ;;  %v5508_v24 = vand.u32 3, %v1088_v60  ;;  %v984_v4 = vadd.s32 3, %v980_v5  ;;  %v1274_v28 = vsel %vm4451_vm0, 0, %v4450_v38  ;;  %v1130_v30 = vor.u32 %v1129_v36, %v1128_v58 }
  0xf9   : > { %4843 = vcosq.f32 %v979_v37  ;;  %v1279_v20 = vsub.s32 4294967266, %v1274_v28  ;;  %vm1133_vm2 = vcmp.lt.s32.totalorder %v5447_v12, 3  ;;  %v1136_v21 = vsel %vm1134_vm1, %v1124_v9, 2102212464 }
  0xfa   : > { %v5513_v26 = vand.u32 3, %v1084_v33  ;;  %4845 = vsinq.f32 %v979_v37  ;;  %v1275_v13 = vsub.s32 32, %v1274_v28  ;;  %v1140_v39 = vsel %vm1134_vm1, %v1127_v14, 920167782 }
  0xfb   : > { %v5484_v19 = vpop.f32.mrb[2].mxu0  ;;  %v1280_v27 = vadd.s32 127, %v1279_v20  ;;  %vm1132_vm3 = vcmp.lt.s32.totalorder %v5447_v12, 2  ;;  %v1135_v48 = vsel %vm1131_vm15, %v1115_v55, %v1118_v1  ;;  %v1139_v29 = vsel %vm1131_vm15, %v1118_v1, %v1121_v0 }
  0xfc   : > { %v5489_v52 = vpop.f32.mrb[3].mxu0  ;;  %v4840_v35 = vpop.eup %4839  ;;  %vm1205_vm5 = vcmp.lt.s32.totalorder %v5243_v11, 0  ;;  %v1137_v33 = vsel %vm1133_vm2, %v1121_v0, %v1136_v21  ;;  %v1141_v10 = vsel %vm1133_vm2, %v1124_v9, %v1140_v39  ;;  %v1143_v53 = vsel %vm1131_vm15, %v1121_v0, %v1124_v9 }
  0xfd   : > { %v1144_v60 = vsel %vm1134_vm1, %v1130_v30, 1326507024  ;;  %v5533_v38 = vand.u32 3, %v984_v4  ;;  %v5535_v55 = vand.u32 3, %v980_v5  ;;  %v1276_v56 = vshll.u32 %v5450_v15, %v1274_v28 }
  0xfe   : > { %v1289_v57 = vsub.s32 4, %v5417_v47  ;;  %v4842_v58 = vpop.eup %4841  ;;  %v1277_v37 = vshrl.u32 %v1259_v32, %v1275_v13  ;;  %v1281_v1 = vshll.u32 %v1280_v27, 23  ;;  %v1142_v36 = vsel %vm1132_vm3, %v1139_v29, %v1141_v10 }
  0xff   : > { %v5503_v45 = vpop.f32.mrb[4].mxu0  ;;  %v1145_v0 = vsel %vm1133_vm2, %v1127_v14, %v1144_v60  ;;  %vm1091_vm6 = vcmp.eq.s32.totalorder %v5508_v24, 0  ;;  %vm1094_vm7 = vcmp.eq.s32.totalorder %v5508_v24, 2  ;;  %v1138_v5 = vsel %vm1132_vm3, %v1135_v48, %v1137_v33 }
 0x100   : > { %v5506_v43 = vpop.f32.mrb[5].mxu0  ;;  %v1146_v15 = vsel %vm1132_vm3, %v1143_v53, %v1145_v0  ;;  %vm5551_vm8 = vcmp.le.f32.partialorder %v1203_v18, 0.7853982  ;;  %v5560_v14 = vmul.u32.u64.low %v5467_v34, %v1142_v36  ;;  %v5561_v28 = vmul.u32.u64.high %v5467_v34, %v1142_v36, %v5560_v14 }
 0x101   : > { %v5556_v9 = vmul.u32.u64.low %v5467_v34, %v1146_v15  ;;  %v5557_v4 = vmul.u32.u64.high %v5467_v34, %v1146_v15, %v5556_v9  ;;  %v1092_v30 = vxor.u32 2147483648, %v4842_v58  ;;  %v1095_v20 = vxor.u32 2147483648, %v4840_v35 }
 0x102   : > { %vm2753_vm9 = vcmp.eq.s32.totalorder %v5513_v26, 0  ;;  %vm2756_vm10 = vcmp.eq.s32.totalorder %v5513_v26, 2  ;;  %vm1090_vm11 = vcmp.lt.s32.totalorder %v5508_v24, 2  ;;  %v1278_v18 = vor.u32 %v1277_v37, %v1276_v56 }
 0x103   : > { %v5517_v46 = vpop.f32.mrb[6].mxu0  ;;  %v1282_v12 = vor.u32 4788187, %v1281_v1  ;;  %v1415_v21 = vshrl.u32 %v1414_v23, 23  ;;  %v4844_v13 = vpop.eup %4843  ;;  %vm1087_vm4 = vweird.f32 %v5228_v63  ;;  %vm2752_vm12 = vcmp.lt.s32.totalorder %v5513_v26, 2 }
 0x104   : > { %vm987_vm13 = vcmp.eq.s32.totalorder %v5533_v38, 0  ;;  %v1154_v39 = vmul.u32 %v5467_v34, %v1138_v5  ;;  %v4846_v27 = vpop.eup %4845  ;;  %vm986_vm14 = vcmp.lt.s32.totalorder %v5533_v38, 2  ;;  %vm1156_vm15 = vc.u32 %v5557_v4, %v5560_v14  ;;  %v5589_v15 = vpop.f32.mrb[7].mxu0 }
 0x105   : > { %v1157_v48 = vadd.s32 1, %v5561_v28  ;;  %v4456_v29 = vadd.s32 4294967169, %v1415_v21  ;;  %v1093_v23 = vsel %vm1091_vm6, %v4840_v35, %v1092_v30  ;;  %v1096_v33 = vsel %vm1094_vm7, %v1095_v20, %v4842_v58 }
 0x106   : > { %v2758_v10 = vsel %vm2756_vm10, %v1095_v20, %v4842_v58  ;;  %v1290_v34 = vsel %vm1205_vm5, %v1289_v57, %v5417_v47  ;;  %v1283_v53 = vand.u32 2147483647, %v1282_v12  ;;  %v1285_v60 = vcvt.s32.f32 %v1278_v18 }
 0x107   : > { %v1158_v56 = vsel %vm1156_vm15, %v1157_v48, %v5561_v28  ;;  %v1421_v37 = vadd.s32 1, %v4456_v29  ;;  %v2755_v1 = vsel %vm2753_vm9, %v4840_v35, %v1092_v30  ;;  %v988_v36 = vxor.u32 2147483648, %v4846_v27 }
 0x108   : > { %v991_v0 = vxor.u32 2147483648, %v4844_v13  ;;  %v1159_v5 = vadd.s32 %v1158_v56, %v1154_v39  ;;  %vm990_vm0 = vcmp.eq.s32.totalorder %v5533_v38, 2  ;;  %vm2649_vm1 = vcmp.lt.s32.totalorder %v5535_v55, 2 }
 0x109   : > { %vm2650_vm2 = vcmp.eq.s32.totalorder %v5535_v55, 0  ;;  %vm1422_vm3 = vcmp.gt.s32.totalorder %v1421_v37, 0  ;;  %vm2653_vm6 = vcmp.eq.s32.totalorder %v5535_v55, 2  ;;  %v1292_v47 = vsel %vm5551_vm8, 0, %v1290_v34 }
 0x10a   : > { %v1160_v57 = vadd.s32 536870912, %v1159_v5  ;;  %v1423_v58 = vsel %vm1422_vm3, %v1421_v37, 0  ;;  %v1097_v35 = vsel %vm1090_vm11, %v1093_v23, %v1096_v33  ;;  %v2759_v9 = vsel %vm2752_vm12, %v2755_v1, %v2758_v10 }
 0x10b   : > { %v1286_v28 = vmul.f32 %v1285_v60, %v1283_v53  ;;  %v1425_v30 = vand.u32 31, %v1423_v58  ;;  %v989_v20 = vsel %vm987_vm13, %v4844_v13, %v988_v36  ;;  %v992_v18 = vsel %vm990_vm0, %v991_v0, %v4846_v27 }
 0x10c   : > { %v5603_v12 = vshrl.u32 %v1160_v57, 30  ;;  %v5608_v21 = vmul.f32 %v5223_v59, %v856_v31  ;;  %vm983_vm7 = vweird.f32 %v5234_v2  ;;  %v1296_v24 = vadd.s32 3, %v1292_v47 }
 0x10d   : > { %v5611_v39 = vand.u32 3, %v1292_v47  ;;  %v1426_v26 = vsub.s32 32, %v1425_v30  ;;  %v5615_v48 = vsel %vm1087_vm4, nan, %v1097_v35  ;;  %v5619_v29 = vsel %vm1087_vm4, nan, %v2759_v9 }
 0x10e   : > { %v2655_v61 = vsel %vm2653_vm6, %v991_v0, %v4846_v27  ;;  %v1162_v59 = vshll.u32 %v5603_v12, 30  ;;  %v993_v31 = vsel %vm986_vm14, %v989_v20, %v992_v18  ;;  %v2652_v23 = vsel %vm2650_vm2, %v4844_v13, %v988_v36 }
 0x10f   : > { %v1287_v33 = vxor.u32 2147483648, %v1286_v28  ;;  %v1418_v10 = vand.u32 8388607, %v7128_v22  ;;  %v5632_v63 = vshrl.u32 %v1423_v58, 5  ;;  %v1428_v53 = vshll.u32 %v5005_v44, %v1425_v30 }
 0x110   : > { %v5630_v34 = vsub.s32 %v1159_v5, %v1162_v59  ;;  %v1310_v27 = vand.u32 2139095040, %v5608_v21  ;;  %v1429_v60 = vshrl.u32 %v7135_v50, %v1426_v26  ;;  %v1431_v38 = vshll.u32 %v7135_v50, %v1425_v30 }
 0x111   : > { %v1432_v56 = vshrl.u32 %v7129_v54, %v1426_v26  ;;  %v1434_v13 = vshll.u32 %v7129_v54, %v1425_v30  ;;  %v1435_v1 = vshrl.u32 %v7131_v3, %v1426_v26  ;;  %v1437_v36 = vshll.u32 %v7131_v3, %v1425_v30 }
 0x112   : > { %v1165_v37 = vsub.s32 0, %v5630_v34  ;;  %v1438_v0 = vshrl.u32 %v5009_v41, %v1426_v26  ;;  %v5646_v5 = vsel %vm983_vm7, nan, %v993_v31  ;;  %v2656_v47 = vsel %vm2649_vm1, %v2652_v23, %v2655_v61 }
 0x113   : > { %v5650_v57 = vand.u32 3, %v1296_v24  ;;  %v1419_v58 = vor.u32 8388608, %v1418_v10  ;;  %v1288_v35 = vsel %vm1205_vm5, %v1287_v33, %v1286_v28  ;;  %v7133_v20 = vand.u32 2147483647, %v5608_v21 }
 0x114   : > { %v4445_v9 = vmin.u32 %v1165_v37, %v5630_v34  ;;  %v1311_v18 = vshrl.u32 %v1310_v27, 23  ;;  %v1430_v59 = vor.u32 %v1429_v60, %v1428_v53  ;;  %v1433_v22 = vor.u32 %v1432_v56, %v1431_v38 }
 0x115   : > { %v1440_v54 = vshll.u32 %v5009_v41, %v1425_v30  ;;  %v1441_v31 = vshrl.u32 %v5010_v8, %v1426_v26  ;;  %v1436_v55 = vor.u32 %v1435_v1, %v1434_v13  ;;  %v1439_v61 = vor.u32 %v1438_v0, %v1437_v36 }
 0x116   : > { %v1167_v3 = vclz %v4445_v9  ;;  %vm1443_vm9 = vcmp.lt.s32.totalorder %v5632_v63, 1  ;;  %vm4208_vm10 = vcmp.eq.s32.totalorder %v5437_v7, 1  ;;  %v2657_v28 = vsel %vm983_vm7, nan, %v2656_v47 }
 0x117   : > { %v1155_v24 = vadd.s32 %v5560_v14, %v5557_v4  ;;  %v1427_v23 = vshrl.u32 %v5005_v44, %v1426_v26  ;;  %vm1446_vm5 = vcmp.lt.s32.totalorder %v5632_v63, 4  ;;  %vm1445_vm11 = vcmp.lt.s32.totalorder %v5632_v63, 3 }
 0x118   : > { %v4446_v30 = vadd.s32 4294967294, %v1167_v3  ;;  %v1448_v33 = vsel %vm1446_vm5, %v1436_v55, 2102212464  ;;  %v1459_v10 = vshll.u32 %v1419_v58, 8  ;;  %v1291_v53 = vsel %vm5551_vm8, %v5243_v11, %v1288_v35 }
 0x119   : > { %v1442_v2 = vor.u32 %v1441_v31, %v1440_v54  ;;  %vm1444_vm4 = vcmp.lt.s32.totalorder %v5632_v63, 2  ;;  %v1451_v4 = vsel %vm1443_vm9, %v1430_v59, %v1433_v22  ;;  %v1452_v3 = vsel %vm1446_vm5, %v1439_v61, 920167782 }
 0x11a   : > { %vm4447_vm12 = vcmp.lt.s32.totalorder %v4446_v30, 0  ;;  %v4452_v14 = vadd.s32 4294967169, %v1311_v18  ;;  %v5679_v26 = vand.u32 8388607, %v7133_v20  ;;  %v1447_v32 = vsel %vm1443_vm9, %v1427_v23, %v1430_v59 }
 0x11b   : > { %v1170_v27 = vsel %vm4447_vm12, 0, %v4446_v30  ;;  %v1449_v54 = vsel %vm1445_vm11, %v1433_v22, %v1448_v33  ;;  %v1453_v60 = vsel %vm1445_vm11, %v1436_v55, %v1452_v3  ;;  %v1455_v37 = vsel %vm1443_vm9, %v1433_v22, %v1436_v55 }
 0x11c   : > { %v1171_v38 = vsub.s32 32, %v1170_v27  ;;  %v1175_v56 = vsub.s32 4294967266, %v1170_v27  ;;  %v1454_v13 = vsel %vm1444_vm4, %v1451_v4, %v1453_v60  ;;  %4847 = vcosq.f32 %v1291_v53 }
 0x11d   : > { %v1456_v1 = vsel %vm1446_vm5, %v1442_v2, 1326507024  ;;  %v5693_v36 = vmul.u32.u64.low %v1459_v10, %v1454_v13  ;;  %v5694_v0 = vmul.u32.u64.high %v1459_v10, %v1454_v13, %v5693_v36  ;;  %4849 = vsinq.f32 %v1291_v53  ;;  %v5725_v53 = vld [vmem:[%s7125_s4] ss:$0 sm:$0xff] }
 0x11e   : > { %v1176_v47 = vadd.s32 127, %v1175_v56  ;;  %v1457_v58 = vsel %vm1445_vm11, %v1439_v61, %v1456_v1  ;;  %v1317_v35 = vadd.s32 1, %v4452_v14  ;;  %v1172_v9 = vshll.u32 %v5630_v34, %v1170_v27 }
 0x11f   : > { %v1185_v18 = vsub.s32 4, %v5603_v12  ;;  %v1450_v22 = vsel %vm1444_vm4, %v1447_v32, %v1449_v54  ;;  %v1458_v59 = vsel %vm1444_vm4, %v1455_v37, %v1457_v58  ;;  %v1173_v31 = vshrl.u32 %v1155_v24, %v1171_v38 }
 0x120   : > { %v1177_v55 = vshll.u32 %v1176_v47, 23  ;;  %v5705_v23 = vmul.u32.u64.low %v1459_v10, %v1458_v59  ;;  %v5706_v30 = vmul.u32.u64.high %v1459_v10, %v1458_v59, %v5705_v23  ;;  %vm1101_vm8 = vcmp.lt.s32.totalorder %v5370_v49, 0 }
 0x121   : > { %v1469_v61 = vadd.s32 1, %v5694_v0  ;;  %vm1318_vm13 = vcmp.gt.s32.totalorder %v1317_v35, 0  ;;  %v5714_v34 = vsel %vm4208_vm10, %v5615_v48, %v5619_v29  ;;  %vm5718_vm14 = vcmp.le.f32.partialorder %v1099_v40, 0.7853982 }
 0x122   : > { %v1466_v24 = vmul.u32 %v1459_v10, %v1450_v22  ;;  %v1319_v33 = vsel %vm1318_vm13, %v1317_v35, 0  ;;  %v5730_v2 = vmul.f32 %v5725_v53, %v859_v16  ;;  %v5735_v48 = vsel %vm4208_vm10, %v5646_v5, %v2657_v28 }
 0x123   : > { %vm1302_vm15 = vcmp.eq.s32.totalorder %v5650_v57, 2  ;;  %vm2962_vm0 = vcmp.eq.s32.totalorder %v5611_v39, 2  ;;  %v1315_v40 = vor.u32 8388608, %v5679_v26  ;;  %v1321_v29 = vand.u32 31, %v1319_v33 }
 0x124   : > { %vm1299_vm1 = vcmp.eq.s32.totalorder %v5650_v57, 0  ;;  %vm2959_vm2 = vcmp.eq.s32.totalorder %v5611_v39, 0  ;;  %v1174_v62 = vor.u32 %v1173_v31, %v1172_v9  ;;  %v1178_v10 = vor.u32 4788187, %v1177_v55 }
 0x125   : > { %v1186_v16 = vsel %vm1101_vm8, %v1185_v18, %v5603_v12  ;;  %vm1468_vm3 = vc.u32 %v5706_v30, %v5693_v36  ;;  %v1322_v28 = vsub.s32 32, %v1321_v29  ;;  %v1324_v4 = vshll.u32 %v5005_v44, %v1321_v29 }
 0x126   : > { %v1470_v5 = vsel %vm1468_vm3, %v1469_v61, %v5694_v0  ;;  %v1327_v3 = vshll.u32 %v7135_v50, %v1321_v29  ;;  %v5750_v26 = vshrl.u32 %v1319_v33, 5  ;;  %v7149_v27 = vmov 2102212464   ;;  %v4848_v60 = vpop.eup %4847 }
 0x127   : > { %v1471_v14 = vadd.s32 %v1470_v5, %v1466_v24  ;;  %v1333_v32 = vshll.u32 %v7149_v27, %v1321_v29  ;;  %v1622_v54 = vand.u32 2139095040, %v5730_v2  ;;  %v1325_v12 = vshrl.u32 %v7135_v50, %v1322_v28  ;;  %v4850_v1 = vpop.eup %4849 }
 0x128   : > { %v7150_v38 = vmov 2131351028   ;;  %v1331_v37 = vshrl.u32 %v7149_v27, %v1322_v28  ;;  %vm1298_vm6 = vcmp.lt.s32.totalorder %v5650_v57, 2  ;;  %v1179_v0 = vand.u32 2147483647, %v1178_v10 }
 0x129   : > { %v1328_v56 = vshrl.u32 %v7150_v38, %v1322_v28  ;;  %v1330_v13 = vshll.u32 %v7150_v38, %v1321_v29  ;;  %v1181_v47 = vcvt.s32.f32 %v1174_v62  ;;  %v1472_v58 = vadd.s32 536870912, %v1471_v14 }
 0x12a   : > { %v1334_v35 = vshrl.u32 %v5009_v41, %v1322_v28  ;;  %vm2958_vm7 = vcmp.lt.s32.totalorder %v5611_v39, 2  ;;  %v1326_v9 = vor.u32 %v1325_v12, %v1324_v4  ;;  %v1336_v22 = vshll.u32 %v5009_v41, %v1321_v29  ;;  %v5772_v29 = vpop.f32.mrb[8].mxu0 }
 0x12b   : > { %v1329_v18 = vor.u32 %v1328_v56, %v1327_v3  ;;  %v1337_v59 = vshrl.u32 %v5010_v8, %v1322_v28  ;;  %v1303_v31 = vxor.u32 2147483648, %v4848_v60  ;;  %v5763_v55 = vshrl.u32 %v1472_v58, 30 }
 0x12c   : > { %v1335_v23 = vor.u32 %v1334_v35, %v1333_v32  ;;  %vm1339_vm9 = vcmp.lt.s32.totalorder %v5750_v26, 1  ;;  %v1300_v61 = vxor.u32 2147483648, %v4850_v1  ;;  %v1188_v24 = vsel %vm5718_vm14, 0, %v1186_v16 }
 0x12d   : > { %v1332_v33 = vor.u32 %v1331_v37, %v1330_v13  ;;  %v1623_v62 = vshrl.u32 %v1622_v54, 23  ;;  %vm1295_vm5 = vweird.f32 %v5243_v11  ;;  %v1182_v10 = vmul.f32 %v1181_v47, %v1179_v0 }
 0x12e   : > { %v1474_v5 = vshll.u32 %v5763_v55, 30  ;;  %vm1341_vm11 = vcmp.lt.s32.totalorder %v5750_v26, 3  ;;  %vm1342_vm4 = vcmp.lt.s32.totalorder %v5750_v26, 4  ;;  %v1338_v4 = vor.u32 %v1337_v59, %v1336_v22 }
 0x12f   : > { %vm1340_vm12 = vcmp.lt.s32.totalorder %v5750_v26, 2  ;;  %v1347_v3 = vsel %vm1339_vm9, %v1326_v9, %v1329_v18  ;;  %v5777_v16 = vshll.u32 %v1315_v40, 8  ;;  %v1304_v32 = vsel %vm1302_vm15, %v1303_v31, %v4850_v1 }
 0x130   : > { %v2964_v54 = vsel %vm2962_vm0, %v1303_v31, %v4850_v1  ;;  %v5783_v12 = vsub.s32 %v1471_v14, %v1474_v5  ;;  %v1348_v56 = vsel %vm1342_vm4, %v1335_v23, 920167782  ;;  %v1301_v13 = vsel %vm1299_vm1, %v4848_v60, %v1300_v61 }
 0x131   : > { %v2961_v37 = vsel %vm2959_vm2, %v4848_v60, %v1300_v61  ;;  %v1349_v40 = vsel %vm1341_vm11, %v1332_v33, %v1348_v56  ;;  %v4464_v0 = vadd.s32 4294967169, %v1623_v62  ;;  %v1183_v47 = vxor.u32 2147483648, %v1182_v10 }
 0x132   : > { %vm1413_vm13 = vcmp.lt.s32.totalorder %v5435_v6, 0  ;;  %v1477_v1 = vsub.s32 0, %v5783_v12  ;;  %v1323_v14 = vshrl.u32 %v5005_v44, %v1322_v28  ;;  %v1350_v58 = vsel %vm1340_vm12, %v1347_v3, %v1349_v40 }
 0x133   : > { %v1344_v35 = vsel %vm1342_vm4, %v1332_v33, 2102212464  ;;  %v1352_v60 = vsel %vm1342_vm4, %v1338_v4, 1326507024  ;;  %v5803_v22 = vmul.u32.u64.low %v5777_v16, %v1350_v58  ;;  %v5804_v59 = vmul.u32.u64.high %v5777_v16, %v1350_v58, %v5803_v22 }
 0x134   : > { %v4457_v31 = vmin.u32 %v1477_v1, %v5783_v12  ;;  %v1351_v61 = vsel %vm1339_vm9, %v1329_v18, %v1332_v33  ;;  %v7137_v28 = vand.u32 2147483647, %v5730_v2  ;;  %v825_v62 = vadd.s32 48, %v5199_v42 }
 0x135   : > { %v1305_v5 = vsel %vm1298_vm6, %v1301_v13, %v1304_v32  ;;  %v1192_v3 = vadd.s32 3, %v1188_v24  ;;  %v1353_v4 = vsel %vm1341_vm11, %v1335_v23, %v1352_v60  ;;  %v1629_v56 = vadd.s32 1, %v4464_v0 }
 0x136   : > { %v2965_v40 = vsel %vm2958_vm7, %v2961_v37, %v2964_v54  ;;  %v7151_v1 = vand.u32 2147483647, %v5435_v6  ;;  %v1479_v33 = vclz %v4457_v31  ;;  %v1343_v20 = vsel %vm1339_vm9, %v1323_v14, %v1326_v9 }
 0x137   : > { %v1345_v57 = vsel %vm1341_vm11, %v1329_v18, %v1344_v35  ;;  %v1184_v23 = vsel %vm1101_vm8, %v1183_v47, %v1182_v10  ;;  %v1497_v32 = vsub.s32 4, %v5763_v55  ;;  %v1354_v39 = vsel %vm1340_vm12, %v1351_v61, %v1353_v4 }
 0x138   : > { %vm5820_vm15 = vcmp.le.f32.partialorder %v7151_v1, 0.7853982  ;;  %vm1630_vm0 = vcmp.gt.s32.totalorder %v1629_v56, 0  ;;  %v4458_v54 = vadd.s32 4294967294, %v1479_v33  ;;  %v1306_v9 = vsel %vm1295_vm5, nan, %v1305_v5 }
 0x139   : > { %v5834_v13 = vmul.u32.u64.low %v5777_v16, %v1354_v39  ;;  %v5835_v37 = vmul.u32.u64.high %v5777_v16, %v1354_v39, %v5834_v13  ;;  %v1631_v0 = vsel %vm1630_vm0, %v1629_v56, 0  ;;  %v5839_v14 = vand.u32 3, %v1188_v24 }
 0x13a   : > { %v1346_v18 = vsel %vm1340_vm12, %v1343_v20, %v1345_v57  ;;  %v1633_v10 = vand.u32 31, %v1631_v0  ;;  %v2966_v47 = vsel %vm1295_vm5, nan, %v2965_v40  ;;  %v1187_v35 = vsel %vm5718_vm14, %v5370_v49, %v1184_v23 }
 0x13b   : > { %v1467_v60 = vadd.s32 %v5693_v36, %v5706_v30  ;;  %vm4459_vm8 = vcmp.lt.s32.totalorder %v4458_v54, 0  ;;  %v1498_v24 = vsel %vm1413_vm13, %v1497_v32, %v5763_v55  ;;  %v1365_v26 = vadd.s32 1, %v5804_v59 }
 0x13c   : > { %v1482_v31 = vsel %vm4459_vm8, 0, %v4458_v54  ;;  %v1626_v20 = vand.u32 8388607, %v7137_v28  ;;  %v1362_v63 = vmul.u32 %v5777_v16, %v1346_v18  ;;  %v1634_v5 = vsub.s32 32, %v1633_v10 }
 0x13d   : > { %v1483_v11 = vsub.s32 32, %v1482_v31  ;;  %v1484_v61 = vshll.u32 %v5783_v12, %v1482_v31  ;;  %v5860_v36 = vsel %vm4208_vm10, %v1306_v9, %v2966_v47  ;;  %4851 = vcosq.f32 %v1187_v35 }
 0x13e   : > { %v5862_v30 = vand.u32 3, %v1192_v3  ;;  %v1487_v4 = vsub.s32 4294967266, %v1482_v31  ;;  %4853 = vsinq.f32 %v1187_v35  ;;  %vm1364_vm14 = vc.u32 %v5835_v37, %v5803_v22 }
 0x13f   : > { %v1485_v55 = vshrl.u32 %v1467_v60, %v1483_v11  ;;  %v842_v56 = vadd.s32 %v5209_v51, %v825_v62  ;;  %v1500_v16 = vsel %vm5820_vm15, 0, %v1498_v24  ;;  %v1366_v12 = vsel %vm1364_vm14, %v1365_v26, %v5804_v59 }
 0x140   : > { %v1488_v40 = vadd.s32 127, %v1487_v4  ;;  %v1627_v1 = vor.u32 8388608, %v1626_v20  ;;  %v1367_v57 = vadd.s32 %v1366_v12, %v1362_v63  ;;  %v1636_v3 = vshll.u32 %v5005_v44, %v1633_v10 }
 0x141   : > { %v1486_v33 = vor.u32 %v1485_v55, %v1484_v61  ;;  %v1637_v23 = vshrl.u32 %v7135_v50, %v1634_v5  ;;  %v1639_v39 = vshll.u32 %v7135_v50, %v1633_v10  ;;  %v1640_v54 = vshrl.u32 %v7150_v38, %v1634_v5 }
 0x142   : > { %v1489_v32 = vshll.u32 %v1488_v40, 23  ;;  %v1642_v62 = vshll.u32 %v7150_v38, %v1633_v10  ;;  %v1368_v13 = vadd.s32 536870912, %v1367_v57  ;;  %v5875_v9 = vshrl.u32 %v1631_v0, 5 }
 0x143   : > { %v1643_v18 = vshrl.u32 %v7149_v27, %v1634_v5  ;;  %v858_v59 = vcvt.s32.f32 %v842_v56  ;;  %v1493_v35 = vcvt.s32.f32 %v1486_v33  ;;  %v1645_v60 = vshll.u32 %v7149_v27, %v1633_v10 }
 0x144   : > { %v1490_v47 = vor.u32 4788187, %v1489_v32  ;;  %v1646_v31 = vshrl.u32 %v5009_v41, %v1634_v5  ;;  %v5880_v24 = vshrl.u32 %v1368_v13, 30  ;;  %v1638_v26 = vor.u32 %v1637_v23, %v1636_v3 }
 0x145   : > { %v1648_v20 = vshll.u32 %v5009_v41, %v1633_v10  ;;  %v1649_v11 = vshrl.u32 %v5010_v8, %v1634_v5  ;;  %v1641_v63 = vor.u32 %v1640_v54, %v1639_v39  ;;  %v1644_v0 = vor.u32 %v1643_v18, %v1642_v62 }
 0x146   : > { %v1491_v61 = vand.u32 2147483647, %v1490_v47  ;;  %v1647_v4 = vor.u32 %v1646_v31, %v1645_v60  ;;  %vm1195_vm1 = vcmp.eq.s32.totalorder %v5862_v30, 0  ;;  %vm1198_vm2 = vcmp.eq.s32.totalorder %v5862_v30, 2 }
 0x147   : > { %vm2859_vm3 = vcmp.eq.s32.totalorder %v5839_v14, 2  ;;  %v1370_v55 = vshll.u32 %v5880_v24, 30  ;;  %vm1651_vm6 = vcmp.lt.s32.totalorder %v5875_v9, 1  ;;  %vm1653_vm7 = vcmp.lt.s32.totalorder %v5875_v9, 3  ;;  %v4852_v10 = vpop.eup %4851 }
 0x148   : > { %v5890_v56 = vshll.u32 %v1627_v1, 8  ;;  %vm2856_vm9 = vcmp.eq.s32.totalorder %v5839_v14, 0  ;;  %v1494_v40 = vmul.f32 %v1493_v35, %v1491_v61  ;;  %v1650_v12 = vor.u32 %v1649_v11, %v1648_v20  ;;  %v4854_v3 = vpop.eup %4853 }
 0x149   : > { %vm1654_vm5 = vcmp.lt.s32.totalorder %v5875_v9, 4  ;;  %v5895_v33 = vmul.f32 %v5725_v53, %v858_v59  ;;  %v1504_v23 = vadd.s32 3, %v1500_v16  ;;  %v5897_v32 = vsub.s32 %v1367_v57, %v1370_v55 }
 0x14a   : > { %v1635_v39 = vshrl.u32 %v5005_v44, %v1634_v5  ;;  %v1660_v1 = vsel %vm1654_vm5, %v1647_v4, 920167782  ;;  %vm1194_vm11 = vcmp.lt.s32.totalorder %v5862_v30, 2  ;;  %v1495_v54 = vxor.u32 2147483648, %v1494_v40 }
 0x14b   : > { %vm1309_vm4 = vcmp.lt.s32.totalorder %v5608_v21, 0  ;;  %vm1652_vm12 = vcmp.lt.s32.totalorder %v5875_v9, 2  ;;  %v1659_v62 = vsel %vm1651_vm6, %v1638_v26, %v1641_v63  ;;  %v1661_v13 = vsel %vm1653_vm7, %v1644_v0, %v1660_v1 }
 0x14c   : > { %v1199_v57 = vxor.u32 2147483648, %v4852_v10  ;;  %vm2855_vm0 = vcmp.lt.s32.totalorder %v5839_v14, 2  ;;  %v5910_v5 = vand.u32 3, %v1500_v16  ;;  %v1373_v18 = vsub.s32 0, %v5897_v32 }
 0x14d   : > { %v1656_v59 = vsel %vm1654_vm5, %v1644_v0, 2102212464  ;;  %v1196_v47 = vxor.u32 2147483648, %v4854_v3  ;;  %v1496_v35 = vsel %vm1413_vm13, %v1495_v54, %v1494_v40  ;;  %v1664_v60 = vsel %vm1654_vm5, %v1650_v12, 1326507024 }
 0x14e   : > { %v1518_v31 = vand.u32 2139095040, %v5895_v33  ;;  %v1499_v20 = vsel %vm5820_vm15, %v5435_v6, %v1496_v35  ;;  %v7154_v16 = vand.u32 2147483647, %v5608_v21  ;;  %v4453_v61 = vmin.u32 %v1373_v18, %v5897_v32 }
 0x14f   : > { %v1662_v55 = vsel %vm1652_vm12, %v1659_v62, %v1661_v13  ;;  %v1663_v40 = vsel %vm1651_vm6, %v1641_v63, %v1644_v0  ;;  %vm1191_vm13 = vweird.f32 %v5370_v49  ;;  %4855 = vcosq.f32 %v1499_v20  ;;  %v5944_v13 = vpop.f32.mrb[9].mxu0 }
 0x150   : > { %vm5925_vm8 = vcmp.le.f32.partialorder %v7154_v16, 0.7853982  ;;  %v1655_v58 = vsel %vm1651_vm6, %v1635_v39, %v1638_v26  ;;  %v1657_v12 = vsel %vm1653_vm7, %v1641_v63, %v1656_v59  ;;  %v1665_v1 = vsel %vm1653_vm7, %v1647_v4, %v1664_v60 }
 0x151   : > { %4857 = vsinq.f32 %v1499_v20  ;;  %v5941_v54 = vand.u32 3, %v1504_v23  ;;  %v1375_v18 = vclz %v4453_v61  ;;  %v1393_v62 = vsub.s32 4, %v5880_v24 }
 0x152   : > { %v1666_v0 = vsel %vm1652_vm12, %v1663_v40, %v1665_v1  ;;  %v5949_v35 = vmul.u32.u64.low %v5890_v56, %v1662_v55  ;;  %v5950_v26 = vmul.u32.u64.high %v5890_v56, %v1662_v55, %v5949_v35  ;;  %v7134_v63 = vand.u32 2147483647, %v5895_v33 }
 0x153   : > { %v4454_v39 = vadd.s32 4294967294, %v1375_v18  ;;  %v1658_v4 = vsel %vm1652_vm12, %v1655_v58, %v1657_v12  ;;  %v5957_v23 = vmul.u32.u64.low %v5890_v56, %v1666_v0  ;;  %v5958_v59 = vmul.u32.u64.high %v5890_v56, %v1666_v0, %v5957_v23 }
 0x154   : > { %v1197_v60 = vsel %vm1195_vm1, %v4852_v10, %v1196_v47  ;;  %v1200_v20 = vsel %vm1198_vm2, %v1199_v57, %v4854_v3  ;;  %v2861_v16 = vsel %vm2859_vm3, %v1199_v57, %v4854_v3  ;;  %v1519_v61 = vshrl.u32 %v1518_v31, 23 }
 0x155   : > { %v2858_v55 = vsel %vm2856_vm9, %v4852_v10, %v1196_v47  ;;  %v1363_v9 = vadd.s32 %v5803_v22, %v5835_v37  ;;  %vm4455_vm15 = vcmp.lt.s32.totalorder %v4454_v39, 0  ;;  %v1394_v40 = vsel %vm1309_vm4, %v1393_v62, %v5880_v24 }
 0x156   : > { %v1378_v58 = vsel %vm4455_vm15, 0, %v4454_v39  ;;  %v1674_v12 = vmul.u32 %v5890_v56, %v1658_v4  ;;  %v1677_v1 = vadd.s32 1, %v5950_v26  ;;  %v4460_v18 = vadd.s32 4294967169, %v1519_v61 }
 0x157   : > { %v1201_v3 = vsel %vm1194_vm11, %v1197_v60, %v1200_v20  ;;  %v1379_v57 = vsub.s32 32, %v1378_v58  ;;  %v1380_v10 = vshll.u32 %v5897_v32, %v1378_v58  ;;  %v1383_v47 = vsub.s32 4294967266, %v1378_v58 }
 0x158   : > { %v2862_v22 = vsel %vm2855_vm0, %v2858_v55, %v2861_v16  ;;  %v1396_v37 = vsel %vm5925_vm8, 0, %v1394_v40  ;;  %vm1676_vm14 = vc.u32 %v5958_v59, %v5949_v35  ;;  %v1525_v24 = vadd.s32 1, %v4460_v18 }
 0x159   : > { %v1381_v56 = vshrl.u32 %v1363_v9, %v1379_v57  ;;  %v1384_v31 = vadd.s32 127, %v1383_v47  ;;  %v1678_v62 = vsel %vm1676_vm14, %v1677_v1, %v5950_v26  ;;  %v1522_v30 = vand.u32 8388607, %v7134_v63  ;;  %v4856_v0 = vpop.eup %4855  ;;  %v6048_v63 = vpop.f32.mrb[10].mxu0 }
 0x15a   : > { %vm3165_vm1 = vcmp.eq.s32.totalorder %v5910_v5, 0  ;;  %vm3168_vm2 = vcmp.eq.s32.totalorder %v5910_v5, 2  ;;  %v1679_v14 = vadd.s32 %v1678_v62, %v1674_v12  ;;  %vm1526_vm3 = vcmp.gt.s32.totalorder %v1525_v24, 0 }
 0x15b   : > { %v4858_v32 = vpop.eup %4857  ;;  %v1202_v39 = vsel %vm1191_vm13, nan, %v1201_v3  ;;  %v1382_v4 = vor.u32 %v1381_v56, %v1380_v10  ;;  %v1385_v23 = vshll.u32 %v1384_v31, 23  ;;  %v1527_v60 = vsel %vm1526_vm3, %v1525_v24, 0 }
 0x15c   : > { %v2863_v26 = vsel %vm1191_vm13, nan, %v2862_v22  ;;  %vm1506_vm6 = vcmp.lt.s32.totalorder %v5941_v54, 2  ;;  %vm3164_vm7 = vcmp.lt.s32.totalorder %v5910_v5, 2  ;;  %v1400_v20 = vadd.s32 3, %v1396_v37 }
 0x15d   : > { %v1680_v16 = vadd.s32 536870912, %v1679_v14  ;;  %v1529_v61 = vand.u32 31, %v1527_v60  ;;  %v1386_v55 = vor.u32 4788187, %v1385_v23  ;;  %v1389_v9 = vcvt.s32.f32 %v1382_v4 }
 0x15e   : > { %v1523_v40 = vor.u32 8388608, %v1522_v30  ;;  %v828_v58 = vadd.s32 72, %v5199_v42  ;;  %vm1507_vm9 = vcmp.eq.s32.totalorder %v5941_v54, 0  ;;  %v1508_v12 = vxor.u32 2147483648, %v4858_v32 }
 0x15f   : > { %v1511_v1 = vxor.u32 2147483648, %v4856_v0  ;;  %v5997_v18 = vshrl.u32 %v1680_v16, 30  ;;  %v6001_v49 = vsel %vm4208_vm10, %v1202_v39, %v2863_v26  ;;  %vm1503_vm5 = vweird.f32 %v5435_v6 }
 0x160   : > { %vm1510_vm11 = vcmp.eq.s32.totalorder %v5941_v54, 2  ;;  %v1387_v3 = vand.u32 2147483647, %v1386_v55  ;;  %v1530_v57 = vsub.s32 32, %v1529_v61  ;;  %v6005_v10 = vand.u32 3, %v1400_v20 }
 0x161   : > { %v6007_v47 = vand.u32 3, %v1396_v37  ;;  %v1682_v22 = vshll.u32 %v5997_v18, 30  ;;  %v827_v24 = vadd.s32 64, %v5199_v42  ;;  %v6013_v31 = vadd.s32 %v5949_v35, %v5958_v59 }
 0x162   : > { %v1390_v56 = vmul.f32 %v1389_v9, %v1387_v3  ;;  %v6015_v62 = vshll.u32 %v1523_v40, 8  ;;  %v6018_v30 = vadd.s32 %v5209_v51, %v828_v58  ;;  %v1509_v39 = vsel %vm1507_vm9, %v4856_v0, %v1508_v12 }
 0x163   : > { %v1512_v4 = vsel %vm1510_vm11, %v1511_v1, %v4858_v32  ;;  %v3170_v37 = vsel %vm3168_vm2, %v1511_v1, %v4858_v32  ;;  %v6024_v23 = vsub.s32 %v1679_v14, %v1682_v22  ;;  %v3167_v26 = vsel %vm3165_vm1, %v4856_v0, %v1508_v12 }
 0x164   : > { %v1391_v20 = vxor.u32 2147483648, %v1390_v56  ;;  %v1532_v35 = vshll.u32 %v5005_v44, %v1529_v61  ;;  %v1533_v59 = vshrl.u32 %v7135_v50, %v1530_v57  ;;  %v1535_v55 = vshll.u32 %v7135_v50, %v1529_v61 }
 0x165   : > { %v1685_v16 = vsub.s32 0, %v6024_v23  ;;  %v1536_v9 = vshrl.u32 %v7150_v38, %v1530_v57  ;;  %v1538_v40 = vshll.u32 %v7150_v38, %v1529_v61  ;;  %v1539_v32 = vshrl.u32 %v7149_v27, %v1530_v57 }
 0x166   : > { %v1392_v14 = vsel %vm1309_vm4, %v1391_v20, %v1390_v56  ;;  %v1541_v0 = vshll.u32 %v7149_v27, %v1529_v61  ;;  %v1542_v58 = vshrl.u32 %v5009_v41, %v1530_v57  ;;  %v6043_v3 = vshrl.u32 %v1527_v60, 5 }
 0x167   : > { %v1395_v12 = vsel %vm5925_vm8, %v5608_v21, %v1392_v14  ;;  %v4465_v1 = vmin.u32 %v1685_v16, %v6024_v23  ;;  %v6046_v22 = vadd.s32 %v5209_v51, %v827_v24  ;;  %v1513_v56 = vsel %vm1506_vm6, %v1509_v39, %v1512_v4 }
 0x168   : > { %v3171_v20 = vsel %vm3164_vm7, %v3167_v26, %v3170_v37  ;;  %4859 = vcosq.f32 %v1395_v12  ;;  %v861_v50 = vcvt.s32.f32 %v6018_v30  ;;  %v1534_v14 = vor.u32 %v1533_v59, %v1532_v35 }
 0x169   : > { %4861 = vsinq.f32 %v1395_v12  ;;  %v1687_v11 = vclz %v4465_v1  ;;  %v1537_v16 = vor.u32 %v1536_v9, %v1535_v55  ;;  %vm1406_vm4 = vcmp.eq.s32.totalorder %v6005_v10, 2 }
 0x16a   : > { %vm3065_vm12 = vcmp.eq.s32.totalorder %v6007_v47, 2  ;;  %v1540_v60 = vor.u32 %v1539_v32, %v1538_v40  ;;  %v1543_v24 = vor.u32 %v1542_v58, %v1541_v0  ;;  %v1544_v28 = vshll.u32 %v5009_v41, %v1529_v61 }
 0x16b   : > { %v1545_v54 = vshrl.u32 %v5010_v8, %v1530_v57  ;;  %v6061_v5 = vsel %vm1503_vm5, nan, %v1513_v56  ;;  %vm1403_vm0 = vcmp.eq.s32.totalorder %v6005_v10, 0  ;;  %vm3062_vm8 = vcmp.eq.s32.totalorder %v6007_v47, 0 }
 0x16c   : > { %v4466_v30 = vadd.s32 4294967294, %v1687_v11  ;;  %vm1547_vm13 = vcmp.lt.s32.totalorder %v6043_v3, 1  ;;  %vm1549_vm15 = vcmp.lt.s32.totalorder %v6043_v3, 3  ;;  %vm1402_vm14 = vcmp.lt.s32.totalorder %v6005_v10, 2 }
 0x16d   : > { %vm3061_vm1 = vcmp.lt.s32.totalorder %v6007_v47, 2  ;;  %v1531_v61 = vshrl.u32 %v5005_v44, %v1530_v57  ;;  %v1546_v39 = vor.u32 %v1545_v54, %v1544_v28  ;;  %vm1548_vm2 = vcmp.lt.s32.totalorder %v6043_v3, 2 }
 0x16e   : > { %vm1550_vm3 = vcmp.lt.s32.totalorder %v6043_v3, 4  ;;  %vm1399_vm6 = vweird.f32 %v5608_v21  ;;  %vm4467_vm7 = vcmp.lt.s32.totalorder %v4466_v30, 0  ;;  %v1555_v37 = vsel %vm1547_vm13, %v1534_v14, %v1537_v16 }
 0x16f   : > { %v1552_v4 = vsel %vm1550_vm3, %v1540_v60, 2102212464  ;;  %v1556_v26 = vsel %vm1550_vm3, %v1543_v24, 920167782  ;;  %v1690_v35 = vsel %vm4467_vm7, 0, %v4466_v30  ;;  %v1559_v28 = vsel %vm1547_vm13, %v1537_v16, %v1540_v60 }
 0x170   : > { %v1557_v59 = vsel %vm1549_vm15, %v1540_v60, %v1556_v26  ;;  %v1560_v57 = vsel %vm1550_vm3, %v1546_v39, 1326507024  ;;  %v3172_v55 = vsel %vm1503_vm5, nan, %v3171_v20  ;;  %vm1621_vm9 = vcmp.lt.s32.totalorder %v5730_v2, 0 }
 0x171   : > { %v1691_v9 = vsub.s32 32, %v1690_v35  ;;  %v1692_v40 = vshll.u32 %v6024_v23, %v1690_v35  ;;  %v1695_v32 = vsub.s32 4294967266, %v1690_v35  ;;  %v1705_v0 = vsub.s32 4, %v5997_v18 }
 0x172   : > { %v1551_v58 = vsel %vm1547_vm13, %v1531_v61, %v1534_v14  ;;  %v1558_v12 = vsel %vm1548_vm2, %v1555_v37, %v1557_v59  ;;  %v1561_v1 = vsel %vm1549_vm15, %v1543_v24, %v1560_v57  ;;  %v1553_v23 = vsel %vm1549_vm15, %v1537_v16, %v1552_v4  ;;  %v4860_v11 = vpop.eup %4859 }
 0x173   : > { %v1693_v6 = vshrl.u32 %v6013_v31, %v1691_v9  ;;  %v1696_v56 = vadd.s32 127, %v1695_v32  ;;  %v1562_v20 = vsel %vm1548_vm2, %v1559_v28, %v1561_v1  ;;  %v7157_v60 = vand.u32 2147483647, %v5730_v2  ;;  %v4862_v16 = vpop.eup %4861 }
 0x174   : > { %v6107_v24 = vmul.u32.u64.low %v6015_v62, %v1562_v20  ;;  %v6108_v30 = vmul.u32.u64.high %v6015_v62, %v1562_v20, %v6107_v24  ;;  %v6111_v31 = vmul.u32.u64.low %v6015_v62, %v1558_v12  ;;  %v6112_v61 = vmul.u32.u64.high %v6015_v62, %v1558_v12, %v6111_v31 }
 0x175   : > { %vm6102_vm5 = vcmp.le.f32.partialorder %v7157_v60, 0.7853982  ;;  %v1407_v37 = vxor.u32 2147483648, %v4860_v11  ;;  %v1694_v26 = vor.u32 %v1693_v6, %v1692_v40  ;;  %v1697_v35 = vshll.u32 %v1696_v56, 23 }
 0x176   : > { %v1404_v28 = vxor.u32 2147483648, %v4862_v16  ;;  %v1554_v57 = vsel %vm1548_vm2, %v1551_v58, %v1553_v23  ;;  %v6120_v9 = vmul.f32 %v5725_v53, %v861_v50  ;;  %vm1572_vm11 = vc.u32 %v6108_v30, %v6111_v31 }
 0x177   : > { %v1408_v12 = vsel %vm1406_vm4, %v1407_v37, %v4862_v16  ;;  %v1698_v1 = vor.u32 4788187, %v1697_v35  ;;  %v1701_v50 = vcvt.s32.f32 %v1694_v26  ;;  %v1570_v60 = vmul.u32 %v6015_v62, %v1554_v57 }
 0x178   : > { %v3064_v3 = vsel %vm3062_vm8, %v4860_v11, %v1404_v28  ;;  %v4214_v21 = vsel %vm4208_vm10, %v6061_v5, %v3172_v55  ;;  %vm1517_vm2 = vcmp.lt.s32.totalorder %v5895_v33, 0 }
 0x179   : > { %v1699_v23 = vand.u32 2147483647, %v1698_v1 }
 0x17a   : > { %v4615_v14 = vpop.f32.mrb[0].mxu1 }
 0x17b   : > { %v744_v39 = vadd.f32 %v5454_v17, %v4615_v14  ;;  %v540_v4 = vpop.f32.mrb[1].mxu1  ;;  %v3067_v17 = vsel %vm3065_vm12, %v1407_v37, %v4862_v16  ;;  %v1702_v47 = vmul.f32 %v1701_v50, %v1699_v23  ;;  %v1573_v16 = vadd.s32 1, %v6112_v61 }
 0x17c   : > { %v739_v59 = vadd.f32 %v5464_v25, %v540_v4  ;;  %v1405_v25 = vsel %vm1403_vm0, %v4860_v11, %v1404_v28  ;;  %v830_v37 = vadd.s32 88, %v5199_v42  ;;  %vm1711_vm12 = vweird.f32 %v5730_v2 }
 0x17d   : > { %v4226_v32 = vadd.f32 %v5714_v34, %v744_v39  ;;  %v1409_v56 = vsel %vm1402_vm14, %v1405_v25, %v1408_v12  ;;  %v1703_v39 = vxor.u32 2147483648, %v1702_v47  ;;  %v1574_v5 = vsel %vm1572_vm11, %v1573_v16, %v6112_v61 }
 0x17e   : > { %v4225_v40 = vadd.f32 %v5735_v48, %v739_v59  ;;  %v4618_v6 = vpop.f32.mrb[2].mxu1  ;;  %v3068_v48 = vsel %vm3061_vm1, %v3064_v3, %v3067_v17  ;;  %v1410_v11 = vsel %vm1399_vm6, nan, %v1409_v56  ;;  %v1575_v35 = vadd.s32 %v1574_v5, %v1570_v60 }
 0x17f   : > { %4242 = vst [vmem:[%s6133_s27 + $0x8] sm:$0xff] %v4226_v32  ;;  %v754_v34 = vadd.f32 %v5484_v19, %v4618_v6  ;;  %v550_v58 = vpop.f32.mrb[3].mxu1  ;;  %v3069_v14 = vsel %vm1399_vm6, nan, %v3068_v48  ;;  %v1706_v19 = vsel %vm1621_vm9, %v1705_v0, %v5997_v18  ;;  %v1830_v18 = vand.u32 2139095040, %v6120_v9 }
 0x180   : > { %4241 = vst [vmem:[%s6133_s27] sm:$0xff] %v4225_v40  ;;  %v749_v20 = vadd.f32 %v5489_v52, %v550_v58  ;;  %v4213_v62 = vsel %vm4208_vm10, %v1410_v11, %v3069_v14  ;;  %v1827_v59 = vand.u32 2147483647, %v6120_v9  ;;  %v1576_v1 = vadd.s32 536870912, %v1575_v35 }
 0x181   : > { %v4228_v10 = vadd.f32 %v5860_v36, %v754_v34  ;;  %v1831_v55 = vshrl.u32 %v1830_v18, 23  ;;  %v860_v40 = vcvt.s32.f32 %v6046_v22  ;;  %v6192_v58 = vadd.s32 %v5209_v51, %v830_v37 }
 0x182   : > { %v4227_v52 = vadd.f32 %v6001_v49, %v749_v20  ;;  %v4621_v24 = vpop.f32.mrb[4].mxu1  ;;  %v1708_v49 = vsel %vm6102_vm5, 0, %v1706_v19  ;;  %v6187_v3 = vshrl.u32 %v1576_v1, 30  ;;  %v1834_v50 = vand.u32 8388607, %v1827_v59 }
 0x183   : > { %4244 = vst [vmem:[%s6133_s27 + $0x18] sm:$0xff] %v4228_v10  ;;  %v764_v36 = vadd.f32 %v5503_v45, %v4621_v24  ;;  %v560_v0 = vpop.f32.mrb[5].mxu1  ;;  %v1704_v45 = vsel %vm1621_vm9, %v1703_v39, %v1702_v47  ;;  %v4472_v12 = vadd.s32 4294967169, %v1831_v55  ;;  %v6182_v6 = vand.u32 3, %v1708_v49  ;;  %v6213_v47 = vpop.f32.mrb[11].mxu0 }
 0x184   : > { %4243 = vst [vmem:[%s6133_s27 + $0x10] sm:$0xff] %v4227_v52  ;;  %v759_v4 = vadd.f32 %v5506_v43, %v560_v0  ;;  %v1707_v32 = vsel %vm6102_vm5, %v5730_v2, %v1704_v45  ;;  %v1712_v43 = vadd.s32 3, %v1708_v49  ;;  %v1578_v22 = vshll.u32 %v6187_v3, 30 }
 0x185   : > { %v4230_v26 = vadd.f32 %v4214_v21, %v764_v36  ;;  %4863 = vcosq.f32 %v1707_v32  ;;  %v1837_v54 = vadd.s32 1, %v4472_v12  ;;  %v6199_v23 = vmul.f32 %v5725_v53, %v860_v40 }
 0x186   : > { %v4229_v28 = vadd.f32 %v4213_v62, %v759_v4  ;;  %v4624_v57 = vpop.f32.mrb[6].mxu1  ;;  %4865 = vsinq.f32 %v1707_v32  ;;  %vm3370_vm0 = vcmp.lt.s32.totalorder %v6182_v6, 2  ;;  %vm3371_vm8 = vcmp.eq.s32.totalorder %v6182_v6, 0 }
 0x187   : > { %4246 = vst [vmem:[%s6133_s27 + $0x28] sm:$0xff] %v4230_v26  ;;  %v6178_v61 = vadd.f32 %v5517_v46, %v4624_v57  ;;  %v570_v17 = vpop.f32.mrb[7].mxu1  ;;  %v1713_v46 = vand.u32 3, %v1712_v43  ;;  %vm1838_vm4 = vcmp.gt.s32.totalorder %v1837_v54, 0  ;;  %vm3374_vm13 = vcmp.eq.s32.totalorder %v6182_v6, 2 }
 0x188   : > { %4245 = vst [vmem:[%s6133_s27 + $0x20] sm:$0xff] %v4229_v28  ;;  %v6185_v25 = vadd.f32 %v5589_v15, %v570_v17  ;;  %v1839_v48 = vsel %vm1838_vm4, %v1837_v54, 0  ;;  %v6208_v14 = vsub.s32 %v1575_v35, %v1578_v22  ;;  %v1723_v19 = vand.u32 2147483647, %v6199_v23 }
 0x189   : > { %v1841_v20 = vand.u32 31, %v1839_v48  ;;  %vm1714_vm15 = vcmp.lt.s32.totalorder %v1713_v46, 2  ;;  %vm1715_vm14 = vcmp.eq.s32.totalorder %v1713_v46, 0  ;;  %vm1718_vm1 = vcmp.eq.s32.totalorder %v1713_v46, 2 }
 0x18a   : > { %v4627_v34 = vpop.f32.mrb[8].mxu1  ;;  %v1571_v60 = vadd.s32 %v6111_v31, %v6108_v30  ;;  %v7160_v24 = vmov 2475754826   ;;  %v1726_v31 = vand.u32 2139095040, %v6199_v23  ;;  %v6232_v4 = vand.u32 8388607, %v1723_v19 }
 0x18b   : > { %v6196_v56 = vadd.f32 %v5772_v29, %v4627_v34  ;;  %v580_v15 = vpop.f32.mrb[9].mxu1  ;;  %v1835_v29 = vor.u32 8388608, %v1834_v50  ;;  %v1842_v53 = vsub.s32 32, %v1841_v20  ;;  %v1844_v52 = vshll.u32 %v5005_v44, %v1841_v20 }
 0x18c   : > { %v6205_v11 = vadd.f32 %v5944_v13, %v580_v15  ;;  %v1581_v13 = vsub.s32 0, %v6208_v14  ;;  %v1847_v21 = vshll.u32 %v7160_v24, %v1841_v20  ;;  %v1850_v0 = vshll.u32 %v7150_v38, %v1841_v20 }
 0x18d   : > { %v1845_v18 = vshrl.u32 %v7160_v24, %v1842_v53  ;;  %v1848_v36 = vshrl.u32 %v7150_v38, %v1842_v53  ;;  %v1851_v62 = vshrl.u32 %v7149_v27, %v1842_v53  ;;  %v6227_v30 = vshll.u32 %v1835_v29, 8 }
 0x18e   : > { %v6211_v10 = vpop.f32.mrb[10].mxu1  ;;  %v4461_v49 = vmin.u32 %v1581_v13, %v6208_v14  ;;  %v1601_v37 = vsub.s32 4, %v6187_v3  ;;  %v1840_v26 = vshrl.u32 %v1839_v48, 5  ;;  %v863_v45 = vcvt.s32.f32 %v6192_v58 }
 0x18f   : > { %v6220_v16 = vpop.f32.mrb[11].mxu1  ;;  %v4864_v39 = vpop.eup %4863  ;;  %v1843_v57 = vshrl.u32 %v5005_v44, %v1842_v53  ;;  %v1846_v32 = vor.u32 %v1845_v18, %v1844_v52  ;;  %v1849_v17 = vor.u32 %v1848_v36, %v1847_v21  ;;  %v1852_v1 = vor.u32 %v1851_v62, %v1850_v0 }
 0x190   : > { %v4866_v5 = vpop.eup %4865  ;;  %v1719_v55 = vxor.u32 2147483648, %v4864_v39  ;;  %v1583_v28 = vclz %v4461_v49  ;;  %v1853_v34 = vshll.u32 %v7149_v27, %v1841_v20  ;;  %v1854_v15 = vshrl.u32 %v5009_v41, %v1842_v53 }
 0x191   : > { %v1716_v35 = vxor.u32 2147483648, %v4866_v5  ;;  %v1856_v29 = vshll.u32 %v5009_v41, %v1841_v20  ;;  %v1857_v21 = vshrl.u32 %v5010_v8, %v1842_v53  ;;  %vm1859_vm6 = vcmp.lt.s32.totalorder %v1840_v26, 1 }
 0x192   : > { %v1720_v43 = vsel %vm1718_vm1, %v1719_v55, %v4866_v5  ;;  %v3376_v12 = vsel %vm3374_vm13, %v1719_v55, %v4866_v5  ;;  %v4462_v50 = vadd.s32 4294967294, %v1583_v28  ;;  %v1855_v6 = vor.u32 %v1854_v15, %v1853_v34 }
 0x193   : > { %v1717_v40 = vsel %vm1715_vm14, %v4864_v39, %v1716_v35  ;;  %v3373_v54 = vsel %vm3371_vm8, %v4864_v39, %v1716_v35  ;;  %v7161_v20 = vand.u32 2147483647, %v5895_v33  ;;  %v1858_v49 = vor.u32 %v1857_v21, %v1856_v29 }
 0x194   : > { %v1721_v22 = vsel %vm1714_vm15, %v1717_v40, %v1720_v43  ;;  %v3377_v48 = vsel %vm3370_vm0, %v3373_v54, %v3376_v12  ;;  %vm4463_vm3 = vcmp.lt.s32.totalorder %v4462_v50, 0  ;;  %vm1861_vm9 = vcmp.lt.s32.totalorder %v1840_v26, 3 }
 0x195   : > { %v1722_v13 = vsel %vm1711_vm12, nan, %v1721_v22  ;;  %v3378_v52 = vsel %vm1711_vm12, nan, %v3377_v48  ;;  %v1586_v18 = vsel %vm4463_vm3, 0, %v4462_v50  ;;  %vm6260_vm7 = vcmp.le.f32.partialorder %v7161_v20, 0.7853982 }
 0x196   : > { %v4216_v46 = vsel %vm4208_vm10, %v1722_v13, %v3378_v52  ;;  %v1587_v2 = vsub.s32 32, %v1586_v18  ;;  %v1588_v62 = vshll.u32 %v6208_v14, %v1586_v18  ;;  %v1591_v39 = vsub.s32 4294967266, %v1586_v18 }
 0x197   : > { %v4232_v36 = vadd.f32 %v4216_v46, %v6178_v61  ;;  %vm1862_vm5 = vcmp.lt.s32.totalorder %v1840_v26, 4  ;;  %v1727_v53 = vshrl.u32 %v1726_v31, 23  ;;  %vm1860_vm11 = vcmp.lt.s32.totalorder %v1840_v26, 2 }
 0x198   : > { %v1589_v5 = vshrl.u32 %v1571_v60, %v1587_v2  ;;  %v1592_v55 = vadd.s32 127, %v1591_v39  ;;  %v1864_v61 = vsel %vm1862_vm5, %v1852_v1, 2102212464  ;;  %v1863_v35 = vsel %vm1859_vm6, %v1843_v57, %v1846_v32 }
 0x199   : > { %4248 = vst [vmem:[%s6133_s27 + $0x38] sm:$0xff] %v4232_v36  ;;  %v1865_v28 = vsel %vm1861_vm9, %v1849_v17, %v1864_v61  ;;  %v1867_v43 = vsel %vm1859_vm6, %v1846_v32, %v1849_v17  ;;  %v1868_v12 = vsel %vm1862_vm5, %v1855_v6, 920167782  ;;  %v1871_v31 = vsel %vm1859_vm6, %v1849_v17, %v1852_v1 }
 0x19a   : > { %v1590_v14 = vor.u32 %v1589_v5, %v1588_v62  ;;  %v1593_v40 = vshll.u32 %v1592_v55, 23  ;;  %v1869_v54 = vsel %vm1861_vm9, %v1852_v1, %v1868_v12  ;;  %v1602_v60 = vsel %vm1517_vm2, %v1601_v37, %v6187_v3 }
 0x19b   : > { %v1870_v50 = vsel %vm1860_vm11, %v1867_v43, %v1869_v54  ;;  %v1872_v57 = vsel %vm1862_vm5, %v1858_v49, 1326507024  ;;  %v4468_v34 = vadd.s32 4294967169, %v1727_v53  ;;  %v1866_v32 = vsel %vm1860_vm11, %v1863_v35, %v1865_v28 }
 0x19c   : > { %v1594_v22 = vor.u32 4788187, %v1593_v40  ;;  %v1597_v48 = vcvt.s32.f32 %v1590_v14  ;;  %v1873_v15 = vsel %vm1861_vm9, %v1855_v6, %v1872_v57  ;;  %v6292_v21 = vadd.f32 %v6048_v63, %v6211_v10  ;;  %v6306_v63 = vld [vmem:[%s7125_s4] ss:$0 sm:$0xff] }
 0x19d   : > { %v1874_v29 = vsel %vm1860_vm11, %v1871_v31, %v1873_v15  ;;  %v6282_v13 = vmul.u32.u64.low %v6227_v30, %v1870_v50  ;;  %v6283_v17 = vmul.u32.u64.high %v6227_v30, %v1870_v50, %v6282_v13  ;;  %v1733_v1 = vadd.s32 1, %v4468_v34 }
 0x19e   : > { %v1595_v3 = vand.u32 2147483647, %v1594_v22  ;;  %v6287_v37 = vmul.u32.u64.low %v6227_v30, %v1874_v29  ;;  %v6288_v52 = vmul.u32.u64.high %v6227_v30, %v1874_v29, %v6287_v37  ;;  %v1604_v46 = vsel %vm6260_vm7, 0, %v1602_v60 }
 0x19f   : > { %vm1734_vm4 = vcmp.gt.s32.totalorder %v1733_v1, 0  ;;  %v1882_v18 = vmul.u32 %v6227_v30, %v1866_v32  ;;  %v6299_v36 = vadd.f32 %v6213_v47, %v6220_v16  ;;  %v1885_v20 = vadd.s32 1, %v6283_v17 }
 0x1a0   : > { %v1598_v26 = vmul.f32 %v1597_v48, %v1595_v3  ;;  %v1735_v6 = vsel %vm1734_vm4, %v1733_v1, 0  ;;  %v1731_v2 = vor.u32 8388608, %v6232_v4  ;;  %v6311_v10 = vmul.f32 %v6306_v63, %v863_v45 }
 0x1a1   : > { %v1737_v62 = vand.u32 31, %v1735_v6  ;;  %v1608_v39 = vadd.s32 3, %v1604_v46  ;;  %v6313_v49 = vand.u32 3, %v1604_v46  ;;  %vm1884_vm12 = vc.u32 %v6288_v52, %v6282_v13 }
 0x1a2   : > { %v1599_v30 = vxor.u32 2147483648, %v1598_v26  ;;  %v1886_v47 = vsel %vm1884_vm12, %v1885_v20, %v6283_v17  ;;  %v1736_v35 = vshrl.u32 %v1735_v6, 5  ;;  %vm1607_vm14 = vweird.f32 %v5895_v33  ;;  %v4661_v6 = vpop.f32.mrb[12].mxu0 }
 0x1a3   : > { %v1738_v16 = vsub.s32 32, %v1737_v62  ;;  %v1740_v4 = vshll.u32 %v5005_v44, %v1737_v62  ;;  %v1743_v53 = vshll.u32 %v7160_v24, %v1737_v62  ;;  %v1887_v5 = vadd.s32 %v1886_v47, %v1882_v18  ;;  %v4633_v47 = vpop.f32.mrb[12].mxu1 }
 0x1a4   : > { %v1600_v58 = vsel %vm1517_vm2, %v1599_v30, %v1598_v26  ;;  %v1746_v45 = vshll.u32 %v7150_v38, %v1737_v62  ;;  %v1749_v55 = vshll.u32 %v7149_v27, %v1737_v62  ;;  %v1752_v60 = vshll.u32 %v5009_v41, %v1737_v62 }
 0x1a5   : > { %v1603_v61 = vsel %vm6260_vm7, %v5895_v33, %v1600_v58  ;;  %v1741_v28 = vshrl.u32 %v7160_v24, %v1738_v16  ;;  %v1744_v43 = vshrl.u32 %v7150_v38, %v1738_v16  ;;  %v1888_v12 = vadd.s32 536870912, %v1887_v5 }
 0x1a6   : > { %4867 = vcosq.f32 %v1603_v61  ;;  %v1747_v14 = vshrl.u32 %v7149_v27, %v1738_v16  ;;  %v1750_v40 = vshrl.u32 %v5009_v41, %v1738_v16  ;;  %v1753_v34 = vshrl.u32 %v5010_v8, %v1738_v16 }
 0x1a7   : > { %4869 = vsinq.f32 %v1603_v61  ;;  %v1742_v54 = vor.u32 %v1741_v28, %v1740_v4  ;;  %v1745_v31 = vor.u32 %v1744_v43, %v1743_v53  ;;  %v6332_v50 = vshrl.u32 %v1888_v12, 30 }
 0x1a8   : > { %v1748_v0 = vor.u32 %v1747_v14, %v1746_v45  ;;  %v1751_v57 = vor.u32 %v1750_v40, %v1749_v55  ;;  %v1739_v22 = vshrl.u32 %v5005_v44, %v1738_v16  ;;  %vm1755_vm0 = vcmp.lt.s32.totalorder %v1736_v35, 1 }
 0x1a9   : > { %vm1757_vm8 = vcmp.lt.s32.totalorder %v1736_v35, 3  ;;  %vm1758_vm13 = vcmp.lt.s32.totalorder %v1736_v35, 4  ;;  %v1609_v48 = vand.u32 3, %v1608_v39  ;;  %v1890_v32 = vshll.u32 %v6332_v50, 30 }
 0x1aa   : > { %v1754_v15 = vor.u32 %v1753_v34, %v1752_v60  ;;  %vm1756_vm15 = vcmp.lt.s32.totalorder %v1736_v35, 2  ;;  %v1760_v29 = vsel %vm1758_vm13, %v1748_v0, 2102212464  ;;  %v1763_v17 = vsel %vm1755_vm0, %v1742_v54, %v1745_v31 }
 0x1ab   : > { %v1764_v1 = vsel %vm1758_vm13, %v1751_v57, 920167782  ;;  %v1771_v3 = vshll.u32 %v1731_v2, 8  ;;  %v6341_v37 = vsub.s32 %v1887_v5, %v1890_v32  ;;  %v1767_v26 = vsel %vm1755_vm0, %v1745_v31, %v1748_v0 }
 0x1ac   : > { %v1765_v46 = vsel %vm1757_vm8, %v1748_v0, %v1764_v1  ;;  %v2038_v18 = vand.u32 2139095040, %v6311_v10  ;;  %v1759_v20 = vsel %vm1755_vm0, %v1739_v22, %v1742_v54  ;;  %v1761_v62 = vsel %vm1757_vm8, %v1745_v31, %v1760_v29 }
 0x1ad   : > { %v1766_v30 = vsel %vm1756_vm15, %v1763_v17, %v1765_v46  ;;  %v1768_v39 = vsel %vm1758_vm13, %v1754_v15, 1326507024  ;;  %vm3267_vm1 = vcmp.lt.s32.totalorder %v6313_v49, 2  ;;  %vm3268_vm2 = vcmp.eq.s32.totalorder %v6313_v49, 0 }
 0x1ae   : > { %v1893_v2 = vsub.s32 0, %v6341_v37  ;;  %v1769_v16 = vsel %vm1757_vm8, %v1751_v57, %v1768_v39  ;;  %vm3271_vm3 = vcmp.eq.s32.totalorder %v6313_v49, 2  ;;  %vm1611_vm6 = vcmp.eq.s32.totalorder %v1609_v48, 0 }
 0x1af   : > { %v1770_v4 = vsel %vm1756_vm15, %v1767_v26, %v1769_v16  ;;  %v6356_v53 = vmul.u32.u64.low %v1771_v3, %v1766_v30  ;;  %v6357_v58 = vmul.u32.u64.high %v1771_v3, %v1766_v30, %v6356_v53  ;;  %vm1614_vm7 = vcmp.eq.s32.totalorder %v1609_v48, 2  ;;  %v798_v16 = vpop.f32.mrb[13].mxu0 }
 0x1b0   : > { %v4868_v5 = vpop.eup %4867  ;;  %vm1829_vm9 = vcmp.lt.s32.totalorder %v6120_v9, 0  ;;  %v4473_v45 = vmin.u32 %v1893_v2, %v6341_v37  ;;  %v1762_v55 = vsel %vm1756_vm15, %v1759_v20, %v1761_v62  ;;  %v2039_v14 = vshrl.u32 %v2038_v18, 23 }
 0x1b1   : > { %v4870_v61 = vpop.eup %4869  ;;  %v1615_v28 = vxor.u32 2147483648, %v4868_v5  ;;  %v6363_v43 = vmul.u32.u64.low %v1771_v3, %v1770_v4  ;;  %v6364_v12 = vmul.u32.u64.high %v1771_v3, %v1770_v4, %v6363_v43  ;;  %vm1610_vm5 = vcmp.lt.s32.totalorder %v1609_v48, 2 }
 0x1b2   : > { %v1612_v40 = vxor.u32 2147483648, %v4870_v61  ;;  %v1883_v54 = vadd.s32 %v6282_v13, %v6288_v52  ;;  %v1895_v31 = vclz %v4473_v45  ;;  %v1778_v57 = vmul.u32 %v1771_v3, %v1762_v55 }
 0x1b3   : > { %v1616_v60 = vsel %vm1614_vm7, %v1615_v28, %v4870_v61  ;;  %v3273_v0 = vsel %vm3271_vm3, %v1615_v28, %v4870_v61  ;;  %v1781_v35 = vadd.s32 1, %v6357_v58  ;;  %v1913_v15 = vsub.s32 4, %v6332_v50 }
 0x1b4   : > { %v1613_v34 = vsel %vm1611_vm6, %v4868_v5, %v1612_v40  ;;  %v3270_v22 = vsel %vm3268_vm2, %v4868_v5, %v1612_v40  ;;  %v4474_v32 = vadd.s32 4294967294, %v1895_v31  ;;  %vm1780_vm11 = vc.u32 %v6364_v12, %v6356_v53 }
 0x1b5   : > { %v1617_v29 = vsel %vm1610_vm5, %v1613_v34, %v1616_v60  ;;  %v3274_v13 = vsel %vm3267_vm1, %v3270_v22, %v3273_v0  ;;  %v4480_v52 = vadd.s32 4294967169, %v2039_v14  ;;  %v1782_v1 = vsel %vm1780_vm11, %v1781_v35, %v6357_v58 }
 0x1b6   : > { %v1618_v17 = vsel %vm1607_vm14, nan, %v1617_v29  ;;  %v3275_v48 = vsel %vm1607_vm14, nan, %v3274_v13  ;;  %vm4475_vm4 = vcmp.lt.s32.totalorder %v4474_v32, 0  ;;  %v1783_v49 = vadd.s32 %v1782_v1, %v1778_v57 }
 0x1b7   : > { %v4215_v3 = vsel %vm4208_vm10, %v1618_v17, %v3275_v48  ;;  %v1898_v46 = vsel %vm4475_vm4, 0, %v4474_v32  ;;  %v2035_v26 = vand.u32 2147483647, %v6311_v10  ;;  %v1914_v33 = vsel %vm1829_vm9, %v1913_v15, %v6332_v50 }
 0x1b8   : > { %v4231_v18 = vadd.f32 %v4215_v3, %v6185_v25  ;;  %v1899_v20 = vsub.s32 32, %v1898_v46  ;;  %v1900_v62 = vshll.u32 %v6341_v37, %v1898_v46  ;;  %v1903_v30 = vsub.s32 4294967266, %v1898_v46 }
 0x1b9   : > { %v1784_v39 = vadd.s32 536870912, %v1783_v49  ;;  %v2045_v2 = vadd.s32 1, %v4480_v52  ;;  %vm6395_vm12 = vcmp.le.f32.partialorder %v1827_v59, 0.7853982  ;;  %v6399_v25 = vadd.f32 %v4661_v6, %v4633_v47 }
 0x1ba   : > { %4247 = vst [vmem:[%s6133_s27 + $0x30] sm:$0xff] %v4231_v18  ;;  %v1901_v4 = vshrl.u32 %v1883_v54, %v1899_v20  ;;  %v1904_v58 = vadd.s32 127, %v1903_v30  ;;  %v2042_v37 = vand.u32 8388607, %v2035_v26  ;;  %v829_v50 = vadd.s32 80, %v5199_v42 }
 0x1bb   : > { %v6401_v5 = vshrl.u32 %v1784_v39, 30  ;;  %vm2046_vm0 = vcmp.gt.s32.totalorder %v2045_v2, 0  ;;  %v1916_v59 = vsel %vm6395_vm12, 0, %v1914_v33  ;;  %v1779_v48 = vadd.s32 %v6356_v53, %v6364_v12 }
 0x1bc   : > { %v1902_v45 = vor.u32 %v1901_v4, %v1900_v62  ;;  %v1905_v55 = vshll.u32 %v1904_v58, 23  ;;  %v2047_v61 = vsel %vm2046_vm0, %v2045_v2, 0  ;;  %v1920_v47 = vadd.s32 3, %v1916_v59 }
 0x1bd   : > { %v1786_v28 = vshll.u32 %v6401_v5, 30  ;;  %v2049_v43 = vand.u32 31, %v2047_v61  ;;  %v2043_v54 = vor.u32 8388608, %v2042_v37  ;;  %v6411_v0 = vand.u32 3, %v1916_v59 }
 0x1be   : > { %v1906_v14 = vor.u32 4788187, %v1905_v55  ;;  %v1909_v6 = vcvt.s32.f32 %v1902_v45  ;;  %v846_v57 = vadd.s32 %v5209_v51, %v829_v50  ;;  %v6421_v17 = vand.u32 3, %v1920_v47 }
 0x1bf   : > { %v6409_v40 = vsub.s32 %v1783_v49, %v1786_v28  ;;  %v2050_v31 = vsub.s32 32, %v2049_v43  ;;  %v2052_v34 = vshll.u32 %v5005_v44, %v2049_v43  ;;  %v2055_v22 = vshll.u32 %v7160_v24, %v2049_v43 }
 0x1c0   : > { %v1907_v60 = vand.u32 2147483647, %v1906_v14  ;;  %v2058_v32 = vshll.u32 %v7150_v38, %v2049_v43  ;;  %v6426_v3 = vshll.u32 %v2043_v54, 8  ;;  %v1809_v49 = vsub.s32 4, %v6401_v5 }
 0x1c1   : > { %v1789_v35 = vsub.s32 0, %v6409_v40  ;;  %v2053_v29 = vshrl.u32 %v7160_v24, %v2050_v31  ;;  %v2056_v13 = vshrl.u32 %v7150_v38, %v2050_v31  ;;  %v2059_v52 = vshrl.u32 %v7149_v27, %v2050_v31 }
 0x1c2   : > { %v1910_v15 = vmul.f32 %v1909_v6, %v1907_v60  ;;  %v2048_v18 = vshrl.u32 %v2047_v61, 5  ;;  %v862_v20 = vcvt.s32.f32 %v846_v57  ;;  %vm1725_vm8 = vcmp.lt.s32.totalorder %v6199_v23, 0 }
 0x1c3   : > { %v4469_v1 = vmin.u32 %v1789_v35, %v6409_v40  ;;  %v2051_v30 = vshrl.u32 %v5005_v44, %v2050_v31  ;;  %v2054_v33 = vor.u32 %v2053_v29, %v2052_v34  ;;  %v2057_v39 = vor.u32 %v2056_v13, %v2055_v22 }
 0x1c4   : > { %v1911_v46 = vxor.u32 2147483648, %v1910_v15  ;;  %v2060_v53 = vor.u32 %v2059_v52, %v2058_v32  ;;  %v2061_v12 = vshll.u32 %v7149_v27, %v2049_v43  ;;  %v2062_v4 = vshrl.u32 %v5009_v41, %v2050_v31 }
 0x1c5   : > { %v1791_v62 = vclz %v4469_v1  ;;  %v2064_v50 = vshll.u32 %v5009_v41, %v2049_v43  ;;  %v2065_v45 = vshrl.u32 %v5010_v8, %v2050_v31  ;;  %vm6442_vm13 = vcmp.le.f32.partialorder %v1723_v19, 0.7853982  ;;  %v600_v19 = vpop.f32.mrb[13].mxu1 }
 0x1c6   : > { %v1912_v2 = vsel %vm1829_vm9, %v1911_v46, %v1910_v15  ;;  %v2063_v59 = vor.u32 %v2062_v4, %v2061_v12  ;;  %vm2067_vm15 = vcmp.lt.s32.totalorder %v2048_v18, 1  ;;  %vm2068_vm14 = vcmp.lt.s32.totalorder %v2048_v18, 2 }
 0x1c7   : > { %v1915_v58 = vsel %vm6395_vm12, %v6120_v9, %v1912_v2  ;;  %v4470_v37 = vadd.s32 4294967294, %v1791_v62  ;;  %v2066_v61 = vor.u32 %v2065_v45, %v2064_v50  ;;  %vm2069_vm2 = vcmp.lt.s32.totalorder %v2048_v18, 3 }
 0x1c8   : > { %4871 = vcosq.f32 %v1915_v58  ;;  %vm3580_vm3 = vcmp.eq.s32.totalorder %v6411_v0, 2  ;;  %vm2070_vm6 = vcmp.lt.s32.totalorder %v2048_v18, 4  ;;  %v2071_v43 = vsel %vm2067_vm15, %v2051_v30, %v2054_v33 }
 0x1c9   : > { %4873 = vsinq.f32 %v1915_v58  ;;  %vm4471_vm1 = vcmp.lt.s32.totalorder %v4470_v37, 0  ;;  %v2075_v14 = vsel %vm2067_vm15, %v2054_v33, %v2057_v39  ;;  %vm3577_vm7 = vcmp.eq.s32.totalorder %v6411_v0, 0 }
 0x1ca   : > { %v1794_v28 = vsel %vm4471_vm1, 0, %v4470_v37  ;;  %v2072_v31 = vsel %vm2070_vm6, %v2060_v53, 2102212464  ;;  %vm1922_vm9 = vcmp.lt.s32.totalorder %v6421_v17, 2  ;;  %vm3576_vm5 = vcmp.lt.s32.totalorder %v6411_v0, 2 }
 0x1cb   : > { %v1795_v6 = vsub.s32 32, %v1794_v28  ;;  %v1796_v47 = vshll.u32 %v6409_v40, %v1794_v28  ;;  %v1799_v54 = vsub.s32 4294967266, %v1794_v28  ;;  %v2073_v60 = vsel %vm2069_vm2, %v2057_v39, %v2072_v31 }
 0x1cc   : > { %v2076_v57 = vsel %vm2070_vm6, %v2063_v59, 920167782  ;;  %v2079_v35 = vsel %vm2067_vm15, %v2057_v39, %v2060_v53  ;;  %v2080_v34 = vsel %vm2070_vm6, %v2066_v61, 1326507024  ;;  %vm1919_vm11 = vweird.f32 %v6120_v9 }
 0x1cd   : > { %v1797_v22 = vshrl.u32 %v1779_v48, %v1795_v6  ;;  %v1800_v32 = vadd.s32 127, %v1799_v54  ;;  %v2077_v15 = vsel %vm2069_vm2, %v2060_v53, %v2076_v57  ;;  %v6458_v40 = vmul.f32 %v6306_v63, %v862_v20 }
 0x1ce   : > { %v1810_v29 = vsel %vm1725_vm8, %v1809_v49, %v6401_v5  ;;  %v2078_v13 = vsel %vm2068_vm14, %v2075_v14, %v2077_v15  ;;  %v2081_v52 = vsel %vm2069_vm2, %v2063_v59, %v2080_v34  ;;  %v832_v1 = vadd.s32 104, %v5199_v42 }
 0x1cf   : > { %v1798_v46 = vor.u32 %v1797_v22, %v1796_v47  ;;  %v1801_v62 = vshll.u32 %v1800_v32, 23  ;;  %v2074_v48 = vsel %vm2068_vm14, %v2071_v43, %v2073_v60  ;;  %v2082_v30 = vsel %vm2068_vm14, %v2079_v35, %v2081_v52 }
 0x1d0   : > { %v6469_v33 = vmul.u32.u64.low %v6426_v3, %v2082_v30  ;;  %v6470_v20 = vmul.u32.u64.high %v6426_v3, %v2082_v30, %v6469_v33  ;;  %v6473_v39 = vmul.u32.u64.low %v6426_v3, %v2078_v13  ;;  %v6474_v2 = vmul.u32.u64.high %v6426_v3, %v2078_v13, %v6473_v39 }
 0x1d1   : > { %v1802_v5 = vor.u32 4788187, %v1801_v62  ;;  %v1805_v49 = vcvt.s32.f32 %v1798_v46  ;;  %v1812_v53 = vsel %vm6442_vm13, 0, %v1810_v29  ;;  %v1934_v12 = vand.u32 2139095040, %v6458_v40 }
 0x1d2   : > { %v4872_v4 = vpop.eup %4871  ;;  %vm1923_vm4 = vcmp.eq.s32.totalorder %v6421_v17, 0  ;;  %vm1926_vm12 = vcmp.eq.s32.totalorder %v6421_v17, 2  ;;  %v849_v18 = vadd.s32 %v5209_v51, %v832_v1  ;;  %v6483_v58 = vadd.f32 %v798_v16, %v600_v19 }
 0x1d3   : > { %v4874_v37 = vpop.eup %4873  ;;  %v1927_v50 = vxor.u32 2147483648, %v4872_v4  ;;  %v1803_v45 = vand.u32 2147483647, %v1802_v5  ;;  %v2090_v59 = vmul.u32 %v6426_v3, %v2074_v48  ;;  %v1935_v61 = vshrl.u32 %v1934_v12, 23 }
 0x1d4   : > { %v1924_v28 = vxor.u32 2147483648, %v4874_v37  ;;  %v1816_v43 = vadd.s32 3, %v1812_v53  ;;  %vm2092_vm0 = vc.u32 %v6470_v20, %v6473_v39  ;;  %v2093_v14 = vadd.s32 1, %v6474_v2 }
 0x1d5   : > { %v1928_v6 = vsel %vm1926_vm12, %v1927_v50, %v4874_v37  ;;  %v3582_v47 = vsel %vm3580_vm3, %v1927_v50, %v4874_v37  ;;  %v1806_v54 = vmul.f32 %v1805_v49, %v1803_v45  ;;  %v4476_v16 = vadd.s32 4294967169, %v1935_v61  ;;  %v6527_v49 = vpop.f32.mrb[14].mxu1 }
 0x1d6   : > { %v1925_v19 = vsel %vm1923_vm4, %v4872_v4, %v1924_v28  ;;  %v3579_v3 = vsel %vm3577_vm7, %v4872_v4, %v1924_v28  ;;  %v2094_v31 = vsel %vm2092_vm0, %v2093_v14, %v6474_v2  ;;  %v1931_v60 = vand.u32 2147483647, %v6458_v40 }
 0x1d7   : > { %v1929_v57 = vsel %vm1922_vm9, %v1925_v19, %v1928_v6  ;;  %v3583_v35 = vsel %vm3576_vm5, %v3579_v3, %v3582_v47  ;;  %v1807_v34 = vxor.u32 2147483648, %v1806_v54  ;;  %v2095_v22 = vadd.s32 %v2094_v31, %v2090_v59 }
 0x1d8   : > { %v1930_v32 = vsel %vm1919_vm11, nan, %v1929_v57  ;;  %v3584_v15 = vsel %vm1919_vm11, nan, %v3583_v35  ;;  %v1941_v29 = vadd.s32 1, %v4476_v16  ;;  %v865_v13 = vcvt.s32.f32 %v849_v18 }
 0x1d9   : > { %v4218_v52 = vsel %vm4208_vm10, %v1930_v32, %v3584_v15  ;;  %v1808_v17 = vsel %vm1725_vm8, %v1807_v34, %v1806_v54  ;;  %v6509_v1 = vand.u32 3, %v1812_v53  ;;  %v2096_v0 = vadd.s32 536870912, %v2095_v22 }
 0x1da   : > { %v4234_v46 = vadd.f32 %v4218_v52, %v6196_v56  ;;  %v1811_v62 = vsel %vm6442_vm13, %v6199_v23, %v1808_v17  ;;  %v6515_v9 = vand.u32 3, %v1816_v43  ;;  %vm1942_vm15 = vcmp.gt.s32.totalorder %v1941_v29, 0  ;;  %v6521_v56 = vpop.f32.mrb[14].mxu0 }
 0x1db   : > { %4875 = vcosq.f32 %v1811_v62  ;;  %v2097_v48 = vshrl.u32 %v2096_v0, 30  ;;  %v1938_v30 = vand.u32 8388607, %v1931_v60  ;;  %v1943_v33 = vsel %vm1942_vm15, %v1941_v29, 0 }
 0x1dc   : > { %4250 = vst [vmem:[%s6133_s27 + $0x48] sm:$0xff] %v4234_v46  ;;  %4877 = vsinq.f32 %v1811_v62  ;;  %v1945_v2 = vand.u32 31, %v1943_v33  ;;  %vm2037_vm8 = vcmp.lt.s32.totalorder %v6311_v10, 0  ;;  %vm1819_vm14 = vcmp.eq.s32.totalorder %v6515_v9, 0 }
 0x1dd   : > { %v2098_v5 = vshll.u32 %v2097_v48, 30  ;;  %vm1822_vm13 = vcmp.eq.s32.totalorder %v6515_v9, 2  ;;  %vm3474_vm1 = vcmp.eq.s32.totalorder %v6509_v1, 0  ;;  %vm3477_vm2 = vcmp.eq.s32.totalorder %v6509_v1, 2 }
 0x1de   : > { %v1946_v55 = vsub.s32 32, %v1945_v2  ;;  %vm1818_vm3 = vcmp.lt.s32.totalorder %v6515_v9, 2  ;;  %vm3473_vm6 = vcmp.lt.s32.totalorder %v6509_v1, 2  ;;  %v2121_v12 = vsub.s32 4, %v2097_v48 }
 0x1df   : > { %v6531_v53 = vsub.s32 %v2095_v22, %v2098_v5  ;;  %v1939_v4 = vor.u32 8388608, %v1938_v30  ;;  %v6534_v18 = vmul.f32 %v6306_v63, %v865_v13  ;;  %vm1815_vm7 = vweird.f32 %v6199_v23 }
 0x1e0   : > { %v1948_v37 = vshll.u32 %v5005_v44, %v1945_v2  ;;  %v1949_v50 = vshrl.u32 %v7160_v24, %v1946_v55  ;;  %v1951_v45 = vshll.u32 %v7160_v24, %v1945_v2  ;;  %v1954_v59 = vshll.u32 %v7150_v38, %v1945_v2 }
 0x1e1   : > { %v2101_v61 = vsub.s32 0, %v6531_v53  ;;  %v1952_v28 = vshrl.u32 %v7150_v38, %v1946_v55  ;;  %v1955_v43 = vshrl.u32 %v7149_v27, %v1946_v55  ;;  %v1957_v14 = vshll.u32 %v7149_v27, %v1945_v2 }
 0x1e2   : > { %v1944_v6 = vshrl.u32 %v1943_v33, 5  ;;  %v1958_v47 = vshrl.u32 %v5009_v41, %v1946_v55  ;;  %v1960_v54 = vshll.u32 %v5009_v41, %v1945_v2  ;;  %v1961_v16 = vshrl.u32 %v5010_v8, %v1946_v55 }
 0x1e3   : > { %v2091_v19 = vadd.s32 %v6473_v39, %v6470_v20  ;;  %v4481_v3 = vmin.u32 %v2101_v61, %v6531_v53  ;;  %v6551_v31 = vshll.u32 %v1939_v4, 8  ;;  %v6554_v57 = vadd.s32 96, %v5199_v42 }
 0x1e4   : > { %v2122_v35 = vsel %vm2037_vm8, %v2121_v12, %v2097_v48  ;;  %v1947_v34 = vshrl.u32 %v5005_v44, %v1946_v55  ;;  %v1950_v22 = vor.u32 %v1949_v50, %v1948_v37  ;;  %v2246_v32 = vand.u32 2139095040, %v6534_v18 }
 0x1e5   : > { %v4876_v15 = vpop.eup %4875  ;;  %v2103_v29 = vclz %v4481_v3  ;;  %v1953_v13 = vor.u32 %v1952_v28, %v1951_v45  ;;  %v1956_v52 = vor.u32 %v1955_v43, %v1954_v59  ;;  %v1959_v20 = vor.u32 %v1958_v47, %v1957_v14 }
 0x1e6   : > { %v4878_v39 = vpop.eup %4877  ;;  %v1823_v17 = vxor.u32 2147483648, %v4876_v15  ;;  %v1962_v0 = vor.u32 %v1961_v16, %v1960_v54  ;;  %vm1963_vm9 = vcmp.lt.s32.totalorder %v1944_v6, 1  ;;  %vm1964_vm5 = vcmp.lt.s32.totalorder %v1944_v6, 2 }
 0x1e7   : > { %v1820_v46 = vxor.u32 2147483648, %v4878_v39  ;;  %v4482_v62 = vadd.s32 4294967294, %v2103_v29  ;;  %vm1965_vm11 = vcmp.lt.s32.totalorder %v1944_v6, 3  ;;  %vm1966_vm4 = vcmp.lt.s32.totalorder %v1944_v6, 4 }
 0x1e8   : > { %v1824_v48 = vsel %vm1822_vm13, %v1823_v17, %v4878_v39  ;;  %v3479_v30 = vsel %vm3477_vm2, %v1823_v17, %v4878_v39  ;;  %v1967_v33 = vsel %vm1963_vm9, %v1947_v34, %v1950_v22  ;;  %v1968_v2 = vsel %vm1966_vm4, %v1956_v52, 2102212464 }
 0x1e9   : > { %v1821_v5 = vsel %vm1819_vm14, %v4876_v15, %v1820_v46  ;;  %v3476_v55 = vsel %vm3474_vm1, %v4876_v15, %v1820_v46  ;;  %vm4483_vm12 = vcmp.lt.s32.totalorder %v4482_v62, 0  ;;  %v1971_v12 = vsel %vm1963_vm9, %v1950_v22, %v1953_v13 }
 0x1ea   : > { %v1825_v4 = vsel %vm1818_vm3, %v1821_v5, %v1824_v48  ;;  %v3480_v37 = vsel %vm3473_vm6, %v3476_v55, %v3479_v30  ;;  %v2106_v50 = vsel %vm4483_vm12, 0, %v4482_v62  ;;  %v1969_v45 = vsel %vm1965_vm11, %v1953_v13, %v1968_v2 }
 0x1eb   : > { %v1826_v59 = vsel %vm1815_vm7, nan, %v1825_v4  ;;  %v3481_v61 = vsel %vm1815_vm7, nan, %v3480_v37  ;;  %v2107_v28 = vsub.s32 32, %v2106_v50  ;;  %v2108_v43 = vshll.u32 %v6531_v53, %v2106_v50 }
 0x1ec   : > { %v4217_v9 = vsel %vm4208_vm10, %v1826_v59, %v3481_v61  ;;  %v2111_v14 = vsub.s32 4294967266, %v2106_v50  ;;  %v1972_v1 = vsel %vm1966_vm4, %v1959_v20, 920167782  ;;  %v1975_v47 = vsel %vm1963_vm9, %v1953_v13, %v1956_v52 }
 0x1ed   : > { %v4233_v54 = vadd.f32 %v4217_v9, %v6205_v11  ;;  %v2109_v16 = vshrl.u32 %v2091_v19, %v2107_v28  ;;  %v1973_v3 = vsel %vm1965_vm11, %v1956_v52, %v1972_v1  ;;  %v1976_v23 = vsel %vm1966_vm4, %v1962_v0, 1326507024 }
 0x1ee   : > { %v2112_v34 = vadd.s32 127, %v2111_v14  ;;  %v1970_v22 = vsel %vm1964_vm5, %v1967_v33, %v1969_v45  ;;  %v1974_v53 = vsel %vm1964_vm5, %v1971_v12, %v1973_v3  ;;  %v1977_v15 = vsel %vm1965_vm11, %v1959_v20, %v1976_v23  ;;  %v6638_v23 = vpop.f32.mrb[15].mxu0 }
 0x1ef   : > { %4249 = vst [vmem:[%s6133_s27 + $0x40] sm:$0xff] %v4233_v54  ;;  %v2110_v29 = vor.u32 %v2109_v16, %v2108_v43  ;;  %v1978_v39 = vsel %vm1964_vm5, %v1975_v47, %v1977_v15  ;;  %v6594_v13 = vmul.u32.u64.low %v6551_v31, %v1974_v53  ;;  %v6595_v17 = vmul.u32.u64.high %v6551_v31, %v1974_v53, %v6594_v13  ;;  %v6644_v15 = vpop.f32.mrb[15].mxu1 }
 0x1f0   : > { %v2113_v11 = vshll.u32 %v2112_v34, 23  ;;  %v6599_v19 = vmul.u32.u64.low %v6551_v31, %v1978_v39  ;;  %v6600_v52 = vmul.u32.u64.high %v6551_v31, %v1978_v39, %v6599_v19  ;;  %v2247_v0 = vshrl.u32 %v2246_v32, 23 }
 0x1f1   : > { %vm6604_vm0 = vcmp.le.f32.partialorder %v2035_v26, 0.7853982  ;;  %v6610_v6 = vadd.f32 %v6521_v56, %v6527_v49  ;;  %v2117_v62 = vcvt.s32.f32 %v2110_v29  ;;  %v1986_v48 = vmul.u32 %v6551_v31, %v1970_v22 }
 0x1f2   : > { %v2114_v20 = vor.u32 4788187, %v2113_v11  ;;  %v4488_v30 = vadd.s32 4294967169, %v2247_v0  ;;  %v2124_v33 = vsel %vm6604_vm0, 0, %v2122_v35  ;;  %v1989_v32 = vadd.s32 1, %v6595_v17 }
 0x1f3   : > { %v2243_v2 = vand.u32 2147483647, %v6534_v18  ;;  %v848_v26 = vadd.s32 %v5209_v51, %v6554_v57  ;;  %vm1988_vm15 = vc.u32 %v6600_v52, %v6594_v13  ;;  %v2128_v31 = vadd.s32 3, %v2124_v33 }
 0x1f4   : > { %v2115_v5 = vand.u32 2147483647, %v2114_v20  ;;  %v2253_v56 = vadd.s32 1, %v4488_v30  ;;  %v1990_v49 = vsel %vm1988_vm15, %v1989_v32, %v6595_v17  ;;  %v6624_v57 = vand.u32 3, %v2124_v33 }
 0x1f5   : > { %v1991_v12 = vadd.s32 %v1990_v49, %v1986_v48  ;;  %v2250_v35 = vand.u32 8388607, %v2243_v2  ;;  %v864_v37 = vcvt.s32.f32 %v848_v26  ;;  %v6628_v28 = vand.u32 3, %v2128_v31 }
 0x1f6   : > { %v2118_v55 = vmul.f32 %v2117_v62, %v2115_v5  ;;  %vm2254_vm14 = vcmp.gt.s32.totalorder %v2253_v56, 0  ;;  %vm3786_vm1 = vcmp.eq.s32.totalorder %v6624_v57, 2  ;;  %vm3783_vm3 = vcmp.eq.s32.totalorder %v6624_v57, 0 }
 0x1f7   : > { %v2255_v4 = vsel %vm2254_vm14, %v2253_v56, 0  ;;  %v1992_v45 = vadd.s32 536870912, %v1991_v12  ;;  %v2251_v1 = vor.u32 8388608, %v2250_v35  ;;  %v6634_v47 = vmul.f32 %v6306_v63, %v864_v37 }
 0x1f8   : > { %v2119_v50 = vxor.u32 2147483648, %v2118_v55  ;;  %v2257_v59 = vand.u32 31, %v2255_v4  ;;  %vm2134_vm13 = vcmp.eq.s32.totalorder %v6628_v28, 2  ;;  %v6650_v29 = vshrl.u32 %v2255_v4, 5 }
 0x1f9   : > { %v1993_v43 = vshrl.u32 %v1992_v45, 30  ;;  %vm2131_vm2 = vcmp.eq.s32.totalorder %v6628_v28, 0  ;;  %v2142_v0 = vand.u32 2139095040, %v6634_v47  ;;  %vm2130_vm6 = vcmp.lt.s32.totalorder %v6628_v28, 2 }
 0x1fa   : > { %v2120_v61 = vsel %vm2037_vm8, %v2119_v50, %v2118_v55  ;;  %v2258_v9 = vsub.s32 32, %v2257_v59  ;;  %v2263_v16 = vshll.u32 %v7160_v24, %v2257_v59  ;;  %v2266_v3 = vshll.u32 %v7150_v38, %v2257_v59 }
 0x1fb   : > { %v2123_v14 = vsel %vm6604_vm0, %v6311_v10, %v2120_v61  ;;  %v1994_v54 = vshll.u32 %v1993_v43, 30  ;;  %vm1933_vm8 = vcmp.lt.s32.totalorder %v6458_v40, 0  ;;  %v2269_v53 = vshll.u32 %v7149_v27, %v2257_v59 }
 0x1fc   : > { %4879 = vcosq.f32 %v2123_v14  ;;  %v2264_v34 = vshrl.u32 %v7150_v38, %v2258_v9  ;;  %v2267_v22 = vshrl.u32 %v7149_v27, %v2258_v9  ;;  %v2270_v39 = vshrl.u32 %v5009_v41, %v2258_v9 }
 0x1fd   : > { %4881 = vsinq.f32 %v2123_v14  ;;  %v6648_v63 = vsub.s32 %v1991_v12, %v1994_v54  ;;  %v2260_v17 = vshll.u32 %v5005_v44, %v2257_v59  ;;  %v2261_v11 = vshrl.u32 %v7160_v24, %v2258_v9 }
 0x1fe   : > { %v2272_v19 = vshll.u32 %v5009_v41, %v2257_v59  ;;  %vm3782_vm7 = vcmp.lt.s32.totalorder %v6624_v57, 2  ;;  %v2259_v20 = vshrl.u32 %v5005_v44, %v2258_v9  ;;  %v6663_v62 = vshll.u32 %v2251_v1, 8 }
 0x1ff   : > { %v1997_v46 = vsub.s32 0, %v6648_v63  ;;  %v2139_v48 = vand.u32 2147483647, %v6634_v47  ;;  %vm2127_vm9 = vweird.f32 %v6311_v10  ;;  %v2265_v30 = vor.u32 %v2264_v34, %v2263_v16 }
 0x200   : > { %v2268_v33 = vor.u32 %v2267_v22, %v2266_v3  ;;  %v2271_v32 = vor.u32 %v2270_v39, %v2269_v53  ;;  %v2273_v26 = vshrl.u32 %v5010_v8, %v2258_v9  ;;  %v1987_v5 = vadd.s32 %v6594_v13, %v6600_v52 }
 0x201   : > { %v4477_v56 = vmin.u32 %v1997_v46, %v6648_v63  ;;  %v2017_v49 = vsub.s32 4, %v1993_v43  ;;  %vm2275_vm5 = vcmp.lt.s32.totalorder %v6650_v29, 1  ;;  %v2262_v55 = vor.u32 %v2261_v11, %v2260_v17 }
 0x202   : > { %v2274_v31 = vor.u32 %v2273_v26, %v2272_v19  ;;  %vm2278_vm11 = vcmp.lt.s32.totalorder %v6650_v29, 4  ;;  %v2143_v12 = vshrl.u32 %v2142_v0, 23  ;;  %vm2276_vm4 = vcmp.lt.s32.totalorder %v6650_v29, 2 }
 0x203   : > { %v1999_v35 = vclz %v4477_v56  ;;  %vm2277_vm12 = vcmp.lt.s32.totalorder %v6650_v29, 3  ;;  %v2146_v4 = vand.u32 8388607, %v2139_v48  ;;  %v2279_v13 = vsel %vm2275_vm5, %v2259_v20, %v2262_v55 }
 0x204   : > { %v2280_v52 = vsel %vm2278_vm11, %v2268_v33, 2102212464  ;;  %v2284_v37 = vsel %vm2278_vm11, %v2271_v32, 920167782  ;;  %v2287_v50 = vsel %vm2275_vm5, %v2265_v30, %v2268_v33  ;;  %v2018_v61 = vsel %vm1933_vm8, %v2017_v49, %v1993_v43 }
 0x205   : > { %v4478_v59 = vadd.s32 4294967294, %v1999_v35  ;;  %v2281_v9 = vsel %vm2277_vm12, %v2265_v30, %v2280_v52  ;;  %v2288_v14 = vsel %vm2278_vm11, %v2274_v31, 1326507024  ;;  %vm6687_vm0 = vcmp.le.f32.partialorder %v1931_v60, 0.7853982 }
 0x206   : > { %v4880_v45 = vpop.eup %4879  ;;  %v2283_v3 = vsel %vm2275_vm5, %v2262_v55, %v2265_v30  ;;  %v2285_v34 = vsel %vm2277_vm12, %v2268_v33, %v2284_v37  ;;  %v2289_v43 = vsel %vm2277_vm12, %v2271_v32, %v2288_v14  ;;  %v2282_v53 = vsel %vm2276_vm4, %v2279_v13, %v2281_v9 }
 0x207   : > { %v4882_v1 = vpop.eup %4881  ;;  %v2135_v54 = vxor.u32 2147483648, %v4880_v45  ;;  %vm4479_vm15 = vcmp.lt.s32.totalorder %v4478_v59, 0  ;;  %v2290_v60 = vsel %vm2276_vm4, %v2287_v50, %v2289_v43  ;;  %v4484_v19 = vadd.s32 4294967169, %v2143_v12 }
 0x208   : > { %v2132_v22 = vxor.u32 2147483648, %v4882_v1  ;;  %v2002_v11 = vsel %vm4479_vm15, 0, %v4478_v59  ;;  %v2286_v56 = vsel %vm2276_vm4, %v2283_v3, %v2285_v34  ;;  %v2147_v50 = vor.u32 8388608, %v2146_v4 }
 0x209   : > { %v2136_v39 = vsel %vm2134_vm13, %v2135_v54, %v4882_v1  ;;  %v3788_v17 = vsel %vm3786_vm1, %v2135_v54, %v4882_v1  ;;  %v2003_v20 = vsub.s32 32, %v2002_v11  ;;  %v2004_v30 = vshll.u32 %v6648_v63, %v2002_v11 }
 0x20a   : > { %v2133_v0 = vsel %vm2131_vm2, %v4880_v45, %v2132_v22  ;;  %v3785_v46 = vsel %vm3783_vm3, %v4880_v45, %v2132_v22  ;;  %v2007_v26 = vsub.s32 4294967266, %v2002_v11  ;;  %v2149_v12 = vadd.s32 1, %v4484_v19 }
 0x20b   : > { %v2137_v33 = vsel %vm2130_vm6, %v2133_v0, %v2136_v39  ;;  %v3789_v32 = vsel %vm3782_vm7, %v3785_v46, %v3788_v17  ;;  %v2005_v31 = vshrl.u32 %v1987_v5, %v2003_v20  ;;  %v834_v5 = vadd.s32 120, %v5199_v42 }
 0x20c   : > { %v2138_v49 = vsel %vm2127_vm9, nan, %v2137_v33  ;;  %v3790_v55 = vsel %vm2127_vm9, nan, %v3789_v32  ;;  %v2008_v63 = vadd.s32 127, %v2007_v26  ;;  %vm2150_vm14 = vcmp.gt.s32.totalorder %v2149_v12, 0 }
 0x20d   : > { %v4220_v28 = vsel %vm4208_vm10, %v2138_v49, %v3790_v55  ;;  %v6723_v57 = vmul.u32.u64.low %v6663_v62, %v2290_v60  ;;  %v6724_v35 = vmul.u32.u64.high %v6663_v62, %v2290_v60, %v6723_v57  ;;  %v2006_v13 = vor.u32 %v2005_v31, %v2004_v30 }
 0x20e   : > { %v4236_v29 = vadd.f32 %v4220_v28, %v6292_v21  ;;  %v6728_v52 = vmul.u32.u64.low %v6663_v62, %v2286_v56  ;;  %v6729_v37 = vmul.u32.u64.high %v6663_v62, %v2286_v56, %v6728_v52  ;;  %v2009_v10 = vshll.u32 %v2008_v63, 23 }
 0x20f   : > { %v2020_v45 = vsel %vm6687_vm0, 0, %v2018_v61  ;;  %v2151_v59 = vsel %vm2150_vm14, %v2149_v12, 0  ;;  %v6738_v9 = vadd.f32 %v6638_v23, %v6644_v15  ;;  %v2013_v14 = vcvt.s32.f32 %v2006_v13 }
 0x210   : > { %4252 = vst [vmem:[%s6133_s27 + $0x58] sm:$0xff] %v4236_v29  ;;  %v2010_v21 = vor.u32 4788187, %v2009_v10  ;;  %v2298_v1 = vmul.u32 %v6663_v62, %v2282_v53  ;;  %vm2300_vm13 = vc.u32 %v6724_v35, %v6728_v52  ;;  %v2301_v4 = vadd.s32 1, %v6729_v37 }
 0x211   : > { %v6744_v54 = vshrl.u32 %v2151_v59, 5  ;;  %v2153_v3 = vand.u32 31, %v2151_v59  ;;  %v833_v34 = vadd.s32 112, %v5199_v42  ;;  %v2024_v43 = vadd.s32 3, %v2020_v45 }
 0x212   : > { %v2011_v61 = vand.u32 2147483647, %v2010_v21  ;;  %v6747_v22 = vshll.u32 %v2147_v50, 8  ;;  %v851_v23 = vadd.s32 %v5209_v51, %v834_v5  ;;  %v2302_v15 = vsel %vm2300_vm13, %v2301_v4, %v6729_v37 }
 0x213   : > { %v2154_v60 = vsub.s32 32, %v2153_v3  ;;  %v2156_v62 = vshll.u32 %v5005_v44, %v2153_v3  ;;  %v2159_v53 = vshll.u32 %v7160_v24, %v2153_v3  ;;  %v2303_v17 = vadd.s32 %v2302_v15, %v2298_v1 }
 0x214   : > { %v2014_v39 = vmul.f32 %v2013_v14, %v2011_v61  ;;  %v2162_v11 = vshll.u32 %v7150_v38, %v2153_v3  ;;  %v2165_v19 = vshll.u32 %v7149_v27, %v2153_v3  ;;  %vm2171_vm1 = vcmp.lt.s32.totalorder %v6744_v54, 1 }
 0x215   : > { %v2157_v42 = vshrl.u32 %v7160_v24, %v2154_v60  ;;  %v2160_v0 = vshrl.u32 %v7150_v38, %v2154_v60  ;;  %v2163_v46 = vshrl.u32 %v7149_v27, %v2154_v60  ;;  %v2304_v30 = vadd.s32 536870912, %v2303_v17 }
 0x216   : > { %v2015_v20 = vxor.u32 2147483648, %v2014_v39  ;;  %v2166_v33 = vshrl.u32 %v5009_v41, %v2154_v60  ;;  %v2168_v32 = vshll.u32 %v5009_v41, %v2153_v3  ;;  %v2169_v55 = vshrl.u32 %v5010_v8, %v2154_v60 }
 0x217   : > { %v2158_v26 = vor.u32 %v2157_v42, %v2156_v62  ;;  %v2161_v56 = vor.u32 %v2160_v0, %v2159_v53  ;;  %v2164_v49 = vor.u32 %v2163_v46, %v2162_v11  ;;  %v2305_v12 = vshrl.u32 %v2304_v30, 30 }
 0x218   : > { %v2016_v31 = vsel %vm1933_vm8, %v2015_v20, %v2014_v39  ;;  %v2167_v28 = vor.u32 %v2166_v33, %v2165_v19  ;;  %vm2174_vm2 = vcmp.lt.s32.totalorder %v6744_v54, 4  ;;  %v2155_v57 = vshrl.u32 %v5005_v44, %v2154_v60  ;;  %v4905_v39 = vld [vmem:[%s7125_s4] ss:$0 sm:$0xff] }
 0x219   : > { %v2019_v63 = vsel %vm6687_vm0, %v6458_v40, %v2016_v31  ;;  %v2170_v29 = vor.u32 %v2169_v55, %v2168_v32  ;;  %vm2173_vm3 = vcmp.lt.s32.totalorder %v6744_v54, 3  ;;  %v2306_v13 = vshll.u32 %v2305_v12, 30 }
 0x21a   : > { %4883 = vcosq.f32 %v2019_v63  ;;  %vm2172_vm6 = vcmp.lt.s32.totalorder %v6744_v54, 2  ;;  %v2176_v37 = vsel %vm2174_vm2, %v2164_v49, 2102212464  ;;  %v2179_v10 = vsel %vm2171_vm1, %v2158_v26, %v2161_v56 }
 0x21b   : > { %4885 = vsinq.f32 %v2019_v63  ;;  %v2180_v16 = vsel %vm2174_vm2, %v2167_v28, 920167782  ;;  %v867_v50 = vcvt.s32.f32 %v851_v23  ;;  %v3678_v5 = vand.u32 3, %v2020_v45 }
 0x21c   : > { %v6777_v59 = vsub.s32 %v2303_v17, %v2306_v13  ;;  %v2181_v21 = vsel %vm2173_vm3, %v2164_v49, %v2180_v16  ;;  %v2183_v14 = vsel %vm2171_vm1, %v2161_v56, %v2164_v49  ;;  %v2175_v1 = vsel %vm2171_vm1, %v2155_v57, %v2158_v26 }
 0x21d   : > { %v2177_v4 = vsel %vm2173_vm3, %v2161_v56, %v2176_v37  ;;  %v2182_v3 = vsel %vm2172_vm6, %v2179_v10, %v2181_v21  ;;  %v2184_v45 = vsel %vm2174_vm2, %v2170_v29, 1326507024  ;;  %v2025_v61 = vand.u32 3, %v2024_v43 }
 0x21e   : > { %v2309_v23 = vsub.s32 0, %v6777_v59  ;;  %v2185_v15 = vsel %vm2173_vm3, %v2167_v28, %v2184_v45  ;;  %vm2023_vm8 = vweird.f32 %v6458_v40  ;;  %v6805_v43 = vmul.f32 %v4905_v39, %v867_v50 }
 0x21f   : > { %v2186_v60 = vsel %vm2172_vm6, %v2183_v14, %v2185_v15  ;;  %v6798_v62 = vmul.u32.u64.low %v6747_v22, %v2182_v3  ;;  %v6799_v53 = vmul.u32.u64.high %v6747_v22, %v2182_v3, %v6798_v62  ;;  %vm2245_vm7 = vcmp.lt.s32.totalorder %v6534_v18, 0 }
 0x220   : > { %v4489_v17 = vmin.u32 %v2309_v23, %v6777_v59  ;;  %v2178_v11 = vsel %vm2172_vm6, %v2175_v1, %v2177_v4  ;;  %v850_v19 = vadd.s32 %v5209_v51, %v833_v34  ;;  %vm3679_vm9 = vcmp.lt.s32.totalorder %v3678_v5, 2 }
 0x221   : > { %v2329_v42 = vsub.s32 4, %v2305_v12  ;;  %v6813_v0 = vmul.u32.u64.low %v6747_v22, %v2186_v60  ;;  %v6814_v46 = vmul.u32.u64.high %v6747_v22, %v2186_v60, %v6813_v0  ;;  %vm2026_vm5 = vcmp.lt.s32.totalorder %v2025_v61, 2 }
 0x222   : > { %vm3680_vm11 = vcmp.eq.s32.totalorder %v3678_v5, 0  ;;  %vm3683_vm4 = vcmp.eq.s32.totalorder %v3678_v5, 2  ;;  %vm6818_vm12 = vcmp.le.f32.partialorder %v2243_v2, 0.7853982  ;;  %v2311_v30 = vclz %v4489_v17 }
 0x223   : > { %vm2027_vm0 = vcmp.eq.s32.totalorder %v2025_v61, 0  ;;  %v2194_v54 = vmul.u32 %v6747_v22, %v2178_v11  ;;  %v2197_v51 = vadd.s32 1, %v6799_v53  ;;  %v2454_v34 = vand.u32 2139095040, %v6805_v43 }
 0x224   : > { %v4884_v33 = vpop.eup %4883  ;;  %vm2030_vm15 = vcmp.eq.s32.totalorder %v2025_v61, 2  ;;  %v2299_v32 = vadd.s32 %v6728_v52, %v6724_v35  ;;  %v4490_v26 = vadd.s32 4294967294, %v2311_v30  ;;  %v866_v56 = vcvt.s32.f32 %v850_v19 }
 0x225   : > { %v4886_v49 = vpop.eup %4885  ;;  %v2031_v2 = vxor.u32 2147483648, %v4884_v33  ;;  %v2330_v55 = vsel %vm2245_vm7, %v2329_v42, %v2305_v12  ;;  %vm2196_vm14 = vc.u32 %v6814_v46, %v6798_v62  ;;  %v2451_v22 = vand.u32 2147483647, %v6805_v43 }
 0x226   : > { %v2028_v31 = vxor.u32 2147483648, %v4886_v49  ;;  %vm4491_vm13 = vcmp.lt.s32.totalorder %v4490_v26, 0  ;;  %v2198_v28 = vsel %vm2196_vm14, %v2197_v51, %v6799_v53  ;;  %v2455_v63 = vshrl.u32 %v2454_v34, 23 }
 0x227   : > { %v2032_v57 = vsel %vm2030_vm15, %v2031_v2, %v4886_v49  ;;  %v3685_v35 = vsel %vm3683_vm4, %v2031_v2, %v4886_v49  ;;  %v2314_v52 = vsel %vm4491_vm13, 0, %v4490_v26  ;;  %v2199_v29 = vadd.s32 %v2198_v28, %v2194_v54 }
 0x228   : > { %v2029_v13 = vsel %vm2027_vm0, %v4884_v33, %v2028_v31  ;;  %v3682_v37 = vsel %vm3680_vm11, %v4884_v33, %v2028_v31  ;;  %v2315_v12 = vsub.s32 32, %v2314_v52  ;;  %v2316_v10 = vshll.u32 %v6777_v59, %v2314_v52 }
 0x229   : > { %v2033_v16 = vsel %vm2026_vm5, %v2029_v13, %v2032_v57  ;;  %v3686_v50 = vsel %vm3679_vm9, %v3682_v37, %v3685_v35  ;;  %v2319_v21 = vsub.s32 4294967266, %v2314_v52  ;;  %v2200_v14 = vadd.s32 536870912, %v2199_v29 }
 0x22a   : > { %v2034_v1 = vsel %vm2023_vm8, nan, %v2033_v16  ;;  %v3687_v4 = vsel %vm2023_vm8, nan, %v3686_v50  ;;  %v2317_v3 = vshrl.u32 %v2299_v32, %v2315_v12  ;;  %v4496_v45 = vadd.s32 4294967169, %v2455_v63 }
 0x22b   : > { %v4219_v23 = vsel %vm4208_vm10, %v2034_v1, %v3687_v4  ;;  %v2320_v15 = vadd.s32 127, %v2319_v21  ;;  %v2332_v59 = vsel %vm6818_vm12, 0, %v2330_v55  ;;  %v6847_v5 = vshrl.u32 %v2200_v14, 30 }
 0x22c   : > { %v4235_v61 = vadd.f32 %v4219_v23, %v6299_v36  ;;  %v2318_v60 = vor.u32 %v2317_v3, %v2316_v10  ;;  %v2458_v53 = vand.u32 8388607, %v2451_v22  ;;  %v2461_v17 = vadd.s32 1, %v4496_v45 }
 0x22d   : > { %v2321_v40 = vshll.u32 %v2320_v15, 23  ;;  %v2202_v11 = vshll.u32 %v6847_v5, 30  ;;  %v6853_v19 = vmul.f32 %v4905_v39, %v866_v56  ;;  %v2336_v42 = vadd.s32 3, %v2332_v59 }
 0x22e   : > { %4251 = vst [vmem:[%s6133_s27 + $0x50] sm:$0xff] %v4235_v61  ;;  %vm2462_vm1 = vcmp.gt.s32.totalorder %v2461_v17, 0  ;;  %v2325_v30 = vcvt.s32.f32 %v2318_v60  ;;  %v2459_v34 = vor.u32 8388608, %v2458_v53  ;;  %v6860_v49 = vand.u32 3, %v2332_v59 }
 0x22f   : > { %v2322_v0 = vor.u32 4788187, %v2321_v40  ;;  %v6856_v54 = vsub.s32 %v2199_v29, %v2202_v11  ;;  %v2463_v51 = vsel %vm2462_vm1, %v2461_v17, 0  ;;  %v2350_v26 = vand.u32 2139095040, %v6853_v19 }
 0x230   : > { %v2465_v36 = vand.u32 31, %v2463_v51  ;;  %v6863_v55 = vand.u32 3, %v2336_v42  ;;  %v2195_v31 = vadd.s32 %v6798_v62, %v6814_v46  ;;  %v6871_v52 = vshll.u32 %v2459_v34, 8 }
 0x231   : > { %v2323_v33 = vand.u32 2147483647, %v2322_v0  ;;  %v2205_v32 = vsub.s32 0, %v6856_v54  ;;  %v2464_v37 = vshrl.u32 %v2463_v51, 5  ;;  %v2351_v12 = vshrl.u32 %v2350_v26, 23 }
 0x232   : > { %v2466_v2 = vsub.s32 32, %v2465_v36  ;;  %v2468_v39 = vshll.u32 %v5005_v44, %v2465_v36  ;;  %v2471_v57 = vshll.u32 %v7160_v24, %v2465_v36  ;;  %v2474_v35 = vshll.u32 %v7150_v38, %v2465_v36 }
 0x233   : > { %v2326_v56 = vmul.f32 %v2325_v30, %v2323_v33  ;;  %v4485_v28 = vmin.u32 %v2205_v32, %v6856_v54  ;;  %v2477_v14 = vshll.u32 %v7149_v27, %v2465_v36  ;;  %v2480_v23 = vshll.u32 %v5009_v41, %v2465_v36 }
 0x234   : > { %v2469_v63 = vshrl.u32 %v7160_v24, %v2466_v2  ;;  %v2467_v10 = vshrl.u32 %v5005_v44, %v2466_v2  ;;  %v2472_v50 = vshrl.u32 %v7150_v38, %v2466_v2  ;;  %v2475_v62 = vshrl.u32 %v7149_v27, %v2466_v2 }
 0x235   : > { %v2327_v29 = vxor.u32 2147483648, %v2326_v56  ;;  %v2207_v13 = vclz %v4485_v28  ;;  %v2478_v1 = vshrl.u32 %v5009_v41, %v2466_v2  ;;  %v2481_v59 = vshrl.u32 %v5010_v8, %v2466_v2 }
 0x236   : > { %v2470_v16 = vor.u32 %v2469_v63, %v2468_v39  ;;  %v2473_v3 = vor.u32 %v2472_v50, %v2471_v57  ;;  %v2476_v45 = vor.u32 %v2475_v62, %v2474_v35  ;;  %vm2141_vm3 = vcmp.lt.s32.totalorder %v6634_v47, 0 }
 0x237   : > { %v2328_v46 = vsel %vm2245_vm7, %v2327_v29, %v2326_v56  ;;  %v4486_v21 = vadd.s32 4294967294, %v2207_v13  ;;  %v2479_v15 = vor.u32 %v2478_v1, %v2477_v14  ;;  %vm2483_vm6 = vcmp.lt.s32.totalorder %v2464_v37, 1 }
 0x238   : > { %v2331_v4 = vsel %vm6818_vm12, %v6534_v18, %v2328_v46  ;;  %vm2484_vm8 = vcmp.lt.s32.totalorder %v2464_v37, 2  ;;  %v2482_v17 = vor.u32 %v2481_v59, %v2480_v23  ;;  %vm3989_vm7 = vcmp.eq.s32.totalorder %v6860_v49, 0 }
 0x239   : > { %4887 = vcosq.f32 %v2331_v4  ;;  %vm4487_vm2 = vcmp.lt.s32.totalorder %v4486_v21, 0  ;;  %vm2485_vm9 = vcmp.lt.s32.totalorder %v2464_v37, 3  ;;  %vm2486_vm5 = vcmp.lt.s32.totalorder %v2464_v37, 4 }
 0x23a   : > { %4889 = vsinq.f32 %v2331_v4  ;;  %v2210_v61 = vsel %vm4487_vm2, 0, %v4486_v21  ;;  %v2487_v40 = vsel %vm2483_vm6, %v2467_v10, %v2470_v16  ;;  %v2491_v11 = vsel %vm2483_vm6, %v2470_v16, %v2473_v3 }
 0x23b   : > { %v2211_v60 = vsub.s32 32, %v2210_v61  ;;  %v2212_v53 = vshll.u32 %v6856_v54, %v2210_v61  ;;  %v2215_v20 = vsub.s32 4294967266, %v2210_v61  ;;  %vm3988_vm11 = vcmp.lt.s32.totalorder %v6860_v49, 2 }
 0x23c   : > { %vm6893_vm4 = vcmp.le.f32.partialorder %v2139_v48, 0.7853982  ;;  %v2488_v54 = vsel %vm2486_vm5, %v2476_v45, 2102212464  ;;  %v2492_v51 = vsel %vm2486_vm5, %v2479_v15, 920167782  ;;  %vm2335_vm12 = vweird.f32 %v6534_v18 }
 0x23d   : > { %v2213_v0 = vshrl.u32 %v2195_v31, %v2211_v60  ;;  %v2216_v30 = vadd.s32 127, %v2215_v20  ;;  %v2489_v34 = vsel %vm2485_vm9, %v2473_v3, %v2488_v54  ;;  %v2493_v36 = vsel %vm2485_vm9, %v2476_v45, %v2492_v51 }
 0x23e   : > { %v2495_v33 = vsel %vm2483_vm6, %v2473_v3, %v2476_v45  ;;  %v2496_v32 = vsel %vm2486_vm5, %v2482_v17, 1326507024  ;;  %v2225_v48 = vsub.s32 4, %v6847_v5  ;;  %v2494_v39 = vsel %vm2484_vm8, %v2491_v11, %v2493_v36 }
 0x23f   : > { %v2214_v26 = vor.u32 %v2213_v0, %v2212_v53  ;;  %v2217_v2 = vshll.u32 %v2216_v30, 23  ;;  %v2490_v56 = vsel %vm2484_vm8, %v2487_v40, %v2489_v34  ;;  %v2497_v31 = vsel %vm2485_vm9, %v2479_v15, %v2496_v32 }
 0x240   : > { %v6906_v28 = vmul.u32.u64.low %v6871_v52, %v2494_v39  ;;  %v6907_v63 = vmul.u32.u64.high %v6871_v52, %v2494_v39, %v6906_v28  ;;  %v2498_v29 = vsel %vm2484_vm8, %v2495_v33, %v2497_v31  ;;  %v4492_v13 = vadd.s32 4294967169, %v2351_v12 }
 0x241   : > { %v2218_v57 = vor.u32 4788187, %v2217_v2  ;;  %v2221_v35 = vcvt.s32.f32 %v2214_v26  ;;  %vm2338_vm0 = vcmp.lt.s32.totalorder %v6863_v55, 2  ;;  %vm3992_vm15 = vcmp.eq.s32.totalorder %v6860_v49, 2 }
 0x242   : > { %v6914_v10 = vmul.u32.u64.low %v6871_v52, %v2498_v29  ;;  %v6915_v16 = vmul.u32.u64.high %v6871_v52, %v2498_v29, %v6914_v10  ;;  %vm2342_vm14 = vcmp.eq.s32.totalorder %v6863_v55, 2  ;;  %v2226_v46 = vsel %vm2141_vm3, %v2225_v48, %v6847_v5 }
 0x243   : > { %v4888_v50 = vpop.eup %4887  ;;  %v2219_v62 = vand.u32 2147483647, %v2218_v57  ;;  %v2357_v21 = vadd.s32 1, %v4492_v13  ;;  %vm2339_vm13 = vcmp.eq.s32.totalorder %v6863_v55, 0  ;;  %v2506_v14 = vmul.u32 %v6871_v52, %v2490_v56 }
 0x244   : > { %v4890_v37 = vpop.eup %4889  ;;  %v2343_v12 = vxor.u32 2147483648, %v4888_v50  ;;  %v2509_v1 = vadd.s32 1, %v6907_v63  ;;  %v2347_v45 = vand.u32 2147483647, %v6853_v19  ;;  %v2228_v5 = vsel %vm6893_vm4, 0, %v2226_v46 }
 0x245   : > { %v2340_v4 = vxor.u32 2147483648, %v4890_v37  ;;  %v2222_v3 = vmul.f32 %v2221_v35, %v2219_v62  ;;  %vm2358_vm1 = vcmp.gt.s32.totalorder %v2357_v21, 0  ;;  %vm2508_vm2 = vc.u32 %v6915_v16, %v6906_v28 }
 0x246   : > { %v2344_v23 = vsel %vm2342_vm14, %v2343_v12, %v4890_v37  ;;  %v3994_v15 = vsel %vm3992_vm15, %v2343_v12, %v4890_v37  ;;  %v2510_v60 = vsel %vm2508_vm2, %v2509_v1, %v6907_v63  ;;  %v2359_v40 = vsel %vm2358_vm1, %v2357_v21, 0 }
 0x247   : > { %v2341_v59 = vsel %vm2339_vm13, %v4888_v50, %v2340_v4  ;;  %v3991_v52 = vsel %vm3989_vm7, %v4888_v50, %v2340_v4  ;;  %v2223_v61 = vxor.u32 2147483648, %v2222_v3  ;;  %v2511_v17 = vadd.s32 %v2510_v60, %v2506_v14 }
 0x248   : > { %v2345_v53 = vsel %vm2338_vm0, %v2341_v59, %v2344_v23  ;;  %v3995_v20 = vsel %vm3988_vm11, %v3991_v52, %v3994_v15  ;;  %v2232_v54 = vadd.s32 3, %v2228_v5  ;;  %v2361_v34 = vand.u32 31, %v2359_v40 }
 0x249   : > { %v2346_v11 = vsel %vm2335_vm12, nan, %v2345_v53  ;;  %v3996_v0 = vsel %vm2335_vm12, nan, %v3995_v20  ;;  %v2224_v30 = vsel %vm2141_vm3, %v2223_v61, %v2222_v3  ;;  %v2512_v51 = vadd.s32 536870912, %v2511_v17 }
 0x24a   : > { %v4222_v55 = vsel %vm4208_vm10, %v2346_v11, %v3996_v0  ;;  %v2227_v49 = vsel %vm6893_vm4, %v6634_v47, %v2224_v30  ;;  %v6950_v33 = vand.u32 3, %v2228_v5  ;;  %v2354_v32 = vand.u32 8388607, %v2347_v45 }
 0x24b   : > { %v4238_v36 = vadd.f32 %v4222_v55, %v6399_v25  ;;  %4891 = vcosq.f32 %v2227_v49  ;;  %v6952_v18 = vshrl.u32 %v2512_v51, 30  ;;  %v2362_v26 = vsub.s32 32, %v2361_v34 }
 0x24c   : > { %4893 = vsinq.f32 %v2227_v49  ;;  %v2233_v2 = vand.u32 3, %v2232_v54  ;;  %v6957_v48 = vshrl.u32 %v2359_v40, 5  ;;  %v2373_v42 = vshll.u32 %v7149_v27, %v2361_v34 }
 0x24d   : > { %4254 = vst [vmem:[%s6133_s27 + $0x68] sm:$0xff] %v4238_v36  ;;  %v2514_v39 = vshll.u32 %v6952_v18, 30  ;;  %v2364_v25 = vshll.u32 %v5005_v44, %v2361_v34  ;;  %v2365_v56 = vshrl.u32 %v7160_v24, %v2362_v26  ;;  %v2367_v31 = vshll.u32 %v7160_v24, %v2361_v34 }
 0x24e   : > { %vm3885_vm3 = vcmp.lt.s32.totalorder %v6950_v33, 2  ;;  %v2368_v63 = vshrl.u32 %v7150_v38, %v2362_v26  ;;  %v2370_v57 = vshll.u32 %v7150_v38, %v2361_v34  ;;  %v2371_v35 = vshrl.u32 %v7149_v27, %v2362_v26 }
 0x24f   : > { %v2374_v29 = vshrl.u32 %v5009_v41, %v2362_v26  ;;  %vm2231_vm6 = vweird.f32 %v6634_v47  ;;  %vm3886_vm8 = vcmp.eq.s32.totalorder %v6950_v33, 0  ;;  %vm3889_vm7 = vcmp.eq.s32.totalorder %v6950_v33, 2 }
 0x250   : > { %v2515_v13 = vsub.s32 %v2511_v17, %v2514_v39  ;;  %v2355_v10 = vor.u32 8388608, %v2354_v32  ;;  %vm2234_vm9 = vcmp.lt.s32.totalorder %v2233_v2, 2  ;;  %v2376_v50 = vshll.u32 %v5009_v41, %v2361_v34 }
 0x251   : > { %v2375_v24 = vor.u32 %v2374_v29, %v2373_v42  ;;  %v2377_v62 = vshrl.u32 %v5010_v8, %v2362_v26  ;;  %vm2235_vm5 = vcmp.eq.s32.totalorder %v2233_v2, 0  ;;  %v2366_v46 = vor.u32 %v2365_v56, %v2364_v25 }
 0x252   : > { %v2517_v38 = vsub.s32 0, %v2515_v13  ;;  %v2369_v27 = vor.u32 %v2368_v63, %v2367_v31  ;;  %v2363_v21 = vshrl.u32 %v5005_v44, %v2362_v26  ;;  %v2372_v37 = vor.u32 %v2371_v35, %v2370_v57 }
 0x253   : > { %vm2379_vm11 = vcmp.lt.s32.totalorder %v6957_v48, 1  ;;  %vm2382_vm4 = vcmp.lt.s32.totalorder %v6957_v48, 4  ;;  %vm2238_vm12 = vcmp.eq.s32.totalorder %v2233_v2, 2  ;;  %vm2381_vm0 = vcmp.lt.s32.totalorder %v6957_v48, 3 }
 0x254   : > { %v4497_v12 = vmin.u32 %v2517_v38, %v2515_v13  ;;  %v2395_v14 = vshll.u32 %v2355_v10, 8  ;;  %v2507_v41 = vadd.s32 %v6906_v28, %v6915_v16  ;;  %v2378_v8 = vor.u32 %v2377_v62, %v2376_v50 }
 0x255   : > { %v4892_v1 = vpop.eup %4891  ;;  %v2384_v4 = vsel %vm2382_vm4, %v2372_v37, 2102212464  ;;  %v2388_v44 = vsel %vm2382_vm4, %v2375_v24, 920167782  ;;  %vm2380_vm15 = vcmp.lt.s32.totalorder %v6957_v48, 2  ;;  %v2387_v5 = vsel %vm2379_vm11, %v2366_v46, %v2369_v27 }
 0x256   : > { %v4894_v3 = vpop.eup %4893  ;;  %v2239_v23 = vxor.u32 2147483648, %v4892_v1  ;;  %v2519_v15 = vclz %v4497_v12  ;;  %v2383_v52 = vsel %vm2379_vm11, %v2363_v21, %v2366_v46  ;;  %v2389_v28 = vsel %vm2381_vm0, %v2372_v37, %v2388_v44 }
 0x257   : > { %v2236_v59 = vxor.u32 2147483648, %v4894_v3  ;;  %v2391_v16 = vsel %vm2379_vm11, %v2369_v27, %v2372_v37  ;;  %v2385_v20 = vsel %vm2381_vm0, %v2369_v27, %v2384_v4  ;;  %v2390_v11 = vsel %vm2380_vm15, %v2387_v5, %v2389_v28 }
 0x258   : > { %v2240_v61 = vsel %vm2238_vm12, %v2239_v23, %v4894_v3  ;;  %v3891_v60 = vsel %vm3889_vm7, %v2239_v23, %v4894_v3  ;;  %v4498_v53 = vadd.s32 4294967294, %v2519_v15  ;;  %v2392_v0 = vsel %vm2382_vm4, %v2378_v8, 1326507024 }
 0x259   : > { %v2237_v17 = vsel %vm2235_vm5, %v4892_v1, %v2236_v59  ;;  %v3888_v40 = vsel %vm3886_vm8, %v4892_v1, %v2236_v59  ;;  %v2393_v55 = vsel %vm2381_vm0, %v2375_v24, %v2392_v0  ;;  %v2386_v39 = vsel %vm2380_vm15, %v2383_v52, %v2385_v20 }
 0x25a   : > { %v2241_v30 = vsel %vm2234_vm9, %v2237_v17, %v2240_v61  ;;  %v3892_v54 = vsel %vm3885_vm3, %v3888_v40, %v3891_v60  ;;  %vm4499_vm14 = vcmp.lt.s32.totalorder %v4498_v53, 0  ;;  %v2394_v36 = vsel %vm2380_vm15, %v2391_v16, %v2393_v55 }
 0x25b   : > { %v2242_v49 = vsel %vm2231_vm6, nan, %v2241_v30  ;;  %v3893_v51 = vsel %vm2231_vm6, nan, %v3892_v54  ;;  %v2522_v34 = vsel %vm4499_vm14, 0, %v4498_v53  ;;  %v2402_v10 = vmul.u32 %v2395_v14, %v2386_v39 }
 0x25c   : > { %v4221_v32 = vsel %vm4208_vm10, %v2242_v49, %v3893_v51  ;;  %v2523_v33 = vsub.s32 32, %v2522_v34  ;;  %v2524_v26 = vshll.u32 %v2515_v13, %v2522_v34  ;;  %v2527_v2 = vsub.s32 4294967266, %v2522_v34 }
 0x25d   : > { %v4237_v42 = vadd.f32 %v4221_v32, %v6483_v58  ;;  %v7021_v25 = vmul.u32.u64.low %v2395_v14, %v2394_v36  ;;  %v7022_v56 = vmul.u32.u64.high %v2395_v14, %v2394_v36, %v7021_v25  ;;  %v2537_v50 = vsub.s32 4, %v6952_v18 }
 0x25e   : > { %v2525_v47 = vshrl.u32 %v2507_v41, %v2523_v33  ;;  %v2528_v31 = vadd.s32 127, %v2527_v2  ;;  %v7024_v63 = vmul.u32.u64.low %v2395_v14, %v2390_v11  ;;  %v7025_v57 = vmul.u32.u64.high %v2395_v14, %v2390_v11, %v7024_v63 }
 0x25f   : > { %4253 = vst [vmem:[%s6133_s27 + $0x60] sm:$0xff] %v4237_v42  ;;  %vm2453_vm1 = vcmp.lt.s32.totalorder %v6805_v43, 0  ;;  %vm2452_vm2 = vcmp.le.f32.partialorder %v2451_v22, 0.7853982  ;;  %vm2543_vm3 = vweird.f32 %v6805_v43  ;;  %vm2349_vm12 = vcmp.lt.s32.totalorder %v6853_v19, 0 }
 0x260   : > { %v2526_v35 = vor.u32 %v2525_v47, %v2524_v26  ;;  %v2529_v29 = vshll.u32 %v2528_v31, 23  ;;  %vm2404_vm13 = vc.u32 %v7022_v56, %v7024_v63  ;;  %v2405_v58 = vadd.s32 1, %v7025_v57 }
 0x261   : > { %v2538_v37 = vsel %vm2453_vm1, %v2537_v50, %v6952_v18  ;;  %v2403_v16 = vadd.s32 %v7024_v63, %v7022_v56  ;;  %vm2348_vm0 = vcmp.le.f32.partialorder %v2347_v45, 0.7853982 }
 0x262   : > { %v2530_v13 = vor.u32 4788187, %v2529_v29  ;;  %v2533_v24 = vcvt.s32.f32 %v2526_v35  ;;  %v2406_v62 = vsel %vm2404_vm13, %v2405_v58, %v7025_v57  ;;  %v2540_v41 = vsel %vm2452_vm2, 0, %v2538_v37 }
 0x263   : > { %v2407_v38 = vadd.s32 %v2406_v62, %v2402_v10  ;;  %v2544_v44 = vadd.s32 3, %v2540_v41  ;;  %v4193_v5 = vand.u32 3, %v2540_v41 }
 0x264   : > { %v2531_v48 = vand.u32 2147483647, %v2530_v13 }
 0x265   : > { %v2408_v27 = vadd.s32 536870912, %v2407_v38  ;;  %v2545_v15 = vand.u32 3, %v2544_v44  ;;  %vm4195_vm8 = vcmp.eq.s32.totalorder %v4193_v5, 0  ;;  %vm4198_vm7 = vcmp.eq.s32.totalorder %v4193_v5, 2 }
 0x266   : > { %v2534_v46 = vmul.f32 %v2533_v24, %v2531_v48  ;;  %vm4194_vm4 = vcmp.lt.s32.totalorder %v4193_v5, 2 }
 0x267   : > { %v2409_v12 = vshrl.u32 %v2408_v27, 30  ;;  %vm2550_vm6 = vcmp.eq.s32.totalorder %v2545_v15, 2  ;;  %vm2547_vm9 = vcmp.eq.s32.totalorder %v2545_v15, 0  ;;  %vm2546_vm11 = vcmp.lt.s32.totalorder %v2545_v15, 2 }
 0x268   : > { %v2535_v21 = vxor.u32 2147483648, %v2534_v46 }
 0x269   : > { %v2410_v8 = vshll.u32 %v2409_v12, 30  ;;  %v2433_v56 = vsub.s32 4, %v2409_v12 }
 0x26a   : > { %v2536_v14 = vsel %vm2453_vm1, %v2535_v21, %v2534_v46 }
 0x26b   : > { %v2539_v1 = vsel %vm2452_vm2, %v6805_v43, %v2536_v14  ;;  %v2411_v4 = vsub.s32 %v2407_v38, %v2410_v8  ;;  %v2434_v31 = vsel %vm2349_vm12, %v2433_v56, %v2409_v12 }
 0x26c   : > { %4895 = vcosq.f32 %v2539_v1 }
 0x26d   : > { %4897 = vsinq.f32 %v2539_v1  ;;  %v2413_v3 = vsub.s32 0, %v2411_v4 }
 0x26f   : > { %v4493_v23 = vmin.u32 %v2413_v3, %v2411_v4 }
 0x271   : > { %v2415_v59 = vclz %v4493_v23 }
 0x273   : > { %v4494_v52 = vadd.s32 4294967294, %v2415_v59 }
 0x275   : > { %vm4495_vm5 = vcmp.lt.s32.totalorder %v4494_v52, 0 }
 0x276   : > { %v4896_v22 = vpop.eup %4895  ;;  %v2418_v60 = vsel %vm4495_vm5, 0, %v4494_v52 }
 0x277   : > { %v4898_v18 = vpop.eup %4897  ;;  %v2551_v28 = vxor.u32 2147483648, %v4896_v22  ;;  %v2419_v17 = vsub.s32 32, %v2418_v60  ;;  %v2420_v40 = vshll.u32 %v2411_v4, %v2418_v60  ;;  %v2423_v30 = vsub.s32 4294967266, %v2418_v60 }
 0x278   : > { %v2548_v61 = vxor.u32 2147483648, %v4898_v18 }
 0x279   : > { %v2552_v53 = vsel %vm2550_vm6, %v2551_v28, %v4898_v18  ;;  %v4200_v20 = vsel %vm4198_vm7, %v2551_v28, %v4898_v18  ;;  %v2421_v49 = vshrl.u32 %v2403_v16, %v2419_v17  ;;  %v2424_v36 = vadd.s32 127, %v2423_v30 }
 0x27a   : > { %v2549_v11 = vsel %vm2547_vm9, %v4896_v22, %v2548_v61  ;;  %v4197_v0 = vsel %vm4195_vm8, %v4896_v22, %v2548_v61  ;;  %vm2439_vm6 = vweird.f32 %v6853_v19 }
 0x27b   : > { %v2553_v54 = vsel %vm2546_vm11, %v2549_v11, %v2552_v53  ;;  %v4201_v55 = vsel %vm4194_vm4, %v4197_v0, %v4200_v20  ;;  %v2422_v33 = vor.u32 %v2421_v49, %v2420_v40  ;;  %v2425_v2 = vshll.u32 %v2424_v36, 23 }
 0x27c   : > { %v2554_v51 = vsel %vm2543_vm3, nan, %v2553_v54  ;;  %v4202_v34 = vsel %vm2543_vm3, nan, %v4201_v55 }
 0x27d   : > { %v4224_v32 = vsel %vm4208_vm10, %v2554_v51, %v4202_v34  ;;  %v2426_v42 = vor.u32 4788187, %v2425_v2  ;;  %v2429_v39 = vcvt.s32.f32 %v2422_v33 }
 0x27e   : > { %v4240_v26 = vadd.f32 %v4224_v32, %v6610_v6  ;;  %v2436_v6 = vsel %vm2348_vm0, 0, %v2434_v31 }
 0x27f   : > { %v2427_v25 = vand.u32 2147483647, %v2426_v42  ;;  %v2440_v35 = vadd.s32 3, %v2436_v6  ;;  %v4090_v10 = vand.u32 3, %v2436_v6 }
 0x280   : > { %4256 = vst [vmem:[%s6133_s27 + $0x78] sm:$0xff] %v4240_v26 }
 0x281   : > { %v2430_v47 = vmul.f32 %v2429_v39, %v2427_v25  ;;  %v2441_v29 = vand.u32 3, %v2440_v35  ;;  %vm4095_vm14 = vcmp.eq.s32.totalorder %v4090_v10, 2  ;;  %vm4092_vm1 = vcmp.eq.s32.totalorder %v4090_v10, 0 }
 0x282   : > { %vm4091_vm3 = vcmp.lt.s32.totalorder %v4090_v10, 2 }
 0x283   : > { %v2431_v43 = vxor.u32 2147483648, %v2430_v47  ;;  %vm2446_vm15 = vcmp.eq.s32.totalorder %v2441_v29, 2  ;;  %vm2443_vm13 = vcmp.eq.s32.totalorder %v2441_v29, 0  ;;  %vm2442_vm2 = vcmp.lt.s32.totalorder %v2441_v29, 2 }
 0x285   : > { %v2432_v63 = vsel %vm2349_vm12, %v2431_v43, %v2430_v47 }
 0x286   : > { %v2435_v57 = vsel %vm2348_vm0, %v6853_v19, %v2432_v63 }
 0x287   : > { %4899 = vcosq.f32 %v2435_v57 }
 0x288   : > { %4901 = vsinq.f32 %v2435_v57 }
 0x291   : > { %v4900_v13 = vpop.eup %4899 }
 0x292   : > { %v4902_v24 = vpop.eup %4901  ;;  %v2447_v45 = vxor.u32 2147483648, %v4900_v13 }
 0x293   : > { %v2444_v58 = vxor.u32 2147483648, %v4902_v24 }
 0x294   : > { %v2448_v48 = vsel %vm2446_vm15, %v2447_v45, %v4902_v24  ;;  %v4097_v50 = vsel %vm4095_vm14, %v2447_v45, %v4902_v24 }
 0x295   : > { %v2445_v62 = vsel %vm2443_vm13, %v4900_v13, %v2444_v58  ;;  %v4094_v38 = vsel %vm4092_vm1, %v4900_v13, %v2444_v58 }
 0x296   : > { %v2449_v46 = vsel %vm2442_vm2, %v2445_v62, %v2448_v48  ;;  %v4098_v27 = vsel %vm4091_vm3, %v4094_v38, %v4097_v50 }
 0x297   : > { %v2450_v21 = vsel %vm2439_vm6, nan, %v2449_v46  ;;  %v4099_v37 = vsel %vm2439_vm6, nan, %v4098_v27 }
 0x298   : > { %v4223_v12 = vsel %vm4208_vm10, %v2450_v21, %v4099_v37 }
 0x299   : > { %v4239_v19 = vadd.f32 %v4223_v12, %v6738_v9 }
 0x29b   : > { %4255 = vst [vmem:[%s6133_s27 + $0x70] sm:$0xff] %v4239_v19 }
 0x29c   : > { %4919 = shalt.err (!%p4916_p7)
}
 0x29d   : > { %s4920_s16 = scalar_lea.hbm %s7059_s14, 2048  ;;  %s4924_s21 = scalar_lea.hbm %s7126_s5, 8192 }
 0x29e   : > { %p4921_p9 = scmp.ne.s32.totalorder %s7059_s14, %s4920_s16  ;;  %p4925_p12 = scmp.lt.u32.totalorder %s7059_s14, %s7126_s5 }
 0x29f   : > { %p4926_p13 = scmp.lt.u32.totalorder %s4924_s21, %s4920_s16  ;;  %p4928_p1 = scmp.lt.u32.totalorder %s4920_s16, %s7059_s14 }
 0x2a0   : > { %p4922_p10 = pnand %p4921_p9, %p5095_p3 }
 0x2a1   : > { %p4927_p0 = por %p4926_p13, %p4925_p12 }
 0x2a2   : > { %p4923_p11 = pneg %p4922_p10 }
 0x2a3   : > { %p4929_p2 = por %p4928_p1, %p4927_p0 }
 0x2a5   : > { %p4930_p4 = pnand %p4929_p2, %p4923_p11 }
 0x2a7   : > { %4933 = shalt.err (!%p4930_p4)
}
 0x2a8   : > { %s5012_s12 = smov 128   ;;  %s5013_s13 = smov 8  }
 0x2a9   : > { %4755 = dma.vmem_to_hbm [thread:$0]  (%p5095_p3), %s7063_s22, 2048, %s7059_s14, %s7069_s15, %s5012_s12, %s5012_s12, %s5013_s13  }
 0x2aa PF: > { %p4761_p5 = scmp.ge.s32.totalorder %s5000_s25, 2  ;;  %s4288_s26 = sand.u32 1, %s4972_s18  }
 0x2ab   : > { %s4289_s30 = scalar_lea.sflag [#allocation3], %s4288_s26 }
 0x2ac   : > { %p4758_p6 = pnand %p4761_p5, %p5104_p8 }
 0x2ae   : > { %4967 = dma.done.wait (!%p4758_p6), %s4289_s30, 2048  }
 0x2af   : > { %4969 = vsyncadd (!%p4758_p6), %s4289_s30, 4294965248  ;;  %s18_s25 = sadd.s32 1, %s5000_s25   ;;  %s7176_s6 = sld [smem:[#allocation5_spill]] }
 0x2b0   : > { %p15_p7 = scmp.ge.s32.totalorder %s18_s25, 6   ;;  %s7177_s18 = smov %s4976_s19 }
 0x2b1   : > { %s7178_s19 = smov %s4980_s20  ;;  %s7179_s20 = smov %s5113_s11 }
 0x2b2   : > { %s7180_s21 = smov %s4992_s23  ;;  %s7181_s22 = smov %s4996_s24 }
 0x2b3   : > { %s7182_s23 = smov %s7185_s28  ;;  %17 = sbr.rel (!%p15_p7) target bundleno = 5 (0x5), region = 78 }
 0x2b5   : > { %s7183_s24 = smov %s7176_s6 }
 0x2ba   :  { %4294 = vsyncpa [#allocation3], 1 }
 0x2bb   :  { %4296 = vsyncpa [#allocation3 + $0x1], 1 }

</bundles_post_ra>
